<compile_context>
chip_gen: v5e
topology: v5e:2x2
jax: 0.10.0
libtpu: 0.0.40
codegen_flags: <defaults>
</compile_context>

<pallas_src>
import functools
import math

import jax
import jax.numpy as jnp
from jax import lax
from jax.experimental import pallas as pl
from jax.experimental.pallas import tpu as pltpu


def _round_up(x, m):
    return (x + m - 1) // m * m


def _vmem_limit_bytes(tq, tk, cp, cip):
    """Double-buffered tile footprint + temporaries, with headroom, capped
    well under the v7x 64 MiB/TC ceiling."""
    est = (4 * tq * cp * 4            # x (q, residual) + output, f32, x2 buf
           + 2 * tq * cip * 2         # theta tile, bf16, x2 buf
           + 4 * tk * cip * 2         # g + phi tiles, bf16, x2 buf
           + 2 * cip * cp * 2         # resident conv_mask weight
           + tq * (cip + 2) * 4       # online-softmax scratch (acc, m, l)
           + 4 * tq * tk * 4)         # logits / exp temporaries
    return min(max(2 * est + (8 << 20), 20 << 20), 40 << 20)


# ---------------------------------------------------------------------------
# Prologue: fused [theta | g | phi] projection, one pass over x per batch.
# ---------------------------------------------------------------------------
def _proj_kernel(x_ref, w_ref, b_ref, tgp_ref):
    """x_ref: (1, tp, Cp) f32, w_ref: (Cp, 3*Cip) bf16, b_ref: (1, 3*Cip) f32,
    tgp_ref: (1, 3, tp, Cip) bf16 -- theta / g / phi stacked on axis 1."""
    cip = tgp_ref.shape[-1]
    xb = x_ref[0].astype(jnp.bfloat16)
    y = (jnp.dot(xb, w_ref[...], preferred_element_type=jnp.float32)
         + b_ref[...])                                          # (tp, 3*Cip)
    tgp_ref[0, 0] = y[:, :cip].astype(jnp.bfloat16)             # theta
    tgp_ref[0, 1] = y[:, cip:2 * cip].astype(jnp.bfloat16)      # g
    tgp_ref[0, 2] = y[:, 2 * cip:].astype(jnp.bfloat16)         # phi


# ---------------------------------------------------------------------------
# Main flash-attention pass (online softmax over kv tiles).
# ---------------------------------------------------------------------------
def _flash_kernel(xq_ref, th_ref, g_ref, phi_ref, wm_ref, scalar_ref, o_ref,
                  m_sc, l_sc, acc_sc, *, tk, n_valid):
    """Grid (B, q_tiles, kv_tiles).
    xq_ref : (1, tq, Cp)     f32   residual slice of x (fetched once / q tile)
    th_ref : (1, 1, tq, Cip) bf16  precomputed theta tile
    g_ref  : (1, 1, tk, Cip) bf16  precomputed g tile
    phi_ref: (1, 1, tk, Cip) bf16  precomputed phi tile
    wm_ref : (Cip, Cp)       bf16  conv_mask weight (resident, no bias)
    scalar : (1, 1)          f32   learnable scalar (SMEM)
    o_ref  : (1, tq, Cp)     f32
    scratch: m (tq,1), l (tq,1), acc (tq,Cip)  -- f32 VMEM
    """
    ki = pl.program_id(2)

    @pl.when(ki == 0)
    def _init():
        m_sc[...] = jnp.full_like(m_sc, -jnp.inf)
        l_sc[...] = jnp.zeros_like(l_sc)
        acc_sc[...] = jnp.zeros_like(acc_sc)

    th = th_ref[0, 0]                       # (tq, Cip) bf16
    g = g_ref[0, 0]                         # (tk, Cip) bf16
    phi = phi_ref[0, 0]                     # (tk, Cip) bf16

    # logits = theta @ phi^T: contract the Ci axis of both operands so the
    # MXU consumes the transposed RHS natively (no XLU transpose).
    s = lax.dot_general(th, phi,
                        dimension_numbers=(((1,), (1,)), ((), ())),
                        preferred_element_type=jnp.float32)     # (tq, tk)

    if n_valid is not None:  # static branch: mask padded kv columns
        col = ki * tk + lax.broadcasted_iota(jnp.int32, s.shape, 1)
        s = jnp.where(col < n_valid, s, -jnp.inf)

    # Online softmax update (all f32 -- no bf16 exp, keeps v5e happy).
    m_new = jnp.maximum(m_sc[...], jnp.max(s, axis=-1, keepdims=True))
    alpha = jnp.exp(m_sc[...] - m_new)
    p = jnp.exp(s - m_new)
    l_sc[...] = alpha * l_sc[...] + jnp.sum(p, axis=-1, keepdims=True)
    acc_sc[...] = alpha * acc_sc[...] + jnp.dot(
        p.astype(jnp.bfloat16), g, preferred_element_type=jnp.float32)
    m_sc[...] = m_new

    @pl.when(ki == pl.num_programs(2) - 1)
    def _finalize():
        ctx = acc_sc[...] * pl.reciprocal(l_sc[...], approx=True)  # (tq, Cip)
        mask = jnp.dot(ctx.astype(jnp.bfloat16), wm_ref[...],
                       preferred_element_type=jnp.float32)         # (tq, Cp)
        o_ref[0] = scalar_ref[0, 0] * mask + xq_ref[0]


def self_att_layer(x_nchw, params, *, tq=None, tk=None):
    """Non-local block forward.  x_nchw: [B, C, H, W] f32 -> [B, C, H, W]."""
    B, C, H, W = x_nchw.shape
    N = H * W
    Ci = params["wg"].shape[1]

    Cp = _round_up(C, 128)      # lane-dense channel dim
    Cip = _round_up(Ci, 128)    # lane-dense inter-channel dim
    # TODO(synk): for deployments with C << 128 the Cp padding is a ~Cp/C tax
    # on the projection matmuls / writeback; acceptable here, revisit if the
    # real model uses tiny channel counts.

    # ---- tile selection (lane/MXU friendly, megacore aware) ----
    n_cap = _round_up(N, 128)
    tq = 256 if tq is None else max(8, _round_up(tq, 8))
    tk = 512 if tk is None else max(8, _round_up(tk, 8))
    tq = min(tq, n_cap)
    tk = min(tk, n_cap)
    # v7x megacore: keep B * q_tiles >= 2 so both TensorCores get work.
    while tq > 128 and B * ((N + tq - 1) // tq) < 2:
        tq //= 2
    Np = _round_up(N, math.lcm(tq, tk))
    n_valid = None if Np == N else N

    # ---- layout: NCHW -> [B, Np, Cp], zero-padded ----
    # TODO(synk): carry NHWC through the surrounding model to drop these two
    # wrapper transposes (pure layout plumbing outside the kernels).
    x_bnc = jnp.transpose(x_nchw, (0, 2, 3, 1)).reshape(B, N, C)
    x_p = jnp.pad(x_bnc, ((0, 0), (0, Np - N), (0, Cp - C)))

    def pad2(a, r, c):
        return jnp.pad(a, ((0, r - a.shape[0]), (0, c - a.shape[1])))

    # Fused [theta | g | phi] projection weights / biases.
    w_tgp = jnp.concatenate([pad2(params["wt"], Cp, Cip),
                             pad2(params["wg"], Cp, Cip),
                             pad2(params["wp"], Cp, Cip)],
                            axis=1).astype(jnp.bfloat16)
    b_tgp = jnp.concatenate([pad2(params["bt"], 1, Cip),
                             pad2(params["bg"], 1, Cip),
                             pad2(params["bp"], 1, Cip)], axis=1)
    wm = pad2(params["wm"], Cip, Cp).astype(jnp.bfloat16)
    scalar = params["scalar"].reshape(1, 1).astype(jnp.float32)

    # ---- prologue: project each token once, store bf16 [theta|g|phi] ----
    tp = tq
    tgp = pl.pallas_call(
        _proj_kernel,
        out_shape=jax.ShapeDtypeStruct((B, 3, Np, Cip), jnp.bfloat16),
        grid_spec=pltpu.PrefetchScalarGridSpec(
            num_scalar_prefetch=0,
            grid=(B, Np // tp),
            in_specs=[
                pl.BlockSpec((1, tp, Cp), lambda b, i: (b, i, 0)),
                pl.BlockSpec((Cp, 3 * Cip), lambda b, i: (0, 0)),
                pl.BlockSpec((1, 3 * Cip), lambda b, i: (0, 0)),
            ],
            out_specs=pl.BlockSpec((1, 3, tp, Cip), lambda b, i: (b, 0, i, 0)),
        ),
        compiler_params=pltpu.CompilerParams(
            dimension_semantics=("parallel", "parallel")),
    )(x_p, w_tgp, b_tgp)

    # ---- main flash pass ----
    grid = (B, Np // tq, Np // tk)
    kernel = functools.partial(_flash_kernel, tk=tk, n_valid=n_valid)
    full = lambda shape: pl.BlockSpec(shape, lambda b, qi, ki: (0, 0))

    out_p = pl.pallas_call(
        kernel,
        out_shape=jax.ShapeDtypeStruct((B, Np, Cp), jnp.float32),
        grid_spec=pltpu.PrefetchScalarGridSpec(
            num_scalar_prefetch=0,
            grid=grid,
            in_specs=[
                pl.BlockSpec((1, tq, Cp), lambda b, qi, ki: (b, qi, 0)),        # x (residual)
                pl.BlockSpec((1, 1, tq, Cip), lambda b, qi, ki: (b, 0, qi, 0)),  # theta
                pl.BlockSpec((1, 1, tk, Cip), lambda b, qi, ki: (b, 1, ki, 0)),  # g
                pl.BlockSpec((1, 1, tk, Cip), lambda b, qi, ki: (b, 2, ki, 0)),  # phi
                full((Cip, Cp)),                                                 # conv_mask W
                pl.BlockSpec(memory_space=pltpu.MemorySpace.SMEM),               # scalar
            ],
            out_specs=pl.BlockSpec((1, tq, Cp), lambda b, qi, ki: (b, qi, 0)),
            scratch_shapes=[
                pltpu.VMEM((tq, 1), jnp.float32),    # running max
                pltpu.VMEM((tq, 1), jnp.float32),    # running denominator
                pltpu.VMEM((tq, Cip), jnp.float32),  # output accumulator
            ],
        ),
        compiler_params=pltpu.CompilerParams(
            dimension_semantics=("parallel", "parallel", "arbitrary"),
            vmem_limit_bytes=_vmem_limit_bytes(tq, tk, Cp, Cip),
        ),
    )(x_p, tgp, tgp, tgp, wm, scalar)

    out = out_p[:, :N, :C]
    return jnp.transpose(out.reshape(B, H, W, C), (0, 3, 1, 2))


def _reference(x_nchw, params):
    """Plain-JAX f32 reference matching the PyTorch forward pass."""
    B, C, H, W = x_nchw.shape
    N = H * W
    x = jnp.transpose(x_nchw, (0, 2, 3, 1)).reshape(B, N, C)
    g = x @ params["wg"] + params["bg"]
    t = x @ params["wt"] + params["bt"]
    p = x @ params["wp"] + params["bp"]
    logits = jnp.einsum("bnc,bmc->bnm", t, p)
    attn = jax.nn.softmax(logits, axis=-1)
    ctx = jnp.einsum("bnm,bmc->bnc", attn, g)
    mask = ctx @ params["wm"]
    out = params["scalar"][0, 0] * mask + x
    return jnp.transpose(out.reshape(B, H, W, C), (0, 3, 1, 2))


def init_params(key, in_channels, reduction=2):
    """Deterministic synthetic init.  Shapes match the PyTorch module
    (1x1 conv weights stored as (in, out) matmul matrices).
    NOTE: the original init zeroes conv_mask and scalar (output == x); here we
    use small nonzero values so the attention path is actually exercised."""
    Ci = in_channels // reduction
    k = jax.random.split(key, 5)
    fan_in = in_channels
    std = (2.0 / fan_in) ** 0.5          # kaiming_normal_ (fan_in, relu gain)
    wg = std * jax.random.normal(k[0], (in_channels, Ci), jnp.float32)
    wt = std * jax.random.normal(k[1], (in_channels, Ci), jnp.float32)
    wp = std * jax.random.normal(k[2], (in_channels, Ci), jnp.float32)
    wm = 0.1 * jax.random.normal(k[3], (Ci, in_channels), jnp.float32)
    scalar = jnp.full((1, 1), 0.5, jnp.float32)
    zeros_b = jnp.zeros((1, Ci), jnp.float32)
    return {"wg": wg, "bg": zeros_b, "wt": wt, "bt": zeros_b,
            "wp": wp, "bp": zeros_b, "wm": wm, "scalar": scalar}


if __name__ == "__main__":
    key = jax.random.PRNGKey(0)
    kx, kp, kx3 = jax.random.split(key, 3)

    B, C, H, W = 2, 4, 16, 16
    x = jax.random.normal(kx, (B, C, H, W), jnp.float32)
    params = init_params(kp, in_channels=C, reduction=2)
    ref = _reference(x, params)

    # 1) Default tiles: whole (padded) sequence fits one kv tile -> the kv
    #    grid axis collapses and the softmax is effectively single-pass.
    out1 = jax.block_until_ready(jax.jit(self_att_layer)(x, params))
    assert out1.shape == (B, C, H, W)
    err1 = float(jnp.max(jnp.abs(out1 - ref)))
    assert err1 < 5e-2, f"default-tile mismatch: max abs err {err1}"

    # 2) Small tiles: forces the multi-tile online-softmax path
    #    (N = 256 -> grid (2, 2, 2)).
    fn2 = jax.jit(functools.partial(self_att_layer, tq=128, tk=128))
    out2 = jax.block_until_ready(fn2(x, params))
    err2 = float(jnp.max(jnp.abs(out2 - ref)))
    assert err2 < 5e-2, f"online-softmax mismatch: max abs err {err2}"

    # 3) Awkward N (10x10 = 100): exercises the padded-kv masking path.
    x3 = jax.random.normal(kx3, (B, C, 10, 10), jnp.float32)
    out3 = jax.block_until_ready(jax.jit(self_att_layer)(x3, params))
    ref3 = _reference(x3, params)
    err3 = float(jnp.max(jnp.abs(out3 - ref3)))
    assert err3 < 5e-2, f"masked-padding mismatch: max abs err {err3}"

    print("KERNEL_OK")
</pallas_src>

<mosaic_0001>
module attributes {stable_mosaic.version = 11 : i64} {
  func.func @_proj_kernel(%arg0: i32, %arg1: i32, %arg2: memref<1x256x128xf32, #tpu.memory_space<vmem>>, %arg3: memref<128x384xbf16, #tpu.memory_space<vmem>>, %arg4: memref<1x384xf32, #tpu.memory_space<vmem>>, %arg5: memref<1x3x256x128xbf16, #tpu.memory_space<vmem>>) attributes {dimension_semantics = [#tpu.dimension_semantics<parallel>, #tpu.dimension_semantics<parallel>], iteration_bounds = array<i64: 2, 1>, scalar_prefetch = 0 : i64, scratch_operands = 0 : i64, tpu.core_type = #tpu.core_type<tc>, window_params = [{transform_indices = @transform_0, window_bounds = array<i64: 1, 256, 128>}, {pipeline_mode = #tpu.pipeline_mode<synchronous>, transform_indices = @transform_1, window_bounds = array<i64: 128, 384>}, {pipeline_mode = #tpu.pipeline_mode<synchronous>, transform_indices = @transform_2, window_bounds = array<i64: 1, 384>}, {transform_indices = @transform_3, window_bounds = array<i64: 1, 3, 256, 128>}]} {
    %c0 = arith.constant 0 : index
    %c0_0 = arith.constant 0 : index
    %c0_1 = arith.constant 0 : index
    %0 = vector.load %arg2[%c0, %c0_0, %c0_1] : memref<1x256x128xf32, #tpu.memory_space<vmem>>, vector<1x256x128xf32>
    %1 = vector.shape_cast %0 : vector<1x256x128xf32> to vector<256x128xf32>
    %2 = arith.truncf %1 : vector<256x128xf32> to vector<256x128xbf16>
    %c0_2 = arith.constant 0 : index
    %c0_3 = arith.constant 0 : index
    %3 = vector.load %arg3[%c0_2, %c0_3] : memref<128x384xbf16, #tpu.memory_space<vmem>>, vector<128x384xbf16>
    %cst = arith.constant dense<0.000000e+00> : vector<256x384xf32>
    %4 = tpu.matmul %2, %3, %cst {dimension_numbers = #tpu.dot_dimension_numbers<[1], [0], [0], [1], [0, 0, 1, 1], [], []>} : vector<256x128xbf16>, vector<128x384xbf16>, vector<256x384xf32> -> vector<256x384xf32>
    %c0_4 = arith.constant 0 : index
    %c0_5 = arith.constant 0 : index
    %5 = vector.load %arg4[%c0_4, %c0_5] : memref<1x384xf32, #tpu.memory_space<vmem>>, vector<1x384xf32>
    %6 = vector.broadcast %5 : vector<1x384xf32> to vector<256x384xf32>
    %7 = arith.addf %4, %6 : vector<256x384xf32>
    %8 = vector.extract_strided_slice %7 {offsets = [0, 0], sizes = [256, 128], strides = [1, 1]} : vector<256x384xf32> to vector<256x128xf32>
    %9 = arith.truncf %8 : vector<256x128xf32> to vector<256x128xbf16>
    %c0_6 = arith.constant 0 : index
    %c0_7 = arith.constant 0 : index
    %c0_8 = arith.constant 0 : index
    %c0_9 = arith.constant 0 : index
    %10 = vector.load %arg5[%c0_6, %c0_7, %c0_8, %c0_9] : memref<1x3x256x128xbf16, #tpu.memory_space<vmem>>, vector<1x1x256x128xbf16>
    %11 = vector.shape_cast %10 : vector<1x1x256x128xbf16> to vector<256x128xbf16>
    %12 = vector.shape_cast %9 : vector<256x128xbf16> to vector<1x1x256x128xbf16>
    tpu.vector_store %arg5[%c0_6, %c0_7, %c0_8, %c0_9], %12 {strides = array<i32>} : memref<1x3x256x128xbf16, #tpu.memory_space<vmem>>, vector<1x1x256x128xbf16>,
    %13 = vector.extract_strided_slice %7 {offsets = [0, 128], sizes = [256, 128], strides = [1, 1]} : vector<256x384xf32> to vector<256x128xf32>
    %14 = arith.truncf %13 : vector<256x128xf32> to vector<256x128xbf16>
    %c0_10 = arith.constant 0 : index
    %c1 = arith.constant 1 : index
    %c0_11 = arith.constant 0 : index
    %c0_12 = arith.constant 0 : index
    %15 = vector.load %arg5[%c0_10, %c1, %c0_11, %c0_12] : memref<1x3x256x128xbf16, #tpu.memory_space<vmem>>, vector<1x1x256x128xbf16>
    %16 = vector.shape_cast %15 : vector<1x1x256x128xbf16> to vector<256x128xbf16>
    %17 = vector.shape_cast %14 : vector<256x128xbf16> to vector<1x1x256x128xbf16>
    tpu.vector_store %arg5[%c0_10, %c1, %c0_11, %c0_12], %17 {strides = array<i32>} : memref<1x3x256x128xbf16, #tpu.memory_space<vmem>>, vector<1x1x256x128xbf16>,
    %18 = vector.extract_strided_slice %7 {offsets = [0, 256], sizes = [256, 128], strides = [1, 1]} : vector<256x384xf32> to vector<256x128xf32>
    %19 = arith.truncf %18 : vector<256x128xf32> to vector<256x128xbf16>
    %c0_13 = arith.constant 0 : index
    %c2 = arith.constant 2 : index
    %c0_14 = arith.constant 0 : index
    %c0_15 = arith.constant 0 : index
    %20 = vector.load %arg5[%c0_13, %c2, %c0_14, %c0_15] : memref<1x3x256x128xbf16, #tpu.memory_space<vmem>>, vector<1x1x256x128xbf16>
    %21 = vector.shape_cast %20 : vector<1x1x256x128xbf16> to vector<256x128xbf16>
    %22 = vector.shape_cast %19 : vector<256x128xbf16> to vector<1x1x256x128xbf16>
    tpu.vector_store %arg5[%c0_13, %c2, %c0_14, %c0_15], %22 {strides = array<i32>} : memref<1x3x256x128xbf16, #tpu.memory_space<vmem>>, vector<1x1x256x128xbf16>,
    return
  }
  func.func @transform_0(%arg0: i32, %arg1: i32) -> (i32, i32, i32) {
    %c0_i32 = arith.constant 0 : i32
    %c0_i32_0 = arith.constant 0 : i32
    return %arg0, %arg1, %c0_i32 : i32, i32, i32
  }
  func.func @transform_1(%arg0: i32, %arg1: i32) -> (i32, i32) {
    %c0_i32 = arith.constant 0 : i32
    %c0_i32_0 = arith.constant 0 : i32
    %c0_i32_1 = arith.constant 0 : i32
    return %c0_i32, %c0_i32_0 : i32, i32
  }
  func.func @transform_2(%arg0: i32, %arg1: i32) -> (i32, i32) {
    %c0_i32 = arith.constant 0 : i32
    %c0_i32_0 = arith.constant 0 : i32
    %c0_i32_1 = arith.constant 0 : i32
    return %c0_i32, %c0_i32_0 : i32, i32
  }
  func.func @transform_3(%arg0: i32, %arg1: i32) -> (i32, i32, i32, i32) {
    %c0_i32 = arith.constant 0 : i32
    %c0_i32_0 = arith.constant 0 : i32
    %c0_i32_1 = arith.constant 0 : i32
    return %arg0, %c0_i32, %arg1, %c0_i32_0 : i32, i32, i32, i32
  }
}

module attributes {stable_mosaic.version = 11 : i64} {
  func.func @_flash_kernel(%arg0: i32, %arg1: i32, %arg2: i32, %arg3: memref<1x256x128xf32, #tpu.memory_space<vmem>>, %arg4: memref<1x1x256x128xbf16, #tpu.memory_space<vmem>>, %arg5: memref<1x1x256x128xbf16, #tpu.memory_space<vmem>>, %arg6: memref<1x1x256x128xbf16, #tpu.memory_space<vmem>>, %arg7: memref<128x128xbf16, #tpu.memory_space<vmem>>, %arg8: memref<1x1xf32, #tpu.memory_space<smem>>, %arg9: memref<1x256x128xf32, #tpu.memory_space<vmem>>, %arg10: memref<256x1xf32, #tpu.memory_space<vmem>>, %arg11: memref<256x1xf32, #tpu.memory_space<vmem>>, %arg12: memref<256x128xf32, #tpu.memory_space<vmem>>) attributes {dimension_semantics = [#tpu.dimension_semantics<parallel>, #tpu.dimension_semantics<parallel>, #tpu.dimension_semantics<arbitrary>], iteration_bounds = array<i64: 2, 1, 1>, scalar_prefetch = 0 : i64, scratch_operands = 3 : i64, tpu.core_type = #tpu.core_type<tc>, window_params = [{transform_indices = @transform_0, window_bounds = array<i64: 1, 256, 128>}, {transform_indices = @transform_1, window_bounds = array<i64: 1, 1, 256, 128>}, {transform_indices = @transform_2, window_bounds = array<i64: 1, 1, 256, 128>}, {transform_indices = @transform_3, window_bounds = array<i64: 1, 1, 256, 128>}, {pipeline_mode = #tpu.pipeline_mode<synchronous>, transform_indices = @transform_4, window_bounds = array<i64: 128, 128>}, {transform_indices = @transform_5, window_bounds = array<i64: 1, 1>}, {transform_indices = @transform_6, window_bounds = array<i64: 1, 256, 128>}]} {
    %c0_i32 = arith.constant 0 : i32
    %0 = arith.cmpi eq, %arg2, %c0_i32 : i32
    %1 = arith.extui %0 : i1 to i32
    %c0_i32_0 = arith.constant 0 : i32
    %2 = arith.cmpi ne, %1, %c0_i32_0 : i32
    scf.if %2 {
      %cst_31 = arith.constant 0xFF800000 : f32
      %37 = vector.broadcast %cst_31 : f32 to vector<256x1xf32>
      %c0_32 = arith.constant 0 : index
      %c0_33 = arith.constant 0 : index
      %38 = vector.load %arg10[%c0_32, %c0_33] : memref<256x1xf32, #tpu.memory_space<vmem>>, vector<256x1xf32>
      tpu.vector_store %arg10[%c0_32, %c0_33], %37 {strides = array<i32>} : memref<256x1xf32, #tpu.memory_space<vmem>>, vector<256x1xf32>,
      %cst_34 = arith.constant 0.000000e+00 : f32
      %39 = vector.broadcast %cst_34 : f32 to vector<256x1xf32>
      %c0_35 = arith.constant 0 : index
      %c0_36 = arith.constant 0 : index
      %40 = vector.load %arg11[%c0_35, %c0_36] : memref<256x1xf32, #tpu.memory_space<vmem>>, vector<256x1xf32>
      tpu.vector_store %arg11[%c0_35, %c0_36], %39 {strides = array<i32>} : memref<256x1xf32, #tpu.memory_space<vmem>>, vector<256x1xf32>,
      %cst_37 = arith.constant 0.000000e+00 : f32
      %41 = vector.broadcast %cst_37 : f32 to vector<256x128xf32>
      %c0_38 = arith.constant 0 : index
      %c0_39 = arith.constant 0 : index
      %42 = vector.load %arg12[%c0_38, %c0_39] : memref<256x128xf32, #tpu.memory_space<vmem>>, vector<256x128xf32>
      tpu.vector_store %arg12[%c0_38, %c0_39], %41 {strides = array<i32>} : memref<256x128xf32, #tpu.memory_space<vmem>>, vector<256x128xf32>,
    } else {
    }
    %c0 = arith.constant 0 : index
    %c0_1 = arith.constant 0 : index
    %c0_2 = arith.constant 0 : index
    %c0_3 = arith.constant 0 : index
    %3 = vector.load %arg4[%c0, %c0_1, %c0_2, %c0_3] : memref<1x1x256x128xbf16, #tpu.memory_space<vmem>>, vector<1x1x256x128xbf16>
    %4 = vector.shape_cast %3 : vector<1x1x256x128xbf16> to vector<256x128xbf16>
    %c0_4 = arith.constant 0 : index
    %c0_5 = arith.constant 0 : index
    %c0_6 = arith.constant 0 : index
    %c0_7 = arith.constant 0 : index
    %5 = vector.load %arg5[%c0_4, %c0_5, %c0_6, %c0_7] : memref<1x1x256x128xbf16, #tpu.memory_space<vmem>>, vector<1x1x256x128xbf16>
    %6 = vector.shape_cast %5 : vector<1x1x256x128xbf16> to vector<256x128xbf16>
    %c0_8 = arith.constant 0 : index
    %c0_9 = arith.constant 0 : index
    %c0_10 = arith.constant 0 : index
    %c0_11 = arith.constant 0 : index
    %7 = vector.load %arg6[%c0_8, %c0_9, %c0_10, %c0_11] : memref<1x1x256x128xbf16, #tpu.memory_space<vmem>>, vector<1x1x256x128xbf16>
    %8 = vector.shape_cast %7 : vector<1x1x256x128xbf16> to vector<256x128xbf16>
    %cst = arith.constant dense<0.000000e+00> : vector<256x256xf32>
    %9 = tpu.matmul %4, %8, %cst {dimension_numbers = #tpu.dot_dimension_numbers<[1], [1], [0], [0], [0, 0, 1, 0], [], []>} : vector<256x128xbf16>, vector<256x128xbf16>, vector<256x256xf32> -> vector<256x256xf32>
    %c0_12 = arith.constant 0 : index
    %c0_13 = arith.constant 0 : index
    %10 = vector.load %arg10[%c0_12, %c0_13] : memref<256x1xf32, #tpu.memory_space<vmem>>, vector<256x1xf32>
    %cst_14 = arith.constant dense<0xFF800000> : vector<256xf32>
    %11 = vector.multi_reduction <maximumf>, %9, %cst_14 [1] : vector<256x256xf32> to vector<256xf32>
    %12 = vector.shape_cast %11 : vector<256xf32> to vector<256x1xf32>
    %13 = arith.maximumf %10, %12 : vector<256x1xf32>
    %c0_15 = arith.constant 0 : index
    %c0_16 = arith.constant 0 : index
    %14 = vector.load %arg10[%c0_15, %c0_16] : memref<256x1xf32, #tpu.memory_space<vmem>>, vector<256x1xf32>
    %15 = arith.subf %14, %13 : vector<256x1xf32>
    %16 = math.exp %15 : vector<256x1xf32>
    %17 = vector.broadcast %13 : vector<256x1xf32> to vector<256x256xf32>
    %18 = arith.subf %9, %17 : vector<256x256xf32>
    %19 = math.exp %18 : vector<256x256xf32>
    %c0_17 = arith.constant 0 : index
    %c0_18 = arith.constant 0 : index
    %20 = vector.load %arg11[%c0_17, %c0_18] : memref<256x1xf32, #tpu.memory_space<vmem>>, vector<256x1xf32>
    %21 = arith.mulf %16, %20 : vector<256x1xf32>
    %cst_19 = arith.constant dense<0.000000e+00> : vector<256xf32>
    %22 = vector.multi_reduction <add>, %19, %cst_19 [1] : vector<256x256xf32> to vector<256xf32>
    %23 = vector.shape_cast %22 : vector<256xf32> to vector<256x1xf32>
    %24 = arith.addf %21, %23 : vector<256x1xf32>
    %c0_20 = arith.constant 0 : index
    %c0_21 = arith.constant 0 : index
    %25 = vector.load %arg11[%c0_20, %c0_21] : memref<256x1xf32, #tpu.memory_space<vmem>>, vector<256x1xf32>
    tpu.vector_store %arg11[%c0_20, %c0_21], %24 {strides = array<i32>} : memref<256x1xf32, #tpu.memory_space<vmem>>, vector<256x1xf32>,
    %c0_22 = arith.constant 0 : index
    %c0_23 = arith.constant 0 : index
    %26 = vector.load %arg12[%c0_22, %c0_23] : memref<256x128xf32, #tpu.memory_space<vmem>>, vector<256x128xf32>
    %27 = vector.broadcast %16 : vector<256x1xf32> to vector<256x128xf32>
    %28 = arith.mulf %27, %26 : vector<256x128xf32>
    %29 = arith.truncf %19 : vector<256x256xf32> to vector<256x256xbf16>
    %cst_24 = arith.constant dense<0.000000e+00> : vector<256x128xf32>
    %30 = tpu.matmul %29, %6, %cst_24 {dimension_numbers = #tpu.dot_dimension_numbers<[1], [0], [0], [1], [0, 0, 1, 1], [], []>} : vector<256x256xbf16>, vector<256x128xbf16>, vector<256x128xf32> -> vector<256x128xf32>
    %31 = arith.addf %28, %30 : vector<256x128xf32>
    %c0_25 = arith.constant 0 : index
    %c0_26 = arith.constant 0 : index
    %32 = vector.load %arg12[%c0_25, %c0_26] : memref<256x128xf32, #tpu.memory_space<vmem>>, vector<256x128xf32>
    tpu.vector_store %arg12[%c0_25, %c0_26], %31 {strides = array<i32>} : memref<256x128xf32, #tpu.memory_space<vmem>>, vector<256x128xf32>,
    %c0_27 = arith.constant 0 : index
    %c0_28 = arith.constant 0 : index
    %33 = vector.load %arg10[%c0_27, %c0_28] : memref<256x1xf32, #tpu.memory_space<vmem>>, vector<256x1xf32>
    tpu.vector_store %arg10[%c0_27, %c0_28], %13 {strides = array<i32>} : memref<256x1xf32, #tpu.memory_space<vmem>>, vector<256x1xf32>,
    %c0_i32_29 = arith.constant 0 : i32
    %34 = arith.cmpi eq, %arg2, %c0_i32_29 : i32
    %35 = arith.extui %34 : i1 to i32
    %c0_i32_30 = arith.constant 0 : i32
    %36 = arith.cmpi ne, %35, %c0_i32_30 : i32
    scf.if %36 {
      %c0_31 = arith.constant 0 : index
      %c0_32 = arith.constant 0 : index
      %37 = vector.load %arg12[%c0_31, %c0_32] : memref<256x128xf32, #tpu.memory_space<vmem>>, vector<256x128xf32>
      %c0_33 = arith.constant 0 : index
      %c0_34 = arith.constant 0 : index
      %38 = vector.load %arg11[%c0_33, %c0_34] : memref<256x1xf32, #tpu.memory_space<vmem>>, vector<256x1xf32>
      %39 = tpu.reciprocal %38 {approx = true} : vector<256x1xf32> -> vector<256x1xf32>
      %40 = vector.broadcast %39 : vector<256x1xf32> to vector<256x128xf32>
      %41 = arith.mulf %37, %40 : vector<256x128xf32>
      %42 = arith.truncf %41 : vector<256x128xf32> to vector<256x128xbf16>
      %c0_35 = arith.constant 0 : index
      %c0_36 = arith.constant 0 : index
      %43 = vector.load %arg7[%c0_35, %c0_36] : memref<128x128xbf16, #tpu.memory_space<vmem>>, vector<128x128xbf16>
      %cst_37 = arith.constant dense<0.000000e+00> : vector<256x128xf32>
      %44 = tpu.matmul %42, %43, %cst_37 {dimension_numbers = #tpu.dot_dimension_numbers<[1], [0], [0], [1], [0, 0, 1, 1], [], []>} : vector<256x128xbf16>, vector<128x128xbf16>, vector<256x128xf32> -> vector<256x128xf32>
      %c0_38 = arith.constant 0 : index
      %c0_39 = arith.constant 0 : index
      %45 = memref.load %arg8[%c0_38, %c0_39] : memref<1x1xf32, #tpu.memory_space<smem>>
      %46 = vector.broadcast %45 : f32 to vector<256x128xf32>
      %47 = arith.mulf %46, %44 : vector<256x128xf32>
      %c0_40 = arith.constant 0 : index
      %c0_41 = arith.constant 0 : index
      %c0_42 = arith.constant 0 : index
      %48 = vector.load %arg3[%c0_40, %c0_41, %c0_42] : memref<1x256x128xf32, #tpu.memory_space<vmem>>, vector<1x256x128xf32>
      %49 = vector.shape_cast %48 : vector<1x256x128xf32> to vector<256x128xf32>
      %50 = arith.addf %47, %49 : vector<256x128xf32>
      %c0_43 = arith.constant 0 : index
      %c0_44 = arith.constant 0 : index
      %c0_45 = arith.constant 0 : index
      %51 = vector.load %arg9[%c0_43, %c0_44, %c0_45] : memref<1x256x128xf32, #tpu.memory_space<vmem>>, vector<1x256x128xf32>
      %52 = vector.shape_cast %51 : vector<1x256x128xf32> to vector<256x128xf32>
      %53 = vector.shape_cast %50 : vector<256x128xf32> to vector<1x256x128xf32>
      tpu.vector_store %arg9[%c0_43, %c0_44, %c0_45], %53 {strides = array<i32>} : memref<1x256x128xf32, #tpu.memory_space<vmem>>, vector<1x256x128xf32>,
    } else {
    }
    return
  }
  func.func @transform_0(%arg0: i32, %arg1: i32, %arg2: i32) -> (i32, i32, i32) {
    %c0_i32 = arith.constant 0 : i32
    %c0_i32_0 = arith.constant 0 : i32
    return %arg0, %arg1, %c0_i32 : i32, i32, i32
  }
  func.func @transform_1(%arg0: i32, %arg1: i32, %arg2: i32) -> (i32, i32, i32, i32) {
    %c0_i32 = arith.constant 0 : i32
    %c0_i32_0 = arith.constant 0 : i32
    %c0_i32_1 = arith.constant 0 : i32
    return %arg0, %c0_i32, %arg1, %c0_i32_0 : i32, i32, i32, i32
  }
  func.func @transform_2(%arg0: i32, %arg1: i32, %arg2: i32) -> (i32, i32, i32, i32) {
    %c1_i32 = arith.constant 1 : i32
    %c0_i32 = arith.constant 0 : i32
    %c0_i32_0 = arith.constant 0 : i32
    return %arg0, %c1_i32, %arg2, %c0_i32 : i32, i32, i32, i32
  }
  func.func @transform_3(%arg0: i32, %arg1: i32, %arg2: i32) -> (i32, i32, i32, i32) {
    %c2_i32 = arith.constant 2 : i32
    %c0_i32 = arith.constant 0 : i32
    %c0_i32_0 = arith.constant 0 : i32
    return %arg0, %c2_i32, %arg2, %c0_i32 : i32, i32, i32, i32
  }
  func.func @transform_4(%arg0: i32, %arg1: i32, %arg2: i32) -> (i32, i32) {
    %c0_i32 = arith.constant 0 : i32
    %c0_i32_0 = arith.constant 0 : i32
    %c0_i32_1 = arith.constant 0 : i32
    return %c0_i32, %c0_i32_0 : i32, i32
  }
  func.func @transform_5(%arg0: i32, %arg1: i32, %arg2: i32) -> (i32, i32) {
    %c0_i32 = arith.constant 0 : i32
    %c0_i32_0 = arith.constant 0 : i32
    %c0_i32_1 = arith.constant 0 : i32
    return %c0_i32, %c0_i32_0 : i32, i32
  }
  func.func @transform_6(%arg0: i32, %arg1: i32, %arg2: i32) -> (i32, i32, i32) {
    %c0_i32 = arith.constant 0 : i32
    %c0_i32_0 = arith.constant 0 : i32
    return %arg0, %arg1, %c0_i32 : i32, i32, i32
  }
}

</mosaic_0001>

<bundles_post_ra>
// kernel: self_att_layer.2
= control target key start
LH: loop header
LB: loop body
LE: loop exit
PB: predicated region body
PF: predicated region fallthrough
CT: control target
= control target key end

     0   :  { %s1549_s12 = smov 0   ;;  %s1551_s13 = smov 0   ;;  %s1991_s0 = inlined_call_operand.vmem [shape: f32[2,256,128], index: 0, kind: input, shape index: {}]   ;;  %s1992_s1 = inlined_call_operand.vmem [shape: bf16[128,384], index: 1, kind: input, shape index: {}]   ;;  %s1993_s2 = inlined_call_operand.vmem [shape: f32[1,384], index: 2, kind: input, shape index: {}]   ;;  %s1994_s3 = inlined_call_operand.vmem [shape: bf16[2,3,256,128], index: 3, kind: output, shape index: {}]  }
   0x1   :  { %s1553_s14 = smov 0  }
   0x2 LB: > { %s25_s15 = sadd.s32 1, %s1523_s13  ;;  %p978_p0 = scmp.ge.s32.totalorder %s1527_s14, 1  ;;  %s1527_s14 = sphi %s1553_s14, %s13_s14   ;;  %s1523_s13 = sphi %s1551_s13, %s1996_s13   ;;  %s1519_s12 = sphi %s1549_s12, %s1995_s12  }
   0x3   : > { %p27_p1 = scmp.ge.s32.totalorder %s25_s15, 2  ;;  %p158_p2 = scmp.lt.s32.totalorder %s1527_s14, 3 }
   0x5   : > { %s1998_s15 = smov (%p27_p1, %s25_s15), 0  ;;  %p159_p3 = pnand %p978_p0, %p158_p2 }
   0x6   : > { %p191_p4 = scmp.lt.s32.totalorder (!%p159_p3), %s1519_s12, 1 }
   0x7   : > { %162 = sbr.rel (%p159_p3) target bundleno = 369 (0x171), region = 32 }
   0xc   : > { %v1068_v0 = vld [vmem:[%s1992_s1 + $0xa8] sm:$0xf]  ;;  %v1167_v1 = vld [vmem:[%s1992_s1 + $0xb0] sm:$0xf0]  ;;  %v1166_v2 = vld [vmem:[%s1992_s1 + $0xac] sm:$0xf] }
   0xd   : > { %v1069_v3 = vor.u32 %v1167_v1, %v1068_v0  ;;  %v1070_v4 = vld [vmem:[%s1992_s1 + $0xb4] sm:$0xf0]  ;;  %v1076_v5 = vld [vmem:[%s1992_s1 + $0xb0] sm:$0xf]  ;;  %v1168_v6 = vld [vmem:[%s1992_s1 + $0xb8] sm:$0xf0] }
   0xe   : > { %v1587_v7 = vor.u32 %v1166_v2, %v1070_v4  ;;  %v1589_v8 = vor.u32 %v1168_v6, %v1076_v5  ;;  %v1056_v9 = vld [vmem:[%s1992_s1 + $0x90] sm:$0xf]  ;;  %v1164_v10 = vld [vmem:[%s1992_s1 + $0x98] sm:$0xf0]  ;;  %v1163_v11 = vld [vmem:[%s1992_s1 + $0x94] sm:$0xf] }
   0xf   : > { %426 = vmatpush.bf16.msra.mxu0 %v1069_v3  ;;  %1456 = vmatpush.bf16.msra.mxu3 %v1069_v3  ;;  %v1057_v12 = vor.u32 %v1164_v10, %v1056_v9  ;;  %v1058_v13 = vld [vmem:[%s1992_s1 + $0x9c] sm:$0xf0]  ;;  %v1064_v14 = vld [vmem:[%s1992_s1 + $0x98] sm:$0xf]  ;;  %v1165_v15 = vld [vmem:[%s1992_s1 + $0xa0] sm:$0xf0] }
  0x10   : > { %515 = vmatpush.bf16.msra.mxu1 %v1587_v7  ;;  %604 = vmatpush.bf16.msra.mxu2 %v1589_v8  ;;  %v1611_v16 = vor.u32 %v1163_v11, %v1058_v13  ;;  %v1613_v17 = vor.u32 %v1165_v15, %v1064_v14  ;;  %v1044_v18 = vld [vmem:[%s1992_s1 + $0x78] sm:$0xf]  ;;  %v1161_v19 = vld [vmem:[%s1992_s1 + $0x80] sm:$0xf0]  ;;  %v1160_v20 = vld [vmem:[%s1992_s1 + $0x7c] sm:$0xf] }
  0x11   : > { %v1046_v21 = vld [vmem:[%s1992_s1 + $0x84] sm:$0xf0]  ;;  %v1052_v22 = vld [vmem:[%s1992_s1 + $0x80] sm:$0xf]  ;;  %v1162_v23 = vld [vmem:[%s1992_s1 + $0x88] sm:$0xf0]  ;;  %v1045_v24 = vor.u32 %v1161_v19, %v1044_v18 }
  0x12   : > { %v1635_v25 = vor.u32 %v1160_v20, %v1046_v21  ;;  %v1637_v26 = vor.u32 %v1162_v23, %v1052_v22  ;;  %v1032_v27 = vld [vmem:[%s1992_s1 + $0x60] sm:$0xf]  ;;  %v1158_v28 = vld [vmem:[%s1992_s1 + $0x68] sm:$0xf0]  ;;  %v1157_v29 = vld [vmem:[%s1992_s1 + $0x64] sm:$0xf] }
  0x13   : > { %427 = vmatpush.bf16.msra.mxu0 %v1057_v12  ;;  %1457 = vmatpush.bf16.msra.mxu3 %v1057_v12  ;;  %v1034_v30 = vld [vmem:[%s1992_s1 + $0x6c] sm:$0xf0]  ;;  %v1040_v31 = vld [vmem:[%s1992_s1 + $0x68] sm:$0xf]  ;;  %v1159_v32 = vld [vmem:[%s1992_s1 + $0x70] sm:$0xf0]  ;;  %v1033_v33 = vor.u32 %v1158_v28, %v1032_v27 }
  0x14   : > { %516 = vmatpush.bf16.msra.mxu1 %v1611_v16  ;;  %605 = vmatpush.bf16.msra.mxu2 %v1613_v17  ;;  %v1659_v34 = vor.u32 %v1157_v29, %v1034_v30  ;;  %v1661_v35 = vor.u32 %v1159_v32, %v1040_v31  ;;  %v1020_v36 = vld [vmem:[%s1992_s1 + $0x48] sm:$0xf]  ;;  %v1155_v37 = vld [vmem:[%s1992_s1 + $0x50] sm:$0xf0]  ;;  %v1154_v38 = vld [vmem:[%s1992_s1 + $0x4c] sm:$0xf] }
  0x15   : > { %v1022_v39 = vld [vmem:[%s1992_s1 + $0x54] sm:$0xf0]  ;;  %v1028_v40 = vld [vmem:[%s1992_s1 + $0x50] sm:$0xf]  ;;  %v1156_v41 = vld [vmem:[%s1992_s1 + $0x58] sm:$0xf0]  ;;  %v1021_v42 = vor.u32 %v1155_v37, %v1020_v36 }
  0x16   : > { %v1008_v43 = vld [vmem:[%s1992_s1 + $0x30] sm:$0xf]  ;;  %v1686_v44 = vor.u32 %v1154_v38, %v1022_v39  ;;  %v1688_v45 = vor.u32 %v1156_v41, %v1028_v40  ;;  %v1152_v46 = vld [vmem:[%s1992_s1 + $0x38] sm:$0xf0]  ;;  %v1151_v47 = vld [vmem:[%s1992_s1 + $0x34] sm:$0xf] }
  0x17   : > { %428 = vmatpush.bf16.msra.mxu0 %v1045_v24  ;;  %1458 = vmatpush.bf16.msra.mxu3 %v1045_v24  ;;  %v1010_v48 = vld [vmem:[%s1992_s1 + $0x3c] sm:$0xf0]  ;;  %v1016_v49 = vld [vmem:[%s1992_s1 + $0x38] sm:$0xf]  ;;  %v1153_v50 = vld [vmem:[%s1992_s1 + $0x40] sm:$0xf0]  ;;  %v1009_v51 = vor.u32 %v1152_v46, %v1008_v43 }
  0x18   : > { %517 = vmatpush.bf16.msra.mxu1 %v1635_v25  ;;  %606 = vmatpush.bf16.msra.mxu2 %v1637_v26  ;;  %s2000_s12 = smov (!%p191_p4, %s1519_s12), 1  ;;  %v996_v52 = vld [vmem:[%s1992_s1 + $0x18] sm:$0xf]  ;;  %v1013_v53 = vor.u32 %v1151_v47, %v1010_v48  ;;  %v1714_v54 = vor.u32 %v1153_v50, %v1016_v49  ;;  %v1149_v55 = vld [vmem:[%s1992_s1 + $0x20] sm:$0xf0] }
  0x19   : > { %v1148_v56 = vld [vmem:[%s1992_s1 + $0x1c] sm:$0xf]  ;;  %s1144_s25 = sshll.u32 %s2000_s12, 8  ;;  %v998_v57 = vld [vmem:[%s1992_s1 + $0x24] sm:$0xf0]  ;;  %v997_v60 = vor.u32 %v1149_v55, %v996_v52  ;;  %s1480_s26 = smul.u32 384, %s2000_s12 }
  0x1a   : > { %v1004_v58 = vld [vmem:[%s1992_s1 + $0x20] sm:$0xf]  ;;  %v1150_v59 = vld [vmem:[%s1992_s1 + $0x28] sm:$0xf0]  ;;  %s1735_s7 = scalar_lea.vmem %s1991_s0, %s1144_s25  ;;  %v1001_v61 = vor.u32 %v1148_v56, %v998_v57  ;;  %v1145_v1 = vld [vmem:[%s1992_s1 + $0x4] sm:$0xf] }
  0x1b   : > { %429 = vmatpush.bf16.msra.mxu0 %v1033_v33  ;;  %1459 = vmatpush.bf16.msra.mxu3 %v1033_v33  ;;  %v1738_v62 = vor.u32 %v1150_v59, %v1004_v58  ;;  %v984_v63 = vld [vmem:[%s1992_s1] sm:$0xf]  ;;  %v1146_v0 = vld [vmem:[%s1992_s1 + $0x8] sm:$0xf0]  ;;  %v986_v2 = vld [vmem:[%s1992_s1 + $0xc] sm:$0xf0]  ;;  %s1827_s29 = scalar_lea.vmem %s1994_s3, %s1480_s26 }
  0x1c   : > { %518 = vmatpush.bf16.msra.mxu1 %v1659_v34  ;;  %607 = vmatpush.bf16.msra.mxu2 %v1661_v35  ;;  %v992_v3 = vld [vmem:[%s1992_s1 + $0x8] sm:$0xf]  ;;  %v1147_v4 = vld [vmem:[%s1992_s1 + $0x10] sm:$0xf0]  ;;  %v210_v5 = vld [vmem:[%s1735_s7] sm:$0xff]  ;;  %v985_v6 = vor.u32 %v1146_v0, %v984_v63  ;;  %v989_v12 = vor.u32 %v1145_v1, %v986_v2 }
  0x1d   : > { %v211_v9 = vld [vmem:[%s1735_s7 + $0x8] sm:$0xff]  ;;  %v234_v10 = vld [vmem:[%s1735_s7 + $0xc0] sm:$0xff]  ;;  %v993_v13 = vor.u32 %v1147_v4, %v992_v3  ;;  %v212_v18 = vld [vmem:[%s1735_s7 + $0x10] sm:$0xff] }
  0x1e   : > { %v235_v11 = vld [vmem:[%s1735_s7 + $0xc8] sm:$0xff]  ;;  %v242_v14 = vpack.c.bf16 %v211_v9, %v210_v5  ;;  %v213_v19 = vld [vmem:[%s1735_s7 + $0x18] sm:$0xff]  ;;  %v236_v20 = vld [vmem:[%s1735_s7 + $0xd0] sm:$0xff] }
  0x1f   : > { %430 = vmatpush.bf16.msra.mxu0 %v1021_v42  ;;  %1460 = vmatpush.bf16.msra.mxu3 %v1021_v42  ;;  %v1763_v15 = vpack.c.bf16 %v235_v11, %v234_v10  ;;  %v237_v21 = vld [vmem:[%s1735_s7 + $0xd8] sm:$0xff]  ;;  %v215_v23 = vld [vmem:[%s1735_s7 + $0x28] sm:$0xff]  ;;  %v238_v24 = vld [vmem:[%s1735_s7 + $0xe0] sm:$0xff] }
  0x20   : > { %519 = vmatpush.bf16.msra.mxu1 %v1686_v44  ;;  %608 = vmatpush.bf16.msra.mxu2 %v1688_v45  ;;  %v1774_v22 = vpack.c.bf16 %v237_v21, %v236_v20  ;;  %v216_v29 = vld [vmem:[%s1735_s7 + $0x30] sm:$0xff]  ;;  %v217_v30 = vld [vmem:[%s1735_s7 + $0x38] sm:$0xff]  ;;  %v222_v38 = vld [vmem:[%s1735_s7 + $0x60] sm:$0xff] }
  0x21   : > { %v240_v31 = vld [vmem:[%s1735_s7 + $0xf0] sm:$0xff]  ;;  %v241_v32 = vld [vmem:[%s1735_s7 + $0xf8] sm:$0xff]  ;;  %v245_v33 = vpack.c.bf16 %v217_v30, %v216_v29  ;;  %v223_v39 = vld [vmem:[%s1735_s7 + $0x68] sm:$0xff] }
  0x22   : > { %v221_v36 = vld [vmem:[%s1735_s7 + $0x58] sm:$0xff]  ;;  %v248_v40 = vpack.c.bf16 %v223_v39, %v222_v38  ;;  %v224_v41 = vld [vmem:[%s1735_s7 + $0x70] sm:$0xff]  ;;  %v290_v49 = vld [vmem:[%s1993_s2] sm:$0x7] }
  0x23   : > { %431 = vmatpush.bf16.msra.mxu0 %v1009_v51  ;;  %1461 = vmatpush.bf16.msra.mxu3 %v1009_v51  ;;  %v225_v42 = vld [vmem:[%s1735_s7 + $0x78] sm:$0xff]  ;;  %v1817_v50 = vperm.slane %v290_v49, 0  ;;  %v1820_v51 = vperm.slane %v290_v49, 1  ;;  %v228_v63 = vld [vmem:[%s1735_s7 + $0x90] sm:$0xff] }
  0x24   : > { %520 = vmatpush.bf16.msra.mxu1 %v1013_v53  ;;  %609 = vmatpush.bf16.msra.mxu2 %v1714_v54  ;;  %v249_v43 = vpack.c.bf16 %v225_v42, %v224_v41  ;;  %v229_v0 = vld [vmem:[%s1735_s7 + $0x98] sm:$0xff] }
  0x25   : > { %v251_v5 = vpack.c.bf16 %v229_v0, %v228_v63 }
  0x27   : > { %432 = vmatpush.bf16.msra.mxu0 %v997_v60  ;;  %1462 = vmatpush.bf16.msra.mxu3 %v997_v60 }
  0x28   : > { %521 = vmatpush.bf16.msra.mxu1 %v1001_v61  ;;  %610 = vmatpush.bf16.msra.mxu2 %v1738_v62 }
  0x2b   : > { %433 = vmatpush.bf16.msra.mxu0 %v985_v6  ;;  %1463 = vmatpush.bf16.msra.mxu3 %v985_v6 }
  0x2c   : > { %522 = vmatpush.bf16.msra.mxu1 %v989_v12  ;;  %611 = vmatpush.bf16.msra.mxu2 %v993_v13 }
  0x2e   : > { %434 = vmatmul.bf16.vlgmr.msra.gmra.mxu0 %v242_v14  ;;  %494 = vmatmul.bf16.vlgmr.msra.gmra.mxu3 %v1763_v15 }
  0x2f   : > { %1464 = vmatpush.bf16.msrb.mxu3 %v1587_v7  ;;  %523 = vmatmul.bf16.vlgmr.msra.gmra.mxu1 %v242_v14  ;;  %v243_v7 = vpack.c.bf16 %v213_v19, %v212_v18 }
  0x30   : > { %612 = vmatmul.bf16.vlgmr.msra.gmra.mxu2 %v242_v14 }
  0x33   : > { %1465 = vmatpush.bf16.msrb.mxu3 %v1611_v16  ;;  %v214_v16 = vld [vmem:[%s1735_s7 + $0x20] sm:$0xff] }
  0x34   : > { %v244_v27 = vpack.c.bf16 %v215_v23, %v214_v16 }
  0x37   : > { %1466 = vmatpush.bf16.msrb.mxu3 %v1635_v25  ;;  %v239_v25 = vld [vmem:[%s1735_s7 + $0xe8] sm:$0xff] }
  0x38   : > { %v1782_v28 = vpack.c.bf16 %v239_v25, %v238_v24  ;;  %v231_v25 = vld [vmem:[%s1735_s7 + $0xa8] sm:$0xff] }
  0x3b   : > { %1467 = vmatpush.bf16.msrb.mxu3 %v1659_v34  ;;  %v1793_v34 = vpack.c.bf16 %v241_v32, %v240_v31 }
  0x3e   : > { %439 = vmatmul.bf16.gmra.mxu0 %v243_v7  ;;  %499 = vmatmul.bf16.gmra.mxu3 %v1774_v22 }
  0x3f   : > { %1468 = vmatpush.bf16.msrb.mxu3 %v1686_v44  ;;  %528 = vmatmul.bf16.gmra.mxu1 %v243_v7  ;;  %v226_v44 = vld [vmem:[%s1735_s7 + $0x80] sm:$0xff] }
  0x40   : > { %617 = vmatmul.bf16.gmra.mxu2 %v243_v7 }
  0x43   : > { %1469 = vmatpush.bf16.msrb.mxu3 %v1013_v53 }
  0x47   : > { %1470 = vmatpush.bf16.msrb.mxu3 %v1001_v61  ;;  %v1831_v61 = vperm.slane %v290_v49, 2 }
  0x4b   : > { %1471 = vmatpush.bf16.msrb.mxu3 %v989_v12 }
  0x4e   : > { %444 = vmatmul.bf16.gmra.mxu0 %v244_v27  ;;  %504 = vmatmul.bf16.gmra.mxu3 %v1782_v28 }
  0x4f   : > { %1472 = vmatpush.bf16.msra.mxu3 %v1589_v8  ;;  %533 = vmatmul.bf16.gmra.mxu1 %v244_v27  ;;  %v218_v8 = vld [vmem:[%s1735_s7 + $0x40] sm:$0xff] }
  0x50   : > { %622 = vmatmul.bf16.gmra.mxu2 %v244_v27 }
  0x53   : > { %1473 = vmatpush.bf16.msra.mxu3 %v1613_v17  ;;  %v219_v17 = vld [vmem:[%s1735_s7 + $0x48] sm:$0xff] }
  0x57   : > { %1474 = vmatpush.bf16.msra.mxu3 %v1637_v26  ;;  %v246_v26 = vpack.c.bf16 %v219_v17, %v218_v8 }
  0x5b   : > { %1475 = vmatpush.bf16.msra.mxu3 %v1661_v35  ;;  %v220_v35 = vld [vmem:[%s1735_s7 + $0x50] sm:$0xff] }
  0x5c   : > { %v247_v37 = vpack.c.bf16 %v221_v36, %v220_v35 }
  0x5e   : > { %449 = vmatmul.bf16.gmra.mxu0 %v245_v33  ;;  %509 = vmatmul.bf16.gmra.mxu3 %v1793_v34 }
  0x5f   : > { %1476 = vmatpush.bf16.msra.mxu3 %v1688_v45  ;;  %538 = vmatmul.bf16.gmra.mxu1 %v245_v33  ;;  %v227_v45 = vld [vmem:[%s1735_s7 + $0x88] sm:$0xff] }
  0x60   : > { %627 = vmatmul.bf16.gmra.mxu2 %v245_v33  ;;  %v250_v46 = vpack.c.bf16 %v227_v45, %v226_v44 }
  0x63   : > { %1477 = vmatpush.bf16.msra.mxu3 %v1714_v54 }
  0x67   : > { %1478 = vmatpush.bf16.msra.mxu3 %v1738_v62 }
  0x6b   : > { %1479 = vmatpush.bf16.msra.mxu3 %v993_v13 }
  0x6e   : > { %454 = vmatmul.bf16.gmra.mxu0 %v246_v26  ;;  %583 = vmatmul.bf16.vlgmr.msrb.gmra.mxu3 %v1763_v15 }
  0x6f   : > { %543 = vmatmul.bf16.gmra.mxu1 %v246_v26 }
  0x70   : > { %632 = vmatmul.bf16.gmra.mxu2 %v246_v26 }
  0x7e   : > { %459 = vmatmul.bf16.gmra.mxu0 %v247_v37  ;;  %588 = vmatmul.bf16.gmra.mxu3 %v1774_v22 }
  0x7f   : > { %548 = vmatmul.bf16.gmra.mxu1 %v247_v37 }
  0x80   : > { %637 = vmatmul.bf16.gmra.mxu2 %v247_v37 }
  0x8e   : > { %464 = vmatmul.bf16.gmra.mxu0 %v248_v40  ;;  %593 = vmatmul.bf16.gmra.mxu3 %v1782_v28 }
  0x8f   : > { %553 = vmatmul.bf16.gmra.mxu1 %v248_v40 }
  0x90   : > { %642 = vmatmul.bf16.gmra.mxu2 %v248_v40 }
  0x9e   : > { %469 = vmatmul.bf16.gmra.mxu0 %v249_v43  ;;  %598 = vmatmul.bf16.gmra.mxu3 %v1793_v34 }
  0x9f   : > { %558 = vmatmul.bf16.gmra.mxu1 %v249_v43 }
  0xa0   : > { %647 = vmatmul.bf16.gmra.mxu2 %v249_v43 }
  0xab   : > { %v435_v47 = vpop.f32.mrf.mxu0 }
  0xac   : > { %v524_v48 = vpop.f32.mrf.mxu1  ;;  %v436_v55 = vadd.f32 %v435_v47, %v1817_v50  ;;  %v233_v47 = vld [vmem:[%s1735_s7 + $0xb8] sm:$0xff] }
  0xad   : > { %v525_v58 = vadd.f32 %v524_v48, %v1820_v51 }
  0xae   : > { %474 = vmatmul.bf16.gmra.mxu0 %v250_v46  ;;  %672 = vmatmul.bf16.vlgmr.msra.gmra.mxu3 %v1763_v15 }
  0xaf   : > { %563 = vmatmul.bf16.gmra.mxu1 %v250_v46 }
  0xb0   : > { %652 = vmatmul.bf16.gmra.mxu2 %v250_v46 }
  0xb1   : > { %v495_v52 = vpop.f32.mrf.mxu3 }
  0xb2   : > { %v496_v2 = vadd.f32 %v495_v52, %v1817_v50 }
  0xb3   : > { %v613_v53 = vpop.f32.mrf.mxu2  ;;  %v437_v54 = vpop.f32.mrf.mxu0 }
  0xb4   : > { %v438_v56 = vadd.f32 %v437_v54, %v1817_v50  ;;  %v526_v57 = vpop.f32.mrf.mxu1  ;;  %v614_v6 = vadd.f32 %v613_v53, %v1831_v61 }
  0xb5   : > { %v527_v59 = vadd.f32 %v526_v57, %v1820_v51 }
  0xb6   : > { %v1172_v60 = vpack.c.bf16 %v438_v56, %v436_v55 }
  0xb7   : > { %v1252_v62 = vpack.c.bf16 %v527_v59, %v525_v58 }
  0xb8   : > { %1173 = vst [vmem:[%s1827_s29] sm:$0xff] %v1172_v60  }
  0xb9   : > { %1424 = vst [vmem:[%s1827_s29 + $0x80] sm:$0xff] %v1252_v62   ;;  %v497_v1 = vpop.f32.mrf.mxu3 }
  0xba   : > { %v498_v3 = vadd.f32 %v497_v1, %v1817_v50 }
  0xbb   : > { %v615_v4 = vpop.f32.mrf.mxu2  ;;  %v440_v10 = vpop.f32.mrf.mxu0 }
  0xbc   : > { %v616_v9 = vadd.f32 %v615_v4, %v1831_v61  ;;  %v1232_v11 = vpack.c.bf16 %v498_v3, %v496_v2  ;;  %v529_v12 = vpop.f32.mrf.mxu1  ;;  %v441_v19 = vadd.f32 %v440_v10, %v1817_v50 }
  0xbd   : > { %v530_v7 = vadd.f32 %v529_v12, %v1820_v51 }
  0xbe   : > { %v1332_v13 = vpack.c.bf16 %v616_v9, %v614_v6  ;;  %1420 = vst [vmem:[%s1827_s29 + $0x60] sm:$0xff] %v1232_v11   ;;  %479 = vmatmul.bf16.gmra.mxu0 %v251_v5  ;;  %677 = vmatmul.bf16.gmra.mxu3 %v1774_v22  ;;  %v230_v22 = vld [vmem:[%s1735_s7 + $0xa0] sm:$0xff] }
  0xbf   : > { %568 = vmatmul.bf16.gmra.mxu1 %v251_v5  ;;  %v252_v32 = vpack.c.bf16 %v231_v25, %v230_v22 }
  0xc0   : > { %1440 = vst [vmem:[%s1827_s29 + $0x100] sm:$0xff] %v1332_v13   ;;  %657 = vmatmul.bf16.gmra.mxu2 %v251_v5 }
  0xc1   : > { %v500_v14 = vpop.f32.mrf.mxu3 }
  0xc2   : > { %v501_v29 = vadd.f32 %v500_v14, %v1817_v50 }
  0xc3   : > { %v618_v15 = vpop.f32.mrf.mxu2  ;;  %v442_v18 = vpop.f32.mrf.mxu0 }
  0xc4   : > { %v443_v20 = vadd.f32 %v442_v18, %v1817_v50  ;;  %v531_v21 = vpop.f32.mrf.mxu1  ;;  %v619_v33 = vadd.f32 %v618_v15, %v1831_v61 }
  0xc5   : > { %v532_v16 = vadd.f32 %v531_v21, %v1820_v51 }
  0xc6   : > { %v1177_v23 = vpack.c.bf16 %v443_v20, %v441_v19 }
  0xc7   : > { %v1257_v24 = vpack.c.bf16 %v532_v16, %v530_v7 }
  0xc8   : > { %1409 = vst [vmem:[%s1827_s29 + $0x8] sm:$0xff] %v1177_v23  }
  0xc9   : > { %1425 = vst [vmem:[%s1827_s29 + $0x88] sm:$0xff] %v1257_v24   ;;  %v502_v27 = vpop.f32.mrf.mxu3 }
  0xca   : > { %v503_v30 = vadd.f32 %v502_v27, %v1817_v50 }
  0xcb   : > { %v620_v31 = vpop.f32.mrf.mxu2  ;;  %v445_v17 = vpop.f32.mrf.mxu0 }
  0xcc   : > { %v621_v8 = vadd.f32 %v620_v31, %v1831_v61  ;;  %v1237_v26 = vpack.c.bf16 %v503_v30, %v501_v29  ;;  %v534_v35 = vpop.f32.mrf.mxu1  ;;  %v446_v40 = vadd.f32 %v445_v17, %v1817_v50 }
  0xcd   : > { %v535_v43 = vadd.f32 %v534_v35, %v1820_v51 }
  0xce   : > { %v1337_v36 = vpack.c.bf16 %v621_v8, %v619_v33  ;;  %1421 = vst [vmem:[%s1827_s29 + $0x68] sm:$0xff] %v1237_v26   ;;  %484 = vmatmul.bf16.gmra.mxu0 %v252_v32  ;;  %682 = vmatmul.bf16.gmra.mxu3 %v1782_v28  ;;  %v232_v28 = vld [vmem:[%s1735_s7 + $0xb0] sm:$0xff] }
  0xcf   : > { %573 = vmatmul.bf16.gmra.mxu1 %v252_v32  ;;  %v253_v54 = vpack.c.bf16 %v233_v47, %v232_v28 }
  0xd0   : > { %1441 = vst [vmem:[%s1827_s29 + $0x108] sm:$0xff] %v1337_v36   ;;  %662 = vmatmul.bf16.gmra.mxu2 %v252_v32 }
  0xd1   : > { %v505_v37 = vpop.f32.mrf.mxu3 }
  0xd2   : > { %v506_v49 = vadd.f32 %v505_v37, %v1817_v50 }
  0xd3   : > { %v623_v38 = vpop.f32.mrf.mxu2  ;;  %v447_v39 = vpop.f32.mrf.mxu0 }
  0xd4   : > { %v448_v41 = vadd.f32 %v447_v39, %v1817_v50  ;;  %v536_v42 = vpop.f32.mrf.mxu1  ;;  %v624_v55 = vadd.f32 %v623_v38, %v1831_v61 }
  0xd5   : > { %v537_v44 = vadd.f32 %v536_v42, %v1820_v51 }
  0xd6   : > { %v1182_v45 = vpack.c.bf16 %v448_v41, %v446_v40 }
  0xd7   : > { %v1262_v46 = vpack.c.bf16 %v537_v44, %v535_v43 }
  0xd8   : > { %1410 = vst [vmem:[%s1827_s29 + $0x10] sm:$0xff] %v1182_v45  }
  0xd9   : > { %1426 = vst [vmem:[%s1827_s29 + $0x90] sm:$0xff] %v1262_v46   ;;  %v507_v48 = vpop.f32.mrf.mxu3 }
  0xda   : > { %v508_v52 = vadd.f32 %v507_v48, %v1817_v50 }
  0xdb   : > { %v625_v53 = vpop.f32.mrf.mxu2  ;;  %v450_v57 = vpop.f32.mrf.mxu0 }
  0xdc   : > { %v626_v56 = vadd.f32 %v625_v53, %v1831_v61  ;;  %v1242_v58 = vpack.c.bf16 %v508_v52, %v506_v49  ;;  %v539_v59 = vpop.f32.mrf.mxu1  ;;  %v451_v1 = vadd.f32 %v450_v57, %v1817_v50 }
  0xdd   : > { %v540_v4 = vadd.f32 %v539_v59, %v1820_v51 }
  0xde   : > { %v1342_v60 = vpack.c.bf16 %v626_v56, %v624_v55  ;;  %1422 = vst [vmem:[%s1827_s29 + $0x70] sm:$0xff] %v1242_v58   ;;  %489 = vmatmul.bf16.gmra.mxu0 %v253_v54  ;;  %687 = vmatmul.bf16.gmra.mxu3 %v1793_v34 }
  0xdf   : > { %578 = vmatmul.bf16.gmra.mxu1 %v253_v54 }
  0xe0   : > { %1442 = vst [vmem:[%s1827_s29 + $0x110] sm:$0xff] %v1342_v60   ;;  %667 = vmatmul.bf16.gmra.mxu2 %v253_v54 }
  0xe1   : > { %v510_v62 = vpop.f32.mrf.mxu3 }
  0xe2   : > { %v511_v10 = vadd.f32 %v510_v62, %v1817_v50 }
  0xe3   : > { %v628_v63 = vpop.f32.mrf.mxu2  ;;  %v452_v0 = vpop.f32.mrf.mxu0 }
  0xe4   : > { %v453_v2 = vadd.f32 %v452_v0, %v1817_v50  ;;  %v541_v3 = vpop.f32.mrf.mxu1  ;;  %v629_v13 = vadd.f32 %v628_v63, %v1831_v61 }
  0xe5   : > { %v542_v5 = vadd.f32 %v541_v3, %v1820_v51 }
  0xe6   : > { %v1187_v6 = vpack.c.bf16 %v453_v2, %v451_v1 }
  0xe7   : > { %v1267_v9 = vpack.c.bf16 %v542_v5, %v540_v4 }
  0xe8   : > { %1411 = vst [vmem:[%s1827_s29 + $0x18] sm:$0xff] %v1187_v6  }
  0xe9   : > { %1427 = vst [vmem:[%s1827_s29 + $0x98] sm:$0xff] %v1267_v9   ;;  %v512_v34 = vpop.f32.mrf.mxu3 }
  0xea   : > { %v513_v11 = vadd.f32 %v512_v34, %v1817_v50 }
  0xeb   : > { %v630_v12 = vpop.f32.mrf.mxu2  ;;  %v455_v15 = vpop.f32.mrf.mxu0 }
  0xec   : > { %v631_v14 = vadd.f32 %v630_v12, %v1831_v61  ;;  %v1247_v18 = vpack.c.bf16 %v513_v11, %v511_v10  ;;  %v544_v19 = vpop.f32.mrf.mxu1  ;;  %v456_v23 = vadd.f32 %v455_v15, %v1817_v50 }
  0xed   : > { %v545_v25 = vadd.f32 %v544_v19, %v1820_v51 }
  0xee   : > { %v1347_v20 = vpack.c.bf16 %v631_v14, %v629_v13  ;;  %1423 = vst [vmem:[%s1827_s29 + $0x78] sm:$0xff] %v1247_v18  }
  0xf0   : > { %1443 = vst [vmem:[%s1827_s29 + $0x118] sm:$0xff] %v1347_v20  }
  0xf1   : > { %v584_v21 = vpop.f32.mrf.mxu3 }
  0xf2   : > { %v585_v32 = vadd.f32 %v584_v21, %v1820_v51 }
  0xf3   : > { %v633_v7 = vpop.f32.mrf.mxu2  ;;  %v457_v16 = vpop.f32.mrf.mxu0 }
  0xf4   : > { %v458_v24 = vadd.f32 %v457_v16, %v1817_v50  ;;  %v546_v22 = vpop.f32.mrf.mxu1  ;;  %v634_v17 = vadd.f32 %v633_v7, %v1831_v61 }
  0xf5   : > { %v547_v27 = vadd.f32 %v546_v22, %v1820_v51 }
  0xf6   : > { %v1192_v29 = vpack.c.bf16 %v458_v24, %v456_v23 }
  0xf7   : > { %v1272_v30 = vpack.c.bf16 %v547_v27, %v545_v25 }
  0xf8   : > { %1412 = vst [vmem:[%s1827_s29 + $0x20] sm:$0xff] %v1192_v29  }
  0xf9   : > { %1428 = vst [vmem:[%s1827_s29 + $0xa0] sm:$0xff] %v1272_v30   ;;  %v586_v31 = vpop.f32.mrf.mxu3 }
  0xfa   : > { %v587_v33 = vadd.f32 %v586_v31, %v1820_v51 }
  0xfb   : > { %v635_v8 = vpop.f32.mrf.mxu2  ;;  %v460_v35 = vpop.f32.mrf.mxu0 }
  0xfc   : > { %v636_v26 = vadd.f32 %v635_v8, %v1831_v61  ;;  %v1312_v36 = vpack.c.bf16 %v587_v33, %v585_v32  ;;  %v549_v37 = vpop.f32.mrf.mxu1  ;;  %v461_v42 = vadd.f32 %v460_v35, %v1817_v50 }
  0xfd   : > { %v550_v45 = vadd.f32 %v549_v37, %v1820_v51 }
  0xfe   : > { %v1352_v38 = vpack.c.bf16 %v636_v26, %v634_v17  ;;  %1436 = vst [vmem:[%s1827_s29 + $0xe0] sm:$0xff] %v1312_v36  }
 0x100   : > { %1444 = vst [vmem:[%s1827_s29 + $0x120] sm:$0xff] %v1352_v38  }
 0x101   : > { %v589_v39 = vpop.f32.mrf.mxu3 }
 0x102   : > { %v590_v49 = vadd.f32 %v589_v39, %v1820_v51 }
 0x103   : > { %v638_v40 = vpop.f32.mrf.mxu2  ;;  %v462_v41 = vpop.f32.mrf.mxu0 }
 0x104   : > { %v463_v43 = vadd.f32 %v462_v41, %v1817_v50  ;;  %v551_v44 = vpop.f32.mrf.mxu1  ;;  %v639_v54 = vadd.f32 %v638_v40, %v1831_v61 }
 0x105   : > { %v552_v46 = vadd.f32 %v551_v44, %v1820_v51 }
 0x106   : > { %v1197_v28 = vpack.c.bf16 %v463_v43, %v461_v42 }
 0x107   : > { %v1277_v47 = vpack.c.bf16 %v552_v46, %v550_v45 }
 0x108   : > { %1413 = vst [vmem:[%s1827_s29 + $0x28] sm:$0xff] %v1197_v28  }
 0x109   : > { %1429 = vst [vmem:[%s1827_s29 + $0xa8] sm:$0xff] %v1277_v47   ;;  %v591_v48 = vpop.f32.mrf.mxu3 }
 0x10a   : > { %v592_v52 = vadd.f32 %v591_v48, %v1820_v51 }
 0x10b   : > { %v640_v53 = vpop.f32.mrf.mxu2  ;;  %v465_v56 = vpop.f32.mrf.mxu0 }
 0x10c   : > { %v641_v55 = vadd.f32 %v640_v53, %v1831_v61  ;;  %v1317_v57 = vpack.c.bf16 %v592_v52, %v590_v49  ;;  %v554_v58 = vpop.f32.mrf.mxu1  ;;  %v466_v0 = vadd.f32 %v465_v56, %v1817_v50 }
 0x10d   : > { %v555_v3 = vadd.f32 %v554_v58, %v1820_v51 }
 0x10e   : > { %v1357_v59 = vpack.c.bf16 %v641_v55, %v639_v54  ;;  %1437 = vst [vmem:[%s1827_s29 + $0xe8] sm:$0xff] %v1317_v57  }
 0x110   : > { %1445 = vst [vmem:[%s1827_s29 + $0x128] sm:$0xff] %v1357_v59  }
 0x111   : > { %v594_v60 = vpop.f32.mrf.mxu3 }
 0x112   : > { %v595_v34 = vadd.f32 %v594_v60, %v1820_v51 }
 0x113   : > { %v643_v62 = vpop.f32.mrf.mxu2  ;;  %v467_v63 = vpop.f32.mrf.mxu0 }
 0x114   : > { %v468_v1 = vadd.f32 %v467_v63, %v1817_v50  ;;  %v556_v2 = vpop.f32.mrf.mxu1  ;;  %v644_v12 = vadd.f32 %v643_v62, %v1831_v61 }
 0x115   : > { %v557_v4 = vadd.f32 %v556_v2, %v1820_v51 }
 0x116   : > { %v1202_v5 = vpack.c.bf16 %v468_v1, %v466_v0 }
 0x117   : > { %v1282_v6 = vpack.c.bf16 %v557_v4, %v555_v3 }
 0x118   : > { %1414 = vst [vmem:[%s1827_s29 + $0x30] sm:$0xff] %v1202_v5  }
 0x119   : > { %1430 = vst [vmem:[%s1827_s29 + $0xb0] sm:$0xff] %v1282_v6   ;;  %v596_v9 = vpop.f32.mrf.mxu3 }
 0x11a   : > { %v597_v10 = vadd.f32 %v596_v9, %v1820_v51 }
 0x11b   : > { %v645_v11 = vpop.f32.mrf.mxu2  ;;  %v470_v14 = vpop.f32.mrf.mxu0 }
 0x11c   : > { %v646_v13 = vadd.f32 %v645_v11, %v1831_v61  ;;  %v1322_v15 = vpack.c.bf16 %v597_v10, %v595_v34  ;;  %v559_v18 = vpop.f32.mrf.mxu1  ;;  %v471_v16 = vadd.f32 %v470_v14, %v1817_v50 }
 0x11d   : > { %v560_v22 = vadd.f32 %v559_v18, %v1820_v51 }
 0x11e   : > { %v1362_v19 = vpack.c.bf16 %v646_v13, %v644_v12  ;;  %1438 = vst [vmem:[%s1827_s29 + $0xf0] sm:$0xff] %v1322_v15  }
 0x120   : > { %1446 = vst [vmem:[%s1827_s29 + $0x130] sm:$0xff] %v1362_v19  }
 0x121   : > { %v599_v20 = vpop.f32.mrf.mxu3 }
 0x122   : > { %v600_v31 = vadd.f32 %v599_v20, %v1820_v51 }
 0x123   : > { %v648_v21 = vpop.f32.mrf.mxu2  ;;  %v472_v7 = vpop.f32.mrf.mxu0 }
 0x124   : > { %v473_v23 = vadd.f32 %v472_v7, %v1817_v50  ;;  %v561_v24 = vpop.f32.mrf.mxu1  ;;  %v649_v8 = vadd.f32 %v648_v21, %v1831_v61 }
 0x125   : > { %v562_v25 = vadd.f32 %v561_v24, %v1820_v51 }
 0x126   : > { %v1207_v27 = vpack.c.bf16 %v473_v23, %v471_v16 }
 0x127   : > { %v1287_v29 = vpack.c.bf16 %v562_v25, %v560_v22 }
 0x128   : > { %1415 = vst [vmem:[%s1827_s29 + $0x38] sm:$0xff] %v1207_v27  }
 0x129   : > { %1431 = vst [vmem:[%s1827_s29 + $0xb8] sm:$0xff] %v1287_v29   ;;  %v601_v30 = vpop.f32.mrf.mxu3 }
 0x12a   : > { %v602_v32 = vadd.f32 %v601_v30, %v1820_v51 }
 0x12b   : > { %v650_v33 = vpop.f32.mrf.mxu2  ;;  %v475_v26 = vpop.f32.mrf.mxu0 }
 0x12c   : > { %v651_v17 = vadd.f32 %v650_v33, %v1831_v61  ;;  %v1327_v35 = vpack.c.bf16 %v602_v32, %v600_v31  ;;  %v564_v36 = vpop.f32.mrf.mxu1  ;;  %v476_v41 = vadd.f32 %v475_v26, %v1817_v50 }
 0x12d   : > { %v565_v44 = vadd.f32 %v564_v36, %v1820_v51 }
 0x12e   : > { %v1367_v37 = vpack.c.bf16 %v651_v17, %v649_v8  ;;  %1439 = vst [vmem:[%s1827_s29 + $0xf8] sm:$0xff] %v1327_v35  }
 0x130   : > { %1447 = vst [vmem:[%s1827_s29 + $0x138] sm:$0xff] %v1367_v37  }
 0x131   : > { %v673_v38 = vpop.f32.mrf.mxu3 }
 0x132   : > { %v674_v48 = vadd.f32 %v673_v38, %v1831_v61 }
 0x133   : > { %v653_v39 = vpop.f32.mrf.mxu2  ;;  %v477_v40 = vpop.f32.mrf.mxu0 }
 0x134   : > { %v478_v42 = vadd.f32 %v477_v40, %v1817_v50  ;;  %v566_v43 = vpop.f32.mrf.mxu1  ;;  %v654_v53 = vadd.f32 %v653_v39, %v1831_v61 }
 0x135   : > { %v567_v45 = vadd.f32 %v566_v43, %v1820_v51 }
 0x136   : > { %v1212_v46 = vpack.c.bf16 %v478_v42, %v476_v41 }
 0x137   : > { %v1292_v28 = vpack.c.bf16 %v567_v45, %v565_v44 }
 0x138   : > { %1416 = vst [vmem:[%s1827_s29 + $0x40] sm:$0xff] %v1212_v46  }
 0x139   : > { %1432 = vst [vmem:[%s1827_s29 + $0xc0] sm:$0xff] %v1292_v28   ;;  %v675_v47 = vpop.f32.mrf.mxu3 }
 0x13a   : > { %v676_v52 = vadd.f32 %v675_v47, %v1831_v61 }
 0x13b   : > { %v655_v49 = vpop.f32.mrf.mxu2  ;;  %v480_v55 = vpop.f32.mrf.mxu0 }
 0x13c   : > { %v656_v54 = vadd.f32 %v655_v49, %v1831_v61  ;;  %v1392_v56 = vpack.c.bf16 %v676_v52, %v674_v48  ;;  %v569_v57 = vpop.f32.mrf.mxu1  ;;  %v481_v63 = vadd.f32 %v480_v55, %v1817_v50 }
 0x13d   : > { %v570_v2 = vadd.f32 %v569_v57, %v1820_v51 }
 0x13e   : > { %v1372_v58 = vpack.c.bf16 %v656_v54, %v654_v53  ;;  %1452 = vst [vmem:[%s1827_s29 + $0x160] sm:$0xff] %v1392_v56  }
 0x140   : > { %1448 = vst [vmem:[%s1827_s29 + $0x140] sm:$0xff] %v1372_v58  }
 0x141   : > { %v678_v59 = vpop.f32.mrf.mxu3 }
 0x142   : > { %v679_v9 = vadd.f32 %v678_v59, %v1831_v61 }
 0x143   : > { %v658_v60 = vpop.f32.mrf.mxu2  ;;  %v482_v62 = vpop.f32.mrf.mxu0 }
 0x144   : > { %v483_v0 = vadd.f32 %v482_v62, %v1817_v50  ;;  %v571_v1 = vpop.f32.mrf.mxu1  ;;  %v659_v11 = vadd.f32 %v658_v60, %v1831_v61 }
 0x145   : > { %v572_v3 = vadd.f32 %v571_v1, %v1820_v51 }
 0x146   : > { %v1217_v4 = vpack.c.bf16 %v483_v0, %v481_v63 }
 0x147   : > { %v1297_v5 = vpack.c.bf16 %v572_v3, %v570_v2 }
 0x148   : > { %1417 = vst [vmem:[%s1827_s29 + $0x48] sm:$0xff] %v1217_v4  }
 0x149   : > { %1433 = vst [vmem:[%s1827_s29 + $0xc8] sm:$0xff] %v1297_v5   ;;  %v680_v6 = vpop.f32.mrf.mxu3 }
 0x14a   : > { %v681_v10 = vadd.f32 %v680_v6, %v1831_v61 }
 0x14b   : > { %v660_v34 = vpop.f32.mrf.mxu2  ;;  %v485_v13 = vpop.f32.mrf.mxu0 }
 0x14c   : > { %v661_v12 = vadd.f32 %v660_v34, %v1831_v61  ;;  %v1397_v14 = vpack.c.bf16 %v681_v10, %v679_v9  ;;  %v574_v15 = vpop.f32.mrf.mxu1  ;;  %v486_v7 = vadd.f32 %v485_v13, %v1817_v50 }
 0x14d   : > { %v575_v24 = vadd.f32 %v574_v15, %v1820_v51 }
 0x14e   : > { %v1377_v18 = vpack.c.bf16 %v661_v12, %v659_v11  ;;  %1453 = vst [vmem:[%s1827_s29 + $0x168] sm:$0xff] %v1397_v14  }
 0x150   : > { %1449 = vst [vmem:[%s1827_s29 + $0x148] sm:$0xff] %v1377_v18  }
 0x151   : > { %v683_v19 = vpop.f32.mrf.mxu3 }
 0x152   : > { %v684_v30 = vadd.f32 %v683_v19, %v1831_v61 }
 0x153   : > { %v663_v20 = vpop.f32.mrf.mxu2  ;;  %v487_v21 = vpop.f32.mrf.mxu0 }
 0x154   : > { %v488_v16 = vadd.f32 %v487_v21, %v1817_v50  ;;  %v576_v23 = vpop.f32.mrf.mxu1  ;;  %v664_v33 = vadd.f32 %v663_v20, %v1831_v61 }
 0x155   : > { %v577_v22 = vadd.f32 %v576_v23, %v1820_v51 }
 0x156   : > { %v1222_v25 = vpack.c.bf16 %v488_v16, %v486_v7 }
 0x157   : > { %v1302_v27 = vpack.c.bf16 %v577_v22, %v575_v24 }
 0x158   : > { %1418 = vst [vmem:[%s1827_s29 + $0x50] sm:$0xff] %v1222_v25  }
 0x159   : > { %1434 = vst [vmem:[%s1827_s29 + $0xd0] sm:$0xff] %v1302_v27   ;;  %v685_v29 = vpop.f32.mrf.mxu3 }
 0x15a   : > { %v686_v32 = vadd.f32 %v685_v29, %v1831_v61 }
 0x15b   : > { %v665_v31 = vpop.f32.mrf.mxu2  ;;  %v490_v17 = vpop.f32.mrf.mxu0 }
 0x15c   : > { %v666_v8 = vadd.f32 %v665_v31, %v1831_v61  ;;  %v1402_v26 = vpack.c.bf16 %v686_v32, %v684_v30  ;;  %v579_v35 = vpop.f32.mrf.mxu1  ;;  %v491_v40 = vadd.f32 %v490_v17, %v1817_v50 }
 0x15d   : > { %v580_v43 = vadd.f32 %v579_v35, %v1820_v51 }
 0x15e   : > { %v1382_v36 = vpack.c.bf16 %v666_v8, %v664_v33  ;;  %1454 = vst [vmem:[%s1827_s29 + $0x170] sm:$0xff] %v1402_v26  }
 0x160   : > { %1450 = vst [vmem:[%s1827_s29 + $0x150] sm:$0xff] %v1382_v36  }
 0x161   : > { %v688_v37 = vpop.f32.mrf.mxu3 }
 0x162   : > { %v689_v47 = vadd.f32 %v688_v37, %v1831_v61 }
 0x163   : > { %v668_v38 = vpop.f32.mrf.mxu2  ;;  %v492_v39 = vpop.f32.mrf.mxu0 }
 0x164   : > { %v493_v41 = vadd.f32 %v492_v39, %v1817_v50  ;;  %v581_v42 = vpop.f32.mrf.mxu1  ;;  %v669_v52 = vadd.f32 %v668_v38, %v1831_v61 }
 0x165   : > { %v582_v44 = vadd.f32 %v581_v42, %v1820_v51 }
 0x166   : > { %v1227_v45 = vpack.c.bf16 %v493_v41, %v491_v40 }
 0x167   : > { %v1307_v46 = vpack.c.bf16 %v582_v44, %v580_v43 }
 0x168   : > { %1419 = vst [vmem:[%s1827_s29 + $0x58] sm:$0xff] %v1227_v45  }
 0x169   : > { %1435 = vst [vmem:[%s1827_s29 + $0xd8] sm:$0xff] %v1307_v46   ;;  %v690_v28 = vpop.f32.mrf.mxu3 }
 0x16a   : > { %v691_v49 = vadd.f32 %v690_v28, %v1831_v61 }
 0x16b   : > { %v670_v48 = vpop.f32.mrf.mxu2 }
 0x16c   : > { %v671_v50 = vadd.f32 %v670_v48, %v1831_v61  ;;  %v1407_v53 = vpack.c.bf16 %v691_v49, %v689_v47 }
 0x16e   : > { %v1387_v54 = vpack.c.bf16 %v671_v50, %v669_v52  ;;  %1455 = vst [vmem:[%s1827_s29 + $0x178] sm:$0xff] %v1407_v53  }
 0x170   : > { %1451 = vst [vmem:[%s1827_s29 + $0x158] sm:$0xff] %v1387_v54  }
 0x171 PF: > { %s13_s14 = sadd.s32 1, %s1527_s14   ;;  %s1995_s12 = smov %s1523_s13 }
 0x172   : > { %p10_p5 = scmp.ge.s32.totalorder %s13_s14, 4   ;;  %s1996_s13 = smov %s1998_s15 }
 0x174   :  { %12 = sbr.rel (!%p10_p5) target bundleno = 2 (0x2), region = 64 }

// kernel: self_att_layer.3
= control target key start
LH: loop header
LB: loop body
LE: loop exit
PB: predicated region body
PF: predicated region fallthrough
CT: control target
= control target key end

     0   :  { %s3915_s23 = smov 0   ;;  %s3917_s24 = smov 0   ;;  %s5461_s0 = inlined_call_operand.vmem [shape: f32[2,256,128], index: 0, kind: input, shape index: {}]   ;;  %s5462_s1 = inlined_call_operand.vmem [shape: bf16[2,3,256,128], index: 1, kind: input, shape index: {}, may-alias: {1,2,3}]   ;;  %s5463_s2 = inlined_call_operand.vmem [shape: bf16[2,3,256,128], index: 2, kind: input, shape index: {}, may-alias: {1,2,3}]   ;;  %s5464_s3 = inlined_call_operand.vmem [shape: bf16[2,3,256,128], index: 3, kind: input, shape index: {}, may-alias: {1,2,3}]   ;;  %s5465_s4 = inlined_call_operand.vmem [shape: bf16[128,128], index: 4, kind: input, shape index: {}]   ;;  %s5466_s5 = inlined_call_operand.<no memory space> [shape: f32[1,1], index: 5, kind: input, shape index: {}]   ;;  %s5467_s6 = inlined_call_operand.vmem [shape: f32[2,256,128], index: 6, kind: output, shape index: {}]  }
   0x1   :  { %11 = sst [smem:[#allocation5]] %s5466_s5  ;;  %s3919_s25 = smov 0  }
   0x2 LB: > { %s36_s5 = sadd.s32 1, %s3868_s24  ;;  %p3183_p0 = scmp.ge.s32.totalorder %s3872_s25, 1  ;;  %s3872_s25 = sphi %s3919_s25, %s17_s25   ;;  %s3868_s24 = sphi %s3917_s24, %s5758_s24   ;;  %s3864_s23 = sphi %s3915_s23, %s5757_s23  }
   0x3   : > { %p38_p1 = scmp.ge.s32.totalorder %s36_s5, 2  ;;  %p294_p2 = scmp.lt.s32.totalorder %s3872_s25, 3 }
   0x5   : > { %s5760_s5 = smov (%p38_p1, %s36_s5), 0  ;;  %p295_p3 = pnand %p3183_p0, %p294_p2 }
   0x7   : > { %298 = sbr.rel (%p295_p3) target bundleno = 1810 (0x712), region = 44 }
   0xc   : > { %p362_p4 = scmp.lt.s32.totalorder %s3864_s23, 1  ;;  %vm417_vm0 = vcmask 7168   ;;  %v3874_v61 = vmov -inf   ;;  %s2899_s7 = sld [smem:[#allocation5]] }
   0xd   : > { %418 = vst.msk [vmem:[#allocation2] sm:$0xff] %vm417_vm0, %v3874_v61 }
   0xe   : > { %s5762_s23 = smov (!%p362_p4, %s3864_s23), 1  ;;  %419 = vst.msk [vmem:[#allocation2 + $0x8] sm:$0xff] %vm417_vm0, %v3874_v61 }
   0xf   : > { %s3936_s26 = smul.u32 384, %s5762_s23  ;;  %420 = vst.msk [vmem:[#allocation2 + $0x10] sm:$0xff] %vm417_vm0, %v3874_v61 }
  0x10   : > { %421 = vst.msk [vmem:[#allocation2 + $0x18] sm:$0xff] %vm417_vm0, %v3874_v61 }
  0x11   : > { %s3115_s29 = scalar_lea.vmem %s5464_s3, %s3936_s26  ;;  %s3946_s8 = scalar_lea.vmem %s5462_s1, %s3936_s26  ;;  %422 = vst.msk [vmem:[#allocation2 + $0x20] sm:$0xff] %vm417_vm0, %v3874_v61 }
  0x12   : > { %v3522_v0 = vld [vmem:[%s3115_s29 + $0x138] sm:$0xff]  ;;  %v3521_v2 = vld [vmem:[%s3115_s29 + $0x130] sm:$0xff]  ;;  %v3520_v4 = vld [vmem:[%s3115_s29 + $0x128] sm:$0xff]  ;;  %423 = vst.msk [vmem:[#allocation2 + $0x28] sm:$0xff] %vm417_vm0, %v3874_v61  ;;  %s4305_s11 = scalar_lea.vmem %s5463_s2, %s3936_s26 }
  0x13   : > { %v3530_v1 = vld [vmem:[%s3115_s29 + $0x178] sm:$0xff]  ;;  %802 = vmatpush.bf16.xpose.msra.mxu0 %v3522_v0  ;;  %v3529_v3 = vld [vmem:[%s3115_s29 + $0x170] sm:$0xff]  ;;  %v3528_v5 = vld [vmem:[%s3115_s29 + $0x168] sm:$0xff]  ;;  %424 = vst.msk [vmem:[#allocation2 + $0x30] sm:$0xff] %vm417_vm0, %v3874_v61 }
  0x14   : > { %891 = vmatpush.bf16.xpose.msra.mxu1 %v3530_v1  ;;  %v3519_v6 = vld [vmem:[%s3115_s29 + $0x120] sm:$0xff]  ;;  %v3518_v8 = vld [vmem:[%s3115_s29 + $0x118] sm:$0xff]  ;;  %v3517_v10 = vld [vmem:[%s3115_s29 + $0x110] sm:$0xff]  ;;  %425 = vst.msk [vmem:[#allocation2 + $0x38] sm:$0xff] %vm417_vm0, %v3874_v61 }
  0x15   : > { %v3527_v7 = vld [vmem:[%s3115_s29 + $0x160] sm:$0xff]  ;;  %v3526_v9 = vld [vmem:[%s3115_s29 + $0x158] sm:$0xff]  ;;  %v3525_v11 = vld [vmem:[%s3115_s29 + $0x150] sm:$0xff]  ;;  %426 = vst.msk [vmem:[#allocation2 + $0x40] sm:$0xff] %vm417_vm0, %v3874_v61 }
  0x16   : > { %v3516_v12 = vld [vmem:[%s3115_s29 + $0x108] sm:$0xff]  ;;  %v3515_v14 = vld [vmem:[%s3115_s29 + $0x100] sm:$0xff]  ;;  %v3485_v18 = vld [vmem:[%s3946_s8 + $0x10] sm:$0xff]  ;;  %427 = vst.msk [vmem:[#allocation2 + $0x48] sm:$0xff] %vm417_vm0, %v3874_v61 }
  0x17   : > { %v3524_v13 = vld [vmem:[%s3115_s29 + $0x148] sm:$0xff]  ;;  %v3523_v15 = vld [vmem:[%s3115_s29 + $0x140] sm:$0xff]  ;;  %v3486_v19 = vld [vmem:[%s3946_s8 + $0x18] sm:$0xff]  ;;  %428 = vst.msk [vmem:[#allocation2 + $0x50] sm:$0xff] %vm417_vm0, %v3874_v61 }
  0x18   : > { %v3483_v16 = vld [vmem:[%s3946_s8] sm:$0xff]  ;;  %v3484_v17 = vld [vmem:[%s3946_s8 + $0x8] sm:$0xff]  ;;  %v3489_v22 = vld [vmem:[%s3946_s8 + $0x30] sm:$0xff]  ;;  %429 = vst.msk [vmem:[#allocation2 + $0x58] sm:$0xff] %vm417_vm0, %v3874_v61 }
  0x19   : > { %v3487_v20 = vld [vmem:[%s3946_s8 + $0x20] sm:$0xff]  ;;  %v3488_v21 = vld [vmem:[%s3946_s8 + $0x28] sm:$0xff]  ;;  %v3490_v23 = vld [vmem:[%s3946_s8 + $0x38] sm:$0xff]  ;;  %430 = vst.msk [vmem:[#allocation2 + $0x60] sm:$0xff] %vm417_vm0, %v3874_v61 }
  0x1a   : > { %v3491_v24 = vld [vmem:[%s3946_s8 + $0x40] sm:$0xff]  ;;  %v3492_v31 = vld [vmem:[%s3946_s8 + $0x48] sm:$0xff]  ;;  %v3493_v38 = vld [vmem:[%s3946_s8 + $0x50] sm:$0xff]  ;;  %431 = vst.msk [vmem:[#allocation2 + $0x68] sm:$0xff] %vm417_vm0, %v3874_v61 }
  0x1b   : > { %803 = vmatpush.bf16.xpose.msra.mxu0 %v3521_v2  ;;  %v3494_v45 = vld [vmem:[%s3946_s8 + $0x58] sm:$0xff]  ;;  %v3495_v52 = vld [vmem:[%s3946_s8 + $0x60] sm:$0xff]  ;;  %432 = vst.msk [vmem:[#allocation2 + $0x70] sm:$0xff] %vm417_vm0, %v3874_v61  ;;  %v3496_v2 = vld [vmem:[%s3946_s8 + $0x68] sm:$0xff] }
  0x1c   : > { %892 = vmatpush.bf16.xpose.msra.mxu1 %v3529_v3  ;;  %433 = vst.msk [vmem:[#allocation2 + $0x78] sm:$0xff] %vm417_vm0, %v3874_v61 }
  0x1d   : > { %434 = vst.msk [vmem:[#allocation2 + $0x80] sm:$0xff] %vm417_vm0, %v3874_v61 }
  0x1e   : > { %435 = vst.msk [vmem:[#allocation2 + $0x88] sm:$0xff] %vm417_vm0, %v3874_v61 }
  0x1f   : > { %436 = vst.msk [vmem:[#allocation2 + $0x90] sm:$0xff] %vm417_vm0, %v3874_v61 }
  0x20   : > { %437 = vst.msk [vmem:[#allocation2 + $0x98] sm:$0xff] %vm417_vm0, %v3874_v61 }
  0x21   : > { %438 = vst.msk [vmem:[#allocation2 + $0xa0] sm:$0xff] %vm417_vm0, %v3874_v61 }
  0x22   : > { %439 = vst.msk [vmem:[#allocation2 + $0xa8] sm:$0xff] %vm417_vm0, %v3874_v61 }
  0x23   : > { %804 = vmatpush.bf16.xpose.msra.mxu0 %v3520_v4  ;;  %440 = vst.msk [vmem:[#allocation2 + $0xb0] sm:$0xff] %vm417_vm0, %v3874_v61 }
  0x24   : > { %893 = vmatpush.bf16.xpose.msra.mxu1 %v3528_v5  ;;  %441 = vst.msk [vmem:[#allocation2 + $0xb8] sm:$0xff] %vm417_vm0, %v3874_v61 }
  0x25   : > { %442 = vst.msk [vmem:[#allocation2 + $0xc0] sm:$0xff] %vm417_vm0, %v3874_v61 }
  0x26   : > { %443 = vst.msk [vmem:[#allocation2 + $0xc8] sm:$0xff] %vm417_vm0, %v3874_v61 }
  0x27   : > { %444 = vst.msk [vmem:[#allocation2 + $0xd0] sm:$0xff] %vm417_vm0, %v3874_v61 }
  0x28   : > { %445 = vst.msk [vmem:[#allocation2 + $0xd8] sm:$0xff] %vm417_vm0, %v3874_v61 }
  0x29   : > { %446 = vst.msk [vmem:[#allocation2 + $0xe0] sm:$0xff] %vm417_vm0, %v3874_v61 }
  0x2a   : > { %447 = vst.msk [vmem:[#allocation2 + $0xe8] sm:$0xff] %vm417_vm0, %v3874_v61 }
  0x2b   : > { %805 = vmatpush.bf16.xpose.msra.mxu0 %v3519_v6  ;;  %448 = vst.msk [vmem:[#allocation2 + $0xf0] sm:$0xff] %vm417_vm0, %v3874_v61 }
  0x2c   : > { %894 = vmatpush.bf16.xpose.msra.mxu1 %v3527_v7  ;;  %449 = vst.msk [vmem:[#allocation2 + $0xf8] sm:$0xff] %vm417_vm0, %v3874_v61 }
  0x33   : > { %806 = vmatpush.bf16.xpose.msra.mxu0 %v3518_v8 }
  0x34   : > { %895 = vmatpush.bf16.xpose.msra.mxu1 %v3526_v9  ;;  %v3875_v9 = vmov 0  }
  0x35   : > { %3591 = vset.pattern.permute.xlu2 %v3875_v9  ;;  %3592 = vset.pattern.permute.xlu0 %v3875_v9 }
  0x36   : > { %3593 = vset.pattern.permute.xlu1 %v3875_v9 }
  0x3b   : > { %807 = vmatpush.bf16.xpose.msra.mxu0 %v3517_v10 }
  0x3c   : > { %896 = vmatpush.bf16.xpose.msra.mxu1 %v3525_v11 }
  0x43   : > { %808 = vmatpush.bf16.xpose.msra.mxu0 %v3516_v12  ;;  %v3876_v12 = vmov 0.0  }
  0x44   : > { %897 = vmatpush.bf16.xpose.msra.mxu1 %v3524_v13  ;;  %450 = vst.msk [vmem:[#allocation3] sm:$0xff] %vm417_vm0, %v3876_v12 }
  0x45   : > { %451 = vst.msk [vmem:[#allocation3 + $0x8] sm:$0xff] %vm417_vm0, %v3876_v12 }
  0x46   : > { %452 = vst.msk [vmem:[#allocation3 + $0x10] sm:$0xff] %vm417_vm0, %v3876_v12 }
  0x47   : > { %453 = vst.msk [vmem:[#allocation3 + $0x18] sm:$0xff] %vm417_vm0, %v3876_v12 }
  0x48   : > { %454 = vst.msk [vmem:[#allocation3 + $0x20] sm:$0xff] %vm417_vm0, %v3876_v12 }
  0x49   : > { %455 = vst.msk [vmem:[#allocation3 + $0x28] sm:$0xff] %vm417_vm0, %v3876_v12 }
  0x4a   : > { %456 = vst.msk [vmem:[#allocation3 + $0x30] sm:$0xff] %vm417_vm0, %v3876_v12 }
  0x4b   : > { %809 = vmatpush.bf16.xpose.msra.mxu0 %v3515_v14  ;;  %v4094_v14 = vld [vmem:[#allocation2] sm:$0xff]  ;;  %457 = vst.msk [vmem:[#allocation3 + $0x38] sm:$0xff] %vm417_vm0, %v3876_v12 }
  0x4c   : > { %898 = vmatpush.bf16.xpose.msra.mxu1 %v3523_v15  ;;  %458 = vst.msk [vmem:[#allocation3 + $0x40] sm:$0xff] %vm417_vm0, %v3876_v12 }
  0x4d   : > { %459 = vst.msk [vmem:[#allocation3 + $0x48] sm:$0xff] %vm417_vm0, %v3876_v12 }
  0x4e   : > { %460 = vst.msk [vmem:[#allocation3 + $0x50] sm:$0xff] %vm417_vm0, %v3876_v12 }
  0x4f   : > { %461 = vst.msk [vmem:[#allocation3 + $0x58] sm:$0xff] %vm417_vm0, %v3876_v12 }
  0x50   : > { %462 = vst.msk [vmem:[#allocation3 + $0x60] sm:$0xff] %vm417_vm0, %v3876_v12 }
  0x51   : > { %463 = vst.msk [vmem:[#allocation3 + $0x68] sm:$0xff] %vm417_vm0, %v3876_v12 }
  0x52   : > { %810 = vmatmul.bf16.vlgmr.msra.gmra.mxu0 %v3483_v16  ;;  %464 = vst.msk [vmem:[#allocation3 + $0x70] sm:$0xff] %vm417_vm0, %v3876_v12 }
  0x53   : > { %899 = vmatmul.bf16.vlgmr.msra.gmra.mxu1 %v3483_v16  ;;  %465 = vst.msk [vmem:[#allocation3 + $0x78] sm:$0xff] %vm417_vm0, %v3876_v12 }
  0x54   : > { %466 = vst.msk [vmem:[#allocation3 + $0x80] sm:$0xff] %vm417_vm0, %v3876_v12 }
  0x55   : > { %467 = vst.msk [vmem:[#allocation3 + $0x88] sm:$0xff] %vm417_vm0, %v3876_v12 }
  0x56   : > { %468 = vst.msk [vmem:[#allocation3 + $0x90] sm:$0xff] %vm417_vm0, %v3876_v12 }
  0x57   : > { %469 = vst.msk [vmem:[#allocation3 + $0x98] sm:$0xff] %vm417_vm0, %v3876_v12 }
  0x58   : > { %470 = vst.msk [vmem:[#allocation3 + $0xa0] sm:$0xff] %vm417_vm0, %v3876_v12 }
  0x59   : > { %471 = vst.msk [vmem:[#allocation3 + $0xa8] sm:$0xff] %vm417_vm0, %v3876_v12 }
  0x5a   : > { %472 = vst.msk [vmem:[#allocation3 + $0xb0] sm:$0xff] %vm417_vm0, %v3876_v12 }
  0x5b   : > { %473 = vst.msk [vmem:[#allocation3 + $0xb8] sm:$0xff] %vm417_vm0, %v3876_v12 }
  0x5c   : > { %474 = vst.msk [vmem:[#allocation3 + $0xc0] sm:$0xff] %vm417_vm0, %v3876_v12 }
  0x5d   : > { %475 = vst.msk [vmem:[#allocation3 + $0xc8] sm:$0xff] %vm417_vm0, %v3876_v12 }
  0x5e   : > { %476 = vst.msk [vmem:[#allocation3 + $0xd0] sm:$0xff] %vm417_vm0, %v3876_v12 }
  0x5f   : > { %477 = vst.msk [vmem:[#allocation3 + $0xd8] sm:$0xff] %vm417_vm0, %v3876_v12 }
  0x60   : > { %478 = vst.msk [vmem:[#allocation3 + $0xe0] sm:$0xff] %vm417_vm0, %v3876_v12 }
  0x61   : > { %479 = vst.msk [vmem:[#allocation3 + $0xe8] sm:$0xff] %vm417_vm0, %v3876_v12 }
  0x62   : > { %815 = vmatmul.bf16.gmra.mxu0 %v3484_v17  ;;  %480 = vst.msk [vmem:[#allocation3 + $0xf0] sm:$0xff] %vm417_vm0, %v3876_v12 }
  0x63   : > { %904 = vmatmul.bf16.gmra.mxu1 %v3484_v17  ;;  %481 = vst.msk [vmem:[#allocation3 + $0xf8] sm:$0xff] %vm417_vm0, %v3876_v12  ;;  %v4221_v12 = vld [vmem:[#allocation2 + $0x28] sm:$0xff] }
  0x64   : > { %5568 = vst [vmem:[#allocation23_spill] sm:$0xff] %v4221_v12 }
  0x72   : > { %820 = vmatmul.bf16.gmra.mxu0 %v3485_v18 }
  0x73   : > { %909 = vmatmul.bf16.gmra.mxu1 %v3485_v18 }
  0x82   : > { %825 = vmatmul.bf16.gmra.mxu0 %v3486_v19 }
  0x83   : > { %914 = vmatmul.bf16.gmra.mxu1 %v3486_v19 }
  0x92   : > { %830 = vmatmul.bf16.gmra.mxu0 %v3487_v20 }
  0x93   : > { %919 = vmatmul.bf16.gmra.mxu1 %v3487_v20 }
  0xa2   : > { %835 = vmatmul.bf16.gmra.mxu0 %v3488_v21 }
  0xa3   : > { %924 = vmatmul.bf16.gmra.mxu1 %v3488_v21  ;;  %v4123_v21 = vld [vmem:[#allocation2 + $0x8] sm:$0xff] }
  0xa4   : > { %5552 = vst [vmem:[#allocation7_spill] sm:$0xff] %v4123_v21 }
  0xb2   : > { %840 = vmatmul.bf16.gmra.mxu0 %v3489_v22 }
  0xb3   : > { %929 = vmatmul.bf16.gmra.mxu1 %v3489_v22 }
  0xc2   : > { %845 = vmatmul.bf16.gmra.mxu0 %v3490_v23 }
  0xc3   : > { %934 = vmatmul.bf16.gmra.mxu1 %v3490_v23 }
  0xcf   : > { %v3957_v25 = vpop.f32.mrf.mxu0 }
  0xd0   : > { %v3959_v26 = vpop.f32.mrf.mxu1 }
  0xd1   : > { %v1012_v27 = vmax.f32 %v3957_v25, %v3959_v26 }
  0xd2   : > { %850 = vmatmul.bf16.gmra.mxu0 %v3491_v24 }
  0xd3   : > { %939 = vmatmul.bf16.gmra.mxu1 %v3491_v24  ;;  %1013 = vmax.xlane.f32.xlu0 %v1012_v27 }
  0xd7   : > { %v3963_v28 = vpop.f32.mrf.mxu0 }
  0xd8   : > { %v3965_v29 = vpop.f32.mrf.mxu1 }
  0xd9   : > { %v1015_v30 = vmax.f32 %v3963_v28, %v3965_v29 }
  0xdb   : > { %1016 = vmax.xlane.f32.xlu0 %v1015_v30 }
  0xdf   : > { %v3970_v32 = vpop.f32.mrf.mxu0 }
  0xe0   : > { %v3972_v33 = vpop.f32.mrf.mxu1 }
  0xe1   : > { %v1018_v34 = vmax.f32 %v3970_v32, %v3972_v33 }
  0xe2   : > { %855 = vmatmul.bf16.gmra.mxu0 %v3492_v31 }
  0xe3   : > { %1019 = vmax.xlane.f32.xlu1 %v1018_v34  ;;  %944 = vmatmul.bf16.gmra.mxu1 %v3492_v31  ;;  %v4150_v34 = vld [vmem:[#allocation2 + $0x10] sm:$0xff] }
  0xe4   : > { %5556 = vst [vmem:[#allocation11_spill] sm:$0xff] %v4150_v34 }
  0xe7   : > { %v3976_v35 = vpop.f32.mrf.mxu0 }
  0xe8   : > { %v3978_v36 = vpop.f32.mrf.mxu1 }
  0xe9   : > { %v1021_v37 = vmax.f32 %v3976_v35, %v3978_v36 }
  0xeb   : > { %1022 = vmax.xlane.f32.xlu1 %v1021_v37 }
  0xef   : > { %v3983_v39 = vpop.f32.mrf.mxu0 }
  0xf0   : > { %v3985_v40 = vpop.f32.mrf.mxu1 }
  0xf1   : > { %v1024_v41 = vmax.f32 %v3983_v39, %v3985_v40 }
  0xf2   : > { %860 = vmatmul.bf16.gmra.mxu0 %v3493_v38 }
  0xf3   : > { %1025 = vmax.xlane.f32.xlu2 %v1024_v41  ;;  %949 = vmatmul.bf16.gmra.mxu1 %v3493_v38 }
  0xf7   : > { %v3989_v42 = vpop.f32.mrf.mxu0 }
  0xf8   : > { %v3991_v43 = vpop.f32.mrf.mxu1 }
  0xf9   : > { %v1027_v44 = vmax.f32 %v3989_v42, %v3991_v43 }
  0xfb   : > { %1028 = vmax.xlane.f32.xlu2 %v1027_v44  ;;  %v4246_v44 = vld [vmem:[#allocation2 + $0x38] sm:$0xff] }
  0xfc   : > { %5575 = vst [vmem:[#allocation30_spill] sm:$0xff] %v4246_v44 }
  0xff   : > { %v3996_v46 = vpop.f32.mrf.mxu0 }
 0x100   : > { %v3998_v47 = vpop.f32.mrf.mxu1 }
 0x101   : > { %v1030_v48 = vmax.f32 %v3996_v46, %v3998_v47 }
 0x102   : > { %865 = vmatmul.bf16.gmra.mxu0 %v3494_v45 }
 0x103   : > { %1031 = vmax.xlane.f32.xlu0 %v1030_v48  ;;  %954 = vmatmul.bf16.gmra.mxu1 %v3494_v45  ;;  %v4178_v48 = vld [vmem:[#allocation2 + $0x18] sm:$0xff] }
 0x104   : > { %5560 = vst [vmem:[#allocation15_spill] sm:$0xff] %v4178_v48 }
 0x107   : > { %v4002_v49 = vpop.f32.mrf.mxu0 }
 0x108   : > { %v4004_v50 = vpop.f32.mrf.mxu1 }
 0x109   : > { %v1033_v51 = vmax.f32 %v4002_v49, %v4004_v50 }
 0x10b   : > { %1034 = vmax.xlane.f32.xlu1 %v1033_v51 }
 0x10f   : > { %v4009_v53 = vpop.f32.mrf.mxu0 }
 0x110   : > { %v4011_v54 = vpop.f32.mrf.mxu1 }
 0x111   : > { %v1036_v55 = vmax.f32 %v4009_v53, %v4011_v54 }
 0x112   : > { %870 = vmatmul.bf16.gmra.mxu0 %v3495_v52 }
 0x113   : > { %1037 = vmax.xlane.f32.xlu2 %v1036_v55  ;;  %959 = vmatmul.bf16.gmra.mxu1 %v3495_v52 }
 0x117   : > { %v4015_v56 = vpop.f32.mrf.mxu0 }
 0x118   : > { %v4017_v57 = vpop.f32.mrf.mxu1 }
 0x119   : > { %v1039_v58 = vmax.f32 %v4015_v56, %v4017_v57 }
 0x11b   : > { %1040 = vmax.xlane.f32.xlu0 %v1039_v58 }
 0x11f   : > { %v4021_v59 = vpop.f32.mrf.mxu0 }
 0x120   : > { %v4023_v60 = vpop.f32.mrf.mxu1 }
 0x121   : > { %v1042_v62 = vmax.f32 %v4021_v59, %v4023_v60 }
 0x122   : > { %875 = vmatmul.bf16.gmra.mxu0 %v3496_v2 }
 0x123   : > { %1043 = vmax.xlane.f32.xlu1 %v1042_v62  ;;  %964 = vmatmul.bf16.gmra.mxu1 %v3496_v2  ;;  %v4206_v62 = vld [vmem:[#allocation2 + $0x20] sm:$0xff] }
 0x124   : > { %5564 = vst [vmem:[#allocation19_spill] sm:$0xff] %v4206_v62 }
 0x127   : > { %v4035_v63 = vpop.f32.mrf.mxu0 }
 0x128   : > { %v4037_v0 = vpop.f32.mrf.mxu1 }
 0x129   : > { %v1045_v1 = vmax.f32 %v4035_v63, %v4037_v0 }
 0x12b   : > { %1046 = vmax.xlane.f32.xlu2 %v1045_v1  ;;  %v3497_v1 = vld [vmem:[%s3946_s8 + $0x70] sm:$0xff] }
 0x12f   : > { %v4050_v3 = vpop.f32.mrf.mxu0 }
 0x130   : > { %v4052_v4 = vpop.f32.mrf.mxu1 }
 0x131   : > { %v1048_v5 = vmax.f32 %v4050_v3, %v4052_v4 }
 0x132   : > { %880 = vmatmul.bf16.gmra.mxu0 %v3497_v1 }
 0x133   : > { %1049 = vmax.xlane.f32.xlu0 %v1048_v5  ;;  %969 = vmatmul.bf16.gmra.mxu1 %v3497_v1  ;;  %v3498_v1 = vld [vmem:[%s3946_s8 + $0x78] sm:$0xff]  ;;  %s3481_s8 = sshll.u32 %s5762_s23, 8 }
 0x134   : > { %s5283_s13 = scalar_lea.vmem %s5467_s6, %s3481_s8 }
 0x137   : > { %v4064_v6 = vpop.f32.mrf.mxu0 }
 0x138   : > { %v4066_v7 = vpop.f32.mrf.mxu1 }
 0x139   : > { %5551 = vst [vmem:[#allocation6_spill] sm:$0xff] %v4066_v7  ;;  %v1051_v8 = vmax.f32 %v4064_v6, %v4066_v7 }
 0x13b   : > { %1052 = vmax.xlane.f32.xlu1 %v1051_v8 }
 0x13f   : > { %v4078_v10 = vpop.f32.mrf.mxu0 }
 0x140   : > { %v4080_v11 = vpop.f32.mrf.mxu1 }
 0x141   : > { %v1054_v13 = vmax.f32 %v4078_v10, %v4080_v11 }
 0x142   : > { %885 = vmatmul.bf16.gmra.mxu0 %v3498_v1 }
 0x143   : > { %1055 = vmax.xlane.f32.xlu2 %v1054_v13  ;;  %974 = vmatmul.bf16.gmra.mxu1 %v3498_v1 }
 0x146   : > { %v1014_v15 = vpop.xlane.xlu0 %1013 }
 0x147   : > { %v4103_v16 = vmax.f32 %v4094_v14, %v1014_v15  ;;  %v4105_v17 = vpop.f32.mrf.mxu0 }
 0x148   : > { %v4107_v18 = vpop.f32.mrf.mxu1 }
 0x149   : > { %v1057_v19 = vmax.f32 %v4105_v17, %v4107_v18  ;;  %2407 = vst.msk [vmem:[#allocation2] sm:$0xff] %vm417_vm0, %v4103_v16 }
 0x14b   : > { %1058 = vmax.xlane.f32.xlu0 %v1057_v19 }
 0x14e   : > { %v1017_v22 = vpop.xlane.xlu0 %1016 }
 0x14f   : > { %v4132_v23 = vmax.f32 %v4123_v21, %v1017_v22  ;;  %v4134_v24 = vpop.f32.mrf.mxu0 }
 0x150   : > { %5554 = vst [vmem:[#allocation9_spill] sm:$0xff] %v4134_v24  ;;  %v4136_v27 = vpop.f32.mrf.mxu1 }
 0x151   : > { %5553 = vst [vmem:[#allocation8_spill] sm:$0xff] %v4132_v23  ;;  %v1060_v30 = vmax.f32 %v4134_v24, %v4136_v27 }
 0x152   : > { %5555 = vst [vmem:[#allocation10_spill] sm:$0xff] %v4136_v27  ;;  %v4259_v27 = vld [vmem:[#allocation2 + $0x40] sm:$0xff] }
 0x153   : > { %2408 = vst.msk [vmem:[#allocation2 + $0x8] sm:$0xff] %vm417_vm0, %v4132_v23  ;;  %1061 = vmax.xlane.f32.xlu1 %v1060_v30 }
 0x154   : > { %5578 = vst [vmem:[#allocation33_spill] sm:$0xff] %v4259_v27 }
 0x156   : > { %v1020_v37 = vpop.xlane.xlu1 %1019 }
 0x157   : > { %v4159_v38 = vmax.f32 %v4150_v34, %v1020_v37  ;;  %v4163_v41 = vpop.f32.mrf.mxu0  ;;  %v4272_v34 = vld [vmem:[#allocation2 + $0x48] sm:$0xff] }
 0x158   : > { %5558 = vst [vmem:[#allocation13_spill] sm:$0xff] %v4163_v41  ;;  %v4171_v45 = vpop.f32.mrf.mxu1 }
 0x159   : > { %5557 = vst [vmem:[#allocation12_spill] sm:$0xff] %v4159_v38 }
 0x15a   : > { %2409 = vst.msk [vmem:[#allocation2 + $0x10] sm:$0xff] %vm417_vm0, %v4159_v38 }
 0x15b   : > { %5559 = vst [vmem:[#allocation14_spill] sm:$0xff] %v4171_v45  ;;  %1238 = vperm.xlu2 %3591, %v4103_v16  }
 0x15c   : > { %5580 = vst [vmem:[#allocation35_spill] sm:$0xff] %v4272_v34 }
 0x15e   : > { %v1023_v51 = vpop.xlane.xlu1 %1022 }
 0x15f   : > { %v4187_v52 = vmax.f32 %v4178_v48, %v1023_v51  ;;  %1243 = vperm.xlu0 %3592, %v4132_v23   ;;  %v4192_v55 = vpop.f32.mrf.mxu0  ;;  %v4234_v51 = vld [vmem:[#allocation2 + $0x30] sm:$0xff] }
 0x160   : > { %5562 = vst [vmem:[#allocation17_spill] sm:$0xff] %v4192_v55  ;;  %v4200_v61 = vpop.f32.mrf.mxu1 }
 0x161   : > { %5561 = vst [vmem:[#allocation16_spill] sm:$0xff] %v4187_v52 }
 0x162   : > { %2410 = vst.msk [vmem:[#allocation2 + $0x18] sm:$0xff] %vm417_vm0, %v4187_v52 }
 0x163   : > { %5563 = vst [vmem:[#allocation18_spill] sm:$0xff] %v4200_v61 }
 0x164   : > { %5572 = vst [vmem:[#allocation27_spill] sm:$0xff] %v4234_v51 }
 0x166   : > { %v1026_v2 = vpop.xlane.xlu2 %1025 }
 0x167   : > { %v4210_v5 = vmax.f32 %v4206_v62, %v1026_v2  ;;  %v4212_v8 = vpop.f32.mrf.mxu0 }
 0x168   : > { %5566 = vst [vmem:[#allocation21_spill] sm:$0xff] %v4212_v8  ;;  %v4218_v13 = vpop.f32.mrf.mxu1 }
 0x169   : > { %5565 = vst [vmem:[#allocation20_spill] sm:$0xff] %v4210_v5 }
 0x16a   : > { %2411 = vst.msk [vmem:[#allocation2 + $0x20] sm:$0xff] %vm417_vm0, %v4210_v5 }
 0x16b   : > { %5567 = vst [vmem:[#allocation22_spill] sm:$0xff] %v4218_v13 }
 0x16c   : > { %1248 = vperm.xlu1 %3593, %v4159_v38  }
 0x16e   : > { %v1029_v15 = vpop.xlane.xlu2 %1028 }
 0x16f   : > { %v4224_v19 = vmax.f32 %v4221_v12, %v1029_v15  ;;  %v4226_v22 = vpop.f32.mrf.mxu0 }
 0x170   : > { %5570 = vst [vmem:[#allocation25_spill] sm:$0xff] %v4226_v22  ;;  %v4232_v37 = vpop.f32.mrf.mxu1 }
 0x171   : > { %5569 = vst [vmem:[#allocation24_spill] sm:$0xff] %v4224_v19 }
 0x172   : > { %2412 = vst.msk [vmem:[#allocation2 + $0x28] sm:$0xff] %vm417_vm0, %v4224_v19 }
 0x173   : > { %5571 = vst [vmem:[#allocation26_spill] sm:$0xff] %v4232_v37 }
 0x176   : > { %v1032_v2 = vpop.xlane.xlu0 %1031 }
 0x177   : > { %v4238_v58 = vmax.f32 %v4234_v51, %v1032_v2  ;;  %v4240_v15 = vpop.f32.mrf.mxu0  ;;  %v1063_v2 = vmax.f32 %v4163_v41, %v4171_v45  ;;  %v1066_v51 = vmax.f32 %v4192_v55, %v4200_v61  ;;  %v1069_v61 = vmax.f32 %v4212_v8, %v4218_v13 }
 0x178   : > { %5573 = vst [vmem:[#allocation28_spill] sm:$0xff] %v4240_v15  ;;  %v4244_v30 = vpop.f32.mrf.mxu1 }
 0x179   : > { %2413 = vst.msk [vmem:[#allocation2 + $0x30] sm:$0xff] %vm417_vm0, %v4238_v58 }
 0x17a   : > { %5574 = vst [vmem:[#allocation29_spill] sm:$0xff] %v4244_v30 }
 0x17e   : > { %v1035_v31 = vpop.xlane.xlu1 %1034 }
 0x17f   : > { %v4249_v9 = vmax.f32 %v4246_v44, %v1035_v31  ;;  %v4251_v20 = vpop.f32.mrf.mxu0 }
 0x180   : > { %5576 = vst [vmem:[#allocation31_spill] sm:$0xff] %v4251_v20  ;;  %v4255_v1 = vpop.f32.mrf.mxu1 }
 0x181   : > { %2414 = vst.msk [vmem:[#allocation2 + $0x38] sm:$0xff] %vm417_vm0, %v4249_v9 }
 0x182   : > { %5577 = vst [vmem:[#allocation32_spill] sm:$0xff] %v4255_v1 }
 0x184   : > { %1064 = vmax.xlane.f32.xlu2 %v1063_v2  ;;  %v1075_v2 = vmax.f32 %v4240_v15, %v4244_v30 }
 0x186   : > { %v1038_v12 = vpop.xlane.xlu2 %1037 }
 0x187   : > { %v4264_v31 = vmax.f32 %v4259_v27, %v1038_v12  ;;  %v4266_v48 = vpop.f32.mrf.mxu0 }
 0x188   : > { %v4270_v38 = vpop.f32.mrf.mxu1 }
 0x189   : > { %5579 = vst [vmem:[#allocation34_spill] sm:$0xff] %v4264_v31  ;;  %1067 = vmax.xlane.f32.xlu0 %v1066_v51  ;;  %v4285_v51 = vld [vmem:[#allocation2 + $0x50] sm:$0xff] }
 0x18a   : > { %2415 = vst.msk [vmem:[#allocation2 + $0x40] sm:$0xff] %vm417_vm0, %v4264_v31 }
 0x18b   : > { %5583 = vst [vmem:[#allocation38_spill] sm:$0xff] %v4285_v51 }
 0x18e   : > { %v1041_v23 = vpop.xlane.xlu0 %1040 }
 0x18f   : > { %v4277_v21 = vmax.f32 %v4272_v34, %v1041_v23  ;;  %v4283_v27 = vpop.f32.mrf.mxu0  ;;  %v4299_v34 = vld [vmem:[#allocation2 + $0x58] sm:$0xff] }
 0x190   : > { %v4281_v12 = vpop.f32.mrf.mxu1  ;;  %5582 = vst [vmem:[#allocation37_spill] sm:$0xff] %v4283_v27 }
 0x191   : > { %2416 = vst.msk [vmem:[#allocation2 + $0x48] sm:$0xff] %vm417_vm0, %v4277_v21  ;;  %1076 = vmax.xlane.f32.xlu0 %v1075_v2  ;;  %v1084_v30 = vmax.f32 %v4283_v27, %v4281_v12  ;;  %v3506_v2 = vld [vmem:[%s4305_s11 + $0xb8] sm:$0xff]  ;;  %v3504_v27 = vld [vmem:[%s4305_s11 + $0xa8] sm:$0xff] }
 0x192   : > { %5581 = vst [vmem:[#allocation36_spill] sm:$0xff] %v4281_v12  ;;  %2165 = vmatpush.bf16.msrb.mxu0 %v3506_v2  ;;  %3539 = vmatpush.bf16.msrb.mxu1 %v3506_v2  ;;  %v4315_v12 = vld [vmem:[#allocation2 + $0x60] sm:$0xff] }
 0x193   : > { %5585 = vst [vmem:[#allocation40_spill] sm:$0xff] %v4299_v34  ;;  %3540 = vmatpush.bf16.msra.mxu2 %v3506_v2  ;;  %3541 = vmatpush.bf16.msra.mxu3 %v3506_v2  ;;  %v3503_v2 = vld [vmem:[%s4305_s11 + $0xa0] sm:$0xff] }
 0x194   : > { %5586 = vst [vmem:[#allocation41_spill] sm:$0xff] %v4315_v12 }
 0x196   : > { %v1044_v15 = vpop.xlane.xlu1 %1043  ;;  %1070 = vmax.xlane.f32.xlu1 %v1069_v61 }
 0x197   : > { %v4292_v23 = vmax.f32 %v4285_v51, %v1044_v15 }
 0x198   : > { %v4350_v51 = vpop.f32.mrf.mxu1 }
 0x199   : > { %5584 = vst [vmem:[#allocation39_spill] sm:$0xff] %v4292_v23  ;;  %1085 = vmax.xlane.f32.xlu0 %v1084_v30  ;;  %v3505_v30 = vld [vmem:[%s4305_s11 + $0xb0] sm:$0xff] }
 0x19a   : > { %2417 = vst.msk [vmem:[#allocation2 + $0x50] sm:$0xff] %vm417_vm0, %v4292_v23  ;;  %2166 = vmatpush.bf16.msrb.mxu0 %v3505_v30  ;;  %3542 = vmatpush.bf16.msrb.mxu1 %v3505_v30 }
 0x19b   : > { %3543 = vmatpush.bf16.msra.mxu2 %v3505_v30  ;;  %3544 = vmatpush.bf16.msra.mxu3 %v3505_v30  ;;  %5590 = vst [vmem:[#allocation45_spill] sm:$0xff] %v4350_v51 }
 0x19c   : > { %1253 = vperm.xlu2 %3591, %v4187_v52   ;;  %v3502_v52 = vld [vmem:[%s4305_s11 + $0x98] sm:$0xff] }
 0x19e   : > { %v1047_v61 = vpop.xlane.xlu2 %1046  ;;  %2167 = vmatpush.bf16.msrb.mxu0 %v3504_v27  ;;  %3545 = vmatpush.bf16.msrb.mxu1 %v3504_v27 }
 0x19f   : > { %v4308_v15 = vmax.f32 %v4299_v34, %v1047_v61  ;;  %3546 = vmatpush.bf16.msra.mxu2 %v3504_v27  ;;  %3547 = vmatpush.bf16.msra.mxu3 %v3504_v27  ;;  %v4324_v34 = vld [vmem:[#allocation2 + $0x68] sm:$0xff]  ;;  %v3499_v27 = vld [vmem:[%s4305_s11 + $0x80] sm:$0xff] }
 0x1a0   : > { %5587 = vst [vmem:[#allocation42_spill] sm:$0xff] %v4324_v34  ;;  %v4363_v44 = vpop.f32.mrf.mxu1 }
 0x1a1   : > { %2418 = vst.msk [vmem:[#allocation2 + $0x58] sm:$0xff] %vm417_vm0, %v4308_v15 }
 0x1a2   : > { %2168 = vmatpush.bf16.msrb.mxu0 %v3503_v2  ;;  %3548 = vmatpush.bf16.msrb.mxu1 %v3503_v2 }
 0x1a3   : > { %3549 = vmatpush.bf16.msra.mxu2 %v3503_v2  ;;  %3550 = vmatpush.bf16.msra.mxu3 %v3503_v2 }
 0x1a4   : > { %1258 = vperm.xlu2 %3591, %v4210_v5  }
 0x1a6   : > { %v1050_v61 = vpop.xlane.xlu0 %1049  ;;  %2169 = vmatpush.bf16.msrb.mxu0 %v3502_v52  ;;  %3551 = vmatpush.bf16.msrb.mxu1 %v3502_v52 }
 0x1a7   : > { %v4318_v13 = vmax.f32 %v4315_v12, %v1050_v61  ;;  %3552 = vmatpush.bf16.msra.mxu2 %v3502_v52  ;;  %v3501_v12 = vld [vmem:[%s4305_s11 + $0x90] sm:$0xff]  ;;  %3553 = vmatpush.bf16.msra.mxu3 %v3502_v52  ;;  %v4348_v52 = vld [vmem:[#allocation2 + $0x78] sm:$0xff] }
 0x1a8   : > { %5589 = vst [vmem:[#allocation44_spill] sm:$0xff] %v4348_v52 }
 0x1a9   : > { %2419 = vst.msk [vmem:[#allocation2 + $0x60] sm:$0xff] %vm417_vm0, %v4318_v13 }
 0x1aa   : > { %2170 = vmatpush.bf16.msrb.mxu0 %v3501_v12  ;;  %3554 = vmatpush.bf16.msrb.mxu1 %v3501_v12 }
 0x1ab   : > { %3555 = vmatpush.bf16.msra.mxu2 %v3501_v12  ;;  %3556 = vmatpush.bf16.msra.mxu3 %v3501_v12 }
 0x1ad   : > { %1288 = vperm.xlu0 %3592, %v4292_v23   ;;  %v4337_v23 = vld [vmem:[#allocation2 + $0x70] sm:$0xff] }
 0x1ae   : > { %v1053_v30 = vpop.xlane.xlu1 %1052  ;;  %5588 = vst [vmem:[#allocation43_spill] sm:$0xff] %v4337_v23 }
 0x1af   : > { %v4329_v61 = vmax.f32 %v4324_v34, %v1053_v30  ;;  %1263 = vperm.xlu1 %3593, %v4224_v19   ;;  %v3500_v19 = vld [vmem:[%s4305_s11 + $0x88] sm:$0xff]  ;;  %v4346_v34 = vpop.f32.mrf.mxu0 }
 0x1b0   : > { %2171 = vmatpush.bf16.msrb.mxu0 %v3500_v19  ;;  %3557 = vmatpush.bf16.msrb.mxu1 %v3500_v19 }
 0x1b1   : > { %2420 = vst.msk [vmem:[#allocation2 + $0x68] sm:$0xff] %vm417_vm0, %v4329_v61  ;;  %3558 = vmatpush.bf16.msra.mxu2 %v3500_v19  ;;  %3559 = vmatpush.bf16.msra.mxu3 %v3500_v19  ;;  %v4359_v19 = vld [vmem:[#allocation2 + $0x80] sm:$0xff] }
 0x1b2   : > { %5591 = vst [vmem:[#allocation46_spill] sm:$0xff] %v4359_v19 }
 0x1b4   : > { %2172 = vmatpush.bf16.msrb.mxu0 %v3499_v27  ;;  %3560 = vmatpush.bf16.msrb.mxu1 %v3499_v27 }
 0x1b5   : > { %3561 = vmatpush.bf16.msra.mxu2 %v3499_v27  ;;  %3562 = vmatpush.bf16.msra.mxu3 %v3499_v27  ;;  %v4379_v27 = vpop.f32.mrf.mxu1 }
 0x1b6   : > { %v1056_v30 = vpop.xlane.xlu2 %1055  ;;  %5595 = vst [vmem:[#allocation50_spill] sm:$0xff] %v4379_v27 }
 0x1b7   : > { %v4340_v2 = vmax.f32 %v4337_v23, %v1056_v30  ;;  %v4361_v41 = vpop.f32.mrf.mxu0 }
 0x1b9   : > { %2421 = vst.msk [vmem:[#allocation2 + $0x70] sm:$0xff] %vm417_vm0, %v4340_v2 }
 0x1be   : > { %v1239_v55 = vpop.permute.xlu2 %1238  ;;  %v1059_v30 = vpop.xlane.xlu0 %1058 }
 0x1bf   : > { %v1396_v12 = vsub.f32 %v3957_v25, %v1239_v55  ;;  %v1397_v23 = vsub.f32 %v3959_v26, %v1239_v55  ;;  %v4355_v7 = vmax.f32 %v4348_v52, %v1059_v30 }
 0x1c1   : > { %v1460_v8 = vmul.f32 1.442695, %v1396_v12  ;;  %v1462_v45 = vmul.f32 1.442695, %v1397_v23  ;;  %2422 = vst.msk [vmem:[#allocation2 + $0x78] sm:$0xff] %vm417_vm0, %v4355_v7  ;;  %v4377_v23 = vpop.f32.mrf.mxu0 }
 0x1c2   : > { %5594 = vst [vmem:[#allocation49_spill] sm:$0xff] %v4377_v23  ;;  %v1093_v52 = vmax.f32 %v4377_v23, %v4379_v27 }
 0x1c3   : > { %3594 = vpow2.f32 %v1460_v8  ;;  %v1072_v8 = vmax.f32 %v4226_v22, %v4232_v37  ;;  %v1078_v37 = vmax.f32 %v4251_v20, %v4255_v1 }
 0x1c4   : > { %3596 = vpow2.f32 %v1462_v45 }
 0x1c6   : > { %v1062_v24 = vpop.xlane.xlu1 %1061 }
 0x1c7   : > { %v4366_v25 = vmax.f32 %v4359_v19, %v1062_v24 }
 0x1c9   : > { %5592 = vst [vmem:[#allocation47_spill] sm:$0xff] %v4366_v25  ;;  %v3595_v26 = vpop.eup %3594 }
 0x1ca   : > { %2423 = vst.msk [vmem:[#allocation2 + $0x80] sm:$0xff] %vm417_vm0, %v4366_v25  ;;  %v4370_v55 = vpop.eup %3596 }
 0x1cb   : > { %5593 = vst [vmem:[#allocation48_spill] sm:$0xff] %v4370_v55  ;;  %v4375_v45 = vadd.f32 %v4370_v55, %v3595_v26 }
 0x1cd   : > { %1073 = vmax.xlane.f32.xlu2 %v1072_v8 }
 0x1d1   : > { %v1244_v30 = vpop.permute.xlu0 %1243 }
 0x1d2   : > { %v1398_v24 = vsub.f32 %v3963_v28, %v1244_v30  ;;  %v1399_v12 = vsub.f32 %v3965_v29, %v1244_v30  ;;  %v4409_v30 = vld [vmem:[#allocation2 + $0x90] sm:$0xff] }
 0x1d3   : > { %5598 = vst [vmem:[#allocation53_spill] sm:$0xff] %v4409_v30 }
 0x1d4   : > { %v1464_v19 = vmul.f32 1.442695, %v1398_v24  ;;  %v1466_v5 = vmul.f32 1.442695, %v1399_v12  ;;  %v4411_v24 = vpop.f32.mrf.mxu1 }
 0x1d6   : > { %3598 = vpow2.f32 %v1464_v19 }
 0x1d7   : > { %3600 = vpow2.f32 %v1466_v5  ;;  %1094 = vmax.xlane.f32.xlu0 %v1093_v52  ;;  %v4399_v5 = vld [vmem:[#allocation2 + $0x88] sm:$0xff] }
 0x1d8   : > { %5597 = vst [vmem:[#allocation52_spill] sm:$0xff] %v4399_v5 }
 0x1d9   : > { %1079 = vmax.xlane.f32.xlu1 %v1078_v37 }
 0x1dc   : > { %v3599_v8 = vpop.eup %3598 }
 0x1dd   : > { %v4387_v22 = vpop.eup %3600  ;;  %v2037_v62 = vpack.c.bf16 %v3599_v8, %v3595_v26  ;;  %v4404_v26 = vpop.f32.mrf.mxu0 }
 0x1de   : > { %5596 = vst [vmem:[#allocation51_spill] sm:$0xff] %v4387_v22  ;;  %v4390_v28 = vadd.f32 %v4387_v22, %v3599_v8  ;;  %v1249_v37 = vpop.permute.xlu1 %1248 }
 0x1df   : > { %2173 = vmatmul.bf16.vlgmr.msrb.gmra.mxu0 %v2037_v62  ;;  %v1400_v62 = vsub.f32 %v3970_v32, %v1249_v37  ;;  %v1401_v12 = vsub.f32 %v3972_v33, %v1249_v37  ;;  %v4425_v37 = vpop.f32.mrf.mxu1 }
 0x1e1   : > { %v1468_v27 = vmul.f32 1.442695, %v1400_v62 }
 0x1e3   : > { %3602 = vpow2.f32 %v1468_v27 }
 0x1e5   : > { %1268 = vperm.xlu2 %3591, %v4238_v58   ;;  %v4423_v33 = vpop.f32.mrf.mxu0 }
 0x1eb   : > { %1303 = vperm.xlu0 %3592, %v4329_v61  }
 0x1ed   : > { %1273 = vperm.xlu2 %3591, %v4249_v9  }
 0x1f2   : > { %1283 = vperm.xlu1 %3593, %v4277_v21  }
 0x1f5   : > { %1278 = vperm.xlu2 %3591, %v4264_v31   ;;  %v4421_v31 = vld [vmem:[#allocation2 + $0xa8] sm:$0xff] }
 0x1f6   : > { %5599 = vst [vmem:[#allocation54_spill] sm:$0xff] %v4421_v31 }
 0x1f7   : > { %v1065_v52 = vpop.xlane.xlu2 %1064 }
 0x1f8   : > { %v4402_v19 = vmax.f32 %v4399_v5, %v1065_v52  ;;  %v1470_v52 = vmul.f32 1.442695, %v1401_v12 }
 0x1fa   : > { %2424 = vst.msk [vmem:[#allocation2 + $0x88] sm:$0xff] %vm417_vm0, %v4402_v19  ;;  %3604 = vpow2.f32 %v1470_v52 }
 0x1fc   : > { %v1068_v8 = vpop.xlane.xlu0 %1067 }
 0x1fd   : > { %v4415_v29 = vmax.f32 %v4409_v30, %v1068_v8  ;;  %v4443_v30 = vld [vmem:[#allocation2 + $0xc0] sm:$0xff] }
 0x1fe   : > { %5601 = vst [vmem:[#allocation56_spill] sm:$0xff] %v4443_v30 }
 0x1ff   : > { %v1254_v55 = vpop.permute.xlu2 %1253  ;;  %2425 = vst.msk [vmem:[#allocation2 + $0x90] sm:$0xff] %vm417_vm0, %v4415_v29 }
 0x200   : > { %v1402_v32 = vsub.f32 %v3976_v35, %v1254_v55  ;;  %v1403_v22 = vsub.f32 %v3978_v36, %v1254_v55  ;;  %v4430_v35 = vld [vmem:[#allocation2 + $0x98] sm:$0xff]  ;;  %v4434_v36 = vpop.eup %3602 }
 0x201   : > { %5600 = vst [vmem:[#allocation55_spill] sm:$0xff] %v4430_v35  ;;  %v4438_v27 = vpop.eup %3604 }
 0x202   : > { %v1472_v5 = vmul.f32 1.442695, %v1402_v32  ;;  %v1474_v23 = vmul.f32 1.442695, %v1403_v22 }
 0x204   : > { %3606 = vpow2.f32 %v1472_v5  ;;  %v1077_v62 = vpop.xlane.xlu0 %1076 }
 0x205   : > { %3608 = vpow2.f32 %v1474_v23  ;;  %v4428_v12 = vmax.f32 %v4421_v31, %v1077_v62 }
 0x207   : > { %v1259_v8 = vpop.permute.xlu2 %1258  ;;  %2428 = vst.msk [vmem:[#allocation2 + $0xa8] sm:$0xff] %vm417_vm0, %v4428_v12 }
 0x208   : > { %v1404_v22 = vsub.f32 %v3983_v39, %v1259_v8  ;;  %v1405_v55 = vsub.f32 %v3985_v40, %v1259_v8 }
 0x209   : > { %v1071_v5 = vpop.xlane.xlu1 %1070 }
 0x20a   : > { %v3607_v52 = vpop.eup %3606  ;;  %v1476_v23 = vmul.f32 1.442695, %v1404_v22  ;;  %v1478_v32 = vmul.f32 1.442695, %v1405_v55  ;;  %v4441_v62 = vmax.f32 %v4430_v35, %v1071_v5  ;;  %v4458_v55 = vpop.f32.mrf.mxu0 }
 0x20b   : > { %v4445_v31 = vpop.eup %3608  ;;  %v2039_v1 = vpack.c.bf16 %v3607_v52, %v4434_v36  ;;  %5604 = vst [vmem:[#allocation59_spill] sm:$0xff] %v4458_v55  ;;  %v4460_v5 = vpop.f32.mrf.mxu1 }
 0x20c   : > { %5602 = vst [vmem:[#allocation57_spill] sm:$0xff] %v4445_v31  ;;  %3610 = vpow2.f32 %v1476_v23  ;;  %v1086_v39 = vpop.xlane.xlu0 %1085  ;;  %v4451_v40 = vadd.f32 %v4445_v31, %v3607_v52  ;;  %v1102_v23 = vmax.f32 %v4458_v55, %v4460_v5 }
 0x20d   : > { %2426 = vst.msk [vmem:[#allocation2 + $0x98] sm:$0xff] %vm417_vm0, %v4441_v62  ;;  %3612 = vpow2.f32 %v1478_v32  ;;  %2178 = vmatmul.bf16.gmra.mxu0 %v2039_v1  ;;  %v4456_v22 = vmax.f32 %v4443_v30, %v1086_v39  ;;  %v1087_v1 = vmax.f32 %v4346_v34, %v4350_v51  ;;  %v1081_v32 = vmax.f32 %v4266_v48, %v4270_v38 }
 0x20e   : > { %5605 = vst [vmem:[#allocation60_spill] sm:$0xff] %v4460_v5 }
 0x20f   : > { %5603 = vst [vmem:[#allocation58_spill] sm:$0xff] %v4456_v22 }
 0x210   : > { %2431 = vst.msk [vmem:[#allocation2 + $0xc0] sm:$0xff] %vm417_vm0, %v4456_v22 }
 0x212   : > { %v3611_v52 = vpop.eup %3610 }
 0x213   : > { %v4466_v35 = vpop.eup %3612 }
 0x214   : > { %5606 = vst [vmem:[#allocation61_spill] sm:$0xff] %v4466_v35  ;;  %v4469_v8 = vadd.f32 %v4466_v35, %v3611_v52 }
 0x215   : > { %1103 = vmax.xlane.f32.xlu0 %v1102_v23 }
 0x21c   : > { %1088 = vmax.xlane.f32.xlu1 %v1087_v1 }
 0x21e   : > { %1082 = vmax.xlane.f32.xlu2 %v1081_v32 }
 0x221   : > { %v1264_v39 = vpop.permute.xlu1 %1263 }
 0x222   : > { %v1406_v30 = vsub.f32 %v3989_v42, %v1264_v39  ;;  %v1407_v31 = vsub.f32 %v3991_v43, %v1264_v39  ;;  %v4487_v42 = vld [vmem:[#allocation2 + $0xa0] sm:$0xff]  ;;  %v4500_v39 = vld [vmem:[#allocation2 + $0xb0] sm:$0xff] }
 0x223   : > { %5608 = vst [vmem:[#allocation63_spill] sm:$0xff] %v4487_v42 }
 0x224   : > { %v1480_v5 = vmul.f32 1.442695, %v1406_v30  ;;  %v1482_v55 = vmul.f32 1.442695, %v1407_v31  ;;  %v4492_v30 = vpop.permute.xlu0 %1288  ;;  %5611 = vst [vmem:[#allocation66_spill] sm:$0xff] %v4500_v39 }
 0x226   : > { %3614 = vpow2.f32 %v1480_v5  ;;  %v4496_v5 = vld [vmem:[#allocation2 + $0xd8] sm:$0xff] }
 0x227   : > { %3616 = vpow2.f32 %v1482_v55  ;;  %5610 = vst [vmem:[#allocation65_spill] sm:$0xff] %v4496_v5 }
 0x229   : > { %1318 = vperm.xlu0 %3592, %v4366_v25  }
 0x22c   : > { %v3615_v23 = vpop.eup %3614 }
 0x22d   : > { %v4478_v20 = vpop.eup %3616  ;;  %v2041_v51 = vpack.c.bf16 %v3615_v23, %v3611_v52 }
 0x22e   : > { %5607 = vst [vmem:[#allocation62_spill] sm:$0xff] %v4478_v20  ;;  %v4481_v1 = vadd.f32 %v4478_v20, %v3615_v23 }
 0x22f   : > { %2183 = vmatmul.bf16.gmra.mxu0 %v2041_v51 }
 0x235   : > { %1298 = vperm.xlu1 %3593, %v4318_v13  }
 0x236   : > { %1293 = vperm.xlu2 %3591, %v4308_v15  }
 0x240   : > { %v1074_v43 = vpop.xlane.xlu2 %1073 }
 0x241   : > { %v4490_v31 = vmax.f32 %v4487_v42, %v1074_v43 }
 0x243   : > { %5609 = vst [vmem:[#allocation64_spill] sm:$0xff] %v4490_v31 }
 0x244   : > { %2427 = vst.msk [vmem:[#allocation2 + $0xa0] sm:$0xff] %vm417_vm0, %v4490_v31 }
 0x248   : > { %v1269_v55 = vpop.permute.xlu2 %1268 }
 0x249   : > { %v1408_v51 = vsub.f32 %v3996_v46, %v1269_v55  ;;  %v1409_v52 = vsub.f32 %v3998_v47, %v1269_v55 }
 0x24a   : > { %v1095_v23 = vpop.xlane.xlu0 %1094 }
 0x24b   : > { %v1484_v32 = vmul.f32 1.442695, %v1408_v51  ;;  %v1486_v35 = vmul.f32 1.442695, %v1409_v52  ;;  %v4503_v43 = vmax.f32 %v4496_v5, %v1095_v23 }
 0x24c   : > { %v1080_v42 = vpop.xlane.xlu1 %1079 }
 0x24d   : > { %5612 = vst [vmem:[#allocation67_spill] sm:$0xff] %v4503_v43  ;;  %3618 = vpow2.f32 %v1484_v32  ;;  %v4506_v20 = vmax.f32 %v4500_v39, %v1080_v42 }
 0x24e   : > { %2434 = vst.msk [vmem:[#allocation2 + $0xd8] sm:$0xff] %vm417_vm0, %v4503_v43  ;;  %3620 = vpow2.f32 %v1486_v35 }
 0x24f   : > { %5613 = vst [vmem:[#allocation68_spill] sm:$0xff] %v4506_v20 }
 0x250   : > { %2429 = vst.msk [vmem:[#allocation2 + $0xb0] sm:$0xff] %vm417_vm0, %v4506_v20  ;;  %v1274_v46 = vpop.permute.xlu2 %1273 }
 0x251   : > { %v1410_v47 = vsub.f32 %v4002_v49, %v1274_v46  ;;  %v1411_v55 = vsub.f32 %v4004_v50, %v1274_v46  ;;  %v1096_v46 = vmax.f32 %v4404_v26, %v4411_v24 }
 0x253   : > { %v3619_v51 = vpop.eup %3618  ;;  %v1488_v52 = vmul.f32 1.442695, %v1410_v47  ;;  %v1490_v23 = vmul.f32 1.442695, %v1411_v55  ;;  %1653 = vadd.xlane.f32.xlu0 %v4375_v45  ;;  %v1090_v55 = vmax.f32 %v4361_v41, %v4363_v44 }
 0x254   : > { %v4515_v32 = vpop.eup %3620 }
 0x255   : > { %5614 = vst [vmem:[#allocation69_spill] sm:$0xff] %v4515_v32  ;;  %3622 = vpow2.f32 %v1488_v52  ;;  %v4518_v42 = vadd.f32 %v4515_v32, %v3619_v51  ;;  %v1099_v32 = vmax.f32 %v4423_v33, %v4425_v37 }
 0x256   : > { %3624 = vpow2.f32 %v1490_v23 }
 0x258   : > { %v1279_v35 = vpop.permute.xlu2 %1278 }
 0x259   : > { %v1412_v5 = vsub.f32 %v4009_v53, %v1279_v35  ;;  %v1413_v39 = vsub.f32 %v4011_v54, %v1279_v35 }
 0x25b   : > { %v3623_v49 = vpop.eup %3622  ;;  %v1492_v25 = vmul.f32 1.442695, %v1412_v5  ;;  %v1494_v50 = vmul.f32 1.442695, %v1413_v39 }
 0x25c   : > { %v4524_v47 = vpop.eup %3624  ;;  %v2043_v45 = vpack.c.bf16 %v3623_v49, %v3619_v51 }
 0x25d   : > { %5615 = vst [vmem:[#allocation70_spill] sm:$0xff] %v4524_v47  ;;  %3626 = vpow2.f32 %v1492_v25  ;;  %v1673_v52 = vadd.f32 %v4524_v47, %v3623_v49 }
 0x25e   : > { %3628 = vpow2.f32 %v1494_v50  ;;  %2188 = vmatmul.bf16.vlgmr.msrb.gmra.mxu1 %v2043_v45 }
 0x25f   : > { %1091 = vmax.xlane.f32.xlu2 %v1090_v55  ;;  %1097 = vmax.xlane.f32.xlu1 %v1096_v46 }
 0x263   : > { %v3627_v53 = vpop.eup %3626 }
 0x264   : > { %v4530_v54 = vpop.eup %3628  ;;  %v1284_v5 = vpop.permute.xlu1 %1283 }
 0x265   : > { %5616 = vst [vmem:[#allocation71_spill] sm:$0xff] %v4530_v54  ;;  %v1414_v39 = vsub.f32 %v4015_v56, %v1284_v5  ;;  %v1415_v23 = vsub.f32 %v4017_v57, %v1284_v5  ;;  %v4535_v25 = vadd.f32 %v4530_v54, %v3627_v53  ;;  %v4547_v57 = vpop.permute.xlu0 %1303  ;;  %v4549_v5 = vld [vmem:[#allocation2 + $0xf0] sm:$0xff]  ;;  %v1416_v56 = vsub.f32 %v4021_v59, %v4492_v30 }
 0x266   : > { %5618 = vst [vmem:[#allocation73_spill] sm:$0xff] %v4549_v5 }
 0x267   : > { %v1496_v51 = vmul.f32 1.442695, %v1414_v39  ;;  %v1498_v35 = vmul.f32 1.442695, %v1415_v23  ;;  %1333 = vperm.xlu0 %3592, %v4441_v62  }
 0x269   : > { %3630 = vpow2.f32 %v1496_v51 }
 0x26a   : > { %3632 = vpow2.f32 %v1498_v35  ;;  %v4558_v35 = vld [vmem:[#allocation2 + $0xb8] sm:$0xff] }
 0x26b   : > { %5620 = vst [vmem:[#allocation75_spill] sm:$0xff] %v4558_v35 }
 0x26f   : > { %v3631_v50 = vpop.eup %3630 }
 0x270   : > { %v4538_v45 = vpop.eup %3632  ;;  %v2045_v46 = vpack.c.bf16 %v3631_v50, %v3627_v53  ;;  %v4556_v53 = vld [vmem:[#allocation2 + $0xc8] sm:$0xff] }
 0x271   : > { %5617 = vst [vmem:[#allocation72_spill] sm:$0xff] %v4538_v45  ;;  %v4541_v55 = vadd.f32 %v4538_v45, %v3631_v50 }
 0x272   : > { %2193 = vmatmul.bf16.gmra.mxu1 %v2045_v46  ;;  %5619 = vst [vmem:[#allocation74_spill] sm:$0xff] %v4556_v53 }
 0x277   : > { %1308 = vperm.xlu2 %3591, %v4340_v2  }
 0x278   : > { %1313 = vperm.xlu1 %3593, %v4355_v7  }
 0x288   : > { %v1104_v39 = vpop.xlane.xlu0 %1103 }
 0x289   : > { %v4552_v23 = vmax.f32 %v4549_v5, %v1104_v39  ;;  %v1500_v5 = vmul.f32 1.442695, %v1416_v56 }
 0x28b   : > { %2437 = vst.msk [vmem:[#allocation2 + $0xf0] sm:$0xff] %vm417_vm0, %v4552_v23  ;;  %3634 = vpow2.f32 %v1500_v5 }
 0x28f   : > { %v1089_v51 = vpop.xlane.xlu1 %1088 }
 0x290   : > { %v4561_v50 = vmax.f32 %v4556_v53, %v1089_v51 }
 0x291   : > { %v1083_v46 = vpop.xlane.xlu2 %1082  ;;  %1665 = vadd.xlane.f32.xlu0 %v4469_v8 }
 0x292   : > { %5621 = vst [vmem:[#allocation76_spill] sm:$0xff] %v4561_v50  ;;  %v4567_v39 = vmax.f32 %v4558_v35, %v1083_v46  ;;  %v4576_v46 = vpop.f32.mrf.mxu1  ;;  %v4580_v35 = vpop.f32.mrf.mxu0 }
 0x293   : > { %2432 = vst.msk [vmem:[#allocation2 + $0xc8] sm:$0xff] %vm417_vm0, %v4561_v50  ;;  %v1105_v59 = vmax.f32 %v4580_v35, %v4576_v46 }
 0x294   : > { %2430 = vst.msk [vmem:[#allocation2 + $0xb8] sm:$0xff] %vm417_vm0, %v4567_v39 }
 0x299   : > { %v1294_v51 = vpop.permute.xlu2 %1293  ;;  %1674 = vadd.xlane.f32.xlu0 %v1673_v52 }
 0x29a   : > { %v1418_v53 = vsub.f32 %v4035_v63, %v1294_v51  ;;  %v1419_v8 = vsub.f32 %v4037_v0, %v1294_v51  ;;  %v3635_v63 = vpop.eup %3634  ;;  %v1422_v0 = vsub.f32 %v4064_v6, %v4547_v57 }
 0x29c   : > { %v1504_v54 = vmul.f32 1.442695, %v1418_v53  ;;  %v1506_v45 = vmul.f32 1.442695, %v1419_v8  ;;  %v1512_v5 = vmul.f32 1.442695, %v1422_v0 }
 0x29e   : > { %3636 = vpow2.f32 %v1504_v54 }
 0x29f   : > { %3638 = vpow2.f32 %v1506_v45 }
 0x2a0   : > { %1100 = vmax.xlane.f32.xlu2 %v1099_v32  ;;  %3640 = vpow2.f32 %v1512_v5 }
 0x2a2   : > { %1106 = vmax.xlane.f32.xlu1 %v1105_v59 }
 0x2a4   : > { %v3637_v49 = vpop.eup %3636 }
 0x2a5   : > { %v4586_v52 = vpop.eup %3638  ;;  %v2047_v56 = vpack.c.bf16 %v3637_v49, %v3635_v63 }
 0x2a6   : > { %5622 = vst [vmem:[#allocation77_spill] sm:$0xff] %v4586_v52  ;;  %v4589_v54 = vadd.f32 %v4586_v52, %v3637_v49  ;;  %v4594_v6 = vpop.eup %3640 }
 0x2a7   : > { %2198 = vmatmul.bf16.gmra.mxu1 %v2047_v56  ;;  %v1299_v53 = vpop.permute.xlu1 %1298  ;;  %v4607_v56 = vpop.permute.xlu0 %1318 }
 0x2a8   : > { %v1420_v32 = vsub.f32 %v4050_v3, %v1299_v53  ;;  %v1421_v45 = vsub.f32 %v4052_v4, %v1299_v53  ;;  %v5624_v3 = vsub.f32 %v4094_v14, %v4103_v16  ;;  %v1588_v53 = vld [vmem:[#allocation3] sm:$0xff]  ;;  %v4615_v14 = vld [vmem:[#allocation2 + $0xd0] sm:$0xff] }
 0x2a9   : > { %v4617_v16 = vld [vmem:[#allocation2 + $0xe0] sm:$0xff] }
 0x2aa   : > { %v1508_v51 = vmul.f32 1.442695, %v1420_v32  ;;  %v1510_v8 = vmul.f32 1.442695, %v1421_v45  ;;  %v1172_v4 = vmul.f32 1.442695, %v5624_v3  ;;  %v1417_v32 = vsub.f32 %v4023_v60, %v4492_v30 }
 0x2ab   : > { %5625 = vst [vmem:[#allocation79_spill] sm:$0xff] %v4617_v16 }
 0x2ac   : > { %3642 = vpow2.f32 %v1508_v51 }
 0x2ad   : > { %3644 = vpow2.f32 %v1510_v8  ;;  %1358 = vperm.xlu0 %3592, %v4456_v22  }
 0x2ae   : > { %3646 = vpow2.f32 %v1172_v4 }
 0x2b2   : > { %v3643_v59 = vpop.eup %3642 }
 0x2b3   : > { %v4596_v47 = vpop.eup %3644  ;;  %v2049_v0 = vpack.c.bf16 %v4594_v6, %v3643_v59 }
 0x2b4   : > { %5623 = vst [vmem:[#allocation78_spill] sm:$0xff] %v4596_v47  ;;  %v4600_v49 = vadd.f32 %v4596_v47, %v3643_v59  ;;  %v4609_v5 = vpop.eup %3646  ;;  %v1502_v59 = vmul.f32 1.442695, %v1417_v32 }
 0x2b5   : > { %2203 = vmatmul.bf16.vlgmr.msra.gmra.mxu2 %v2049_v0  ;;  %v1620_v45 = vmul.f32 %v4609_v5, %v1588_v53 }
 0x2b6   : > { %3648 = vpow2.f32 %v1502_v59  ;;  %v1658_v59 = vadd.f32 %v4438_v27, %v4434_v36 }
 0x2b8   : > { %1323 = vperm.xlu2 %3591, %v4402_v19  }
 0x2bb   : > { %1328 = vperm.xlu1 %3593, %v4415_v29  }
 0x2bc   : > { %v4619_v0 = vpop.eup %3648 }
 0x2bd   : > { %v1682_v30 = vadd.f32 %v4619_v0, %v3635_v63 }
 0x2c6   : > { %v1654_v51 = vpop.xlane.xlu0 %1653 }
 0x2c7   : > { %v1748_v8 = vadd.f32 %v1654_v51, %v1620_v45 }
 0x2c9   : > { %1781 = vst.msk [vmem:[#allocation3] sm:$0xff] %vm417_vm0, %v1748_v8 }
 0x2d2   : > { %v1092_v3 = vpop.xlane.xlu2 %1091  ;;  %v1098_v4 = vpop.xlane.xlu1 %1097 }
 0x2d3   : > { %v4622_v22 = vmax.f32 %v4615_v14, %v1092_v3  ;;  %v4625_v60 = vmax.f32 %v4617_v16, %v1098_v4 }
 0x2d5   : > { %2433 = vst.msk [vmem:[#allocation2 + $0xd0] sm:$0xff] %vm417_vm0, %v4622_v22 }
 0x2d6   : > { %2435 = vst.msk [vmem:[#allocation2 + $0xe0] sm:$0xff] %vm417_vm0, %v4625_v60 }
 0x2d7   : > { %1683 = vadd.xlane.f32.xlu0 %v1682_v30 }
 0x2da   : > { %v1309_v53 = vpop.permute.xlu2 %1308 }
 0x2db   : > { %v1424_v32 = vsub.f32 %v4078_v10, %v1309_v53  ;;  %v1425_v45 = vsub.f32 %v4080_v11, %v1309_v53 }
 0x2dd   : > { %v1516_v51 = vmul.f32 1.442695, %v1424_v32  ;;  %v1518_v8 = vmul.f32 1.442695, %v1425_v45  ;;  %v5628_v45 = vld [vmem:[#allocation19_spill] sm:$0xff] }
 0x2df   : > { %3650 = vpow2.f32 %v1516_v51  ;;  %v5629_v51 = vld [vmem:[#allocation20_spill] sm:$0xff] }
 0x2e0   : > { %3652 = vpow2.f32 %v1518_v8  ;;  %v5630_v8 = vsub.f32 %v5628_v45, %v5629_v51 }
 0x2e1   : > { %1656 = vadd.xlane.f32.xlu2 %v4390_v28 }
 0x2e5   : > { %1659 = vadd.xlane.f32.xlu1 %v1658_v59  ;;  %v3651_v63 = vpop.eup %3650  ;;  %v1180_v59 = vmul.f32 1.442695, %v5630_v8 }
 0x2e6   : > { %v4637_v3 = vpop.eup %3652 }
 0x2e7   : > { %5626 = vst [vmem:[#allocation80_spill] sm:$0xff] %v4637_v3  ;;  %v4640_v4 = vadd.f32 %v4637_v3, %v3651_v63 }
 0x2e9   : > { %1662 = vadd.xlane.f32.xlu2 %v4451_v40 }
 0x2ea   : > { %v1314_v10 = vpop.permute.xlu1 %1313 }
 0x2eb   : > { %v1426_v11 = vsub.f32 %v4105_v17, %v1314_v10  ;;  %v1427_v30 = vsub.f32 %v4107_v18, %v1314_v10  ;;  %1373 = vperm.xlu0 %3592, %v4503_v43   ;;  %v5631_v18 = vld [vmem:[#allocation30_spill] sm:$0xff]  ;;  %v4672_v17 = vld [vmem:[#allocation2 + $0xf8] sm:$0xff] }
 0x2ec   : > { %v1147_v10 = vsub.f32 %v5631_v18, %v4249_v9  ;;  %v1595_v9 = vld [vmem:[#allocation3 + $0x38] sm:$0xff]  ;;  %v4670_v18 = vld [vmem:[#allocation2 + $0xe8] sm:$0xff]  ;;  %5633 = vst [vmem:[#allocation20_spill] sm:$0xff] %v4672_v17 }
 0x2ed   : > { %v1520_v28 = vmul.f32 1.442695, %v1426_v11  ;;  %v1522_v53 = vmul.f32 1.442695, %v1427_v30  ;;  %v4658_v11 = vpop.permute.xlu0 %1333  ;;  %5632 = vst [vmem:[#allocation19_spill] sm:$0xff] %v4670_v18 }
 0x2ee   : > { %v1186_v30 = vmul.f32 1.442695, %v1147_v10 }
 0x2ef   : > { %3654 = vpow2.f32 %v1520_v28 }
 0x2f0   : > { %3656 = vpow2.f32 %v1522_v53  ;;  %v1592_v53 = vld [vmem:[#allocation3 + $0x20] sm:$0xff] }
 0x2f1   : > { %3658 = vpow2.f32 %v1180_v59 }
 0x2f2   : > { %3660 = vpow2.f32 %v1186_v30 }
 0x2f5   : > { %v3655_v36 = vpop.eup %3654 }
 0x2f6   : > { %v4646_v32 = vpop.eup %3656  ;;  %v2051_v16 = vpack.c.bf16 %v3655_v36, %v3651_v63 }
 0x2f7   : > { %5627 = vst [vmem:[#allocation81_spill] sm:$0xff] %v4646_v32  ;;  %v4652_v40 = vadd.f32 %v4646_v32, %v3655_v36  ;;  %v4661_v28 = vpop.eup %3658 }
 0x2f8   : > { %2208 = vmatmul.bf16.gmra.mxu2 %v2051_v16  ;;  %v1624_v63 = vmul.f32 %v4661_v28, %v1592_v53  ;;  %v4666_v16 = vpop.eup %3660 }
 0x2f9   : > { %v1627_v51 = vmul.f32 %v4666_v16, %v1595_v9 }
 0x2fe   : > { %1343 = vperm.xlu1 %3593, %v4428_v12  }
 0x301   : > { %1338 = vperm.xlu2 %3591, %v4490_v31  }
 0x304   : > { %v1666_v36 = vpop.xlane.xlu0 %1665 }
 0x305   : > { %v1752_v45 = vadd.f32 %v1666_v36, %v1624_v63 }
 0x307   : > { %1785 = vst.msk [vmem:[#allocation3 + $0x20] sm:$0xff] %vm417_vm0, %v1752_v45  ;;  %v5636_v45 = vld [vmem:[#allocation9_spill] sm:$0xff] }
 0x308   : > { %v1428_v9 = vsub.f32 %v5636_v45, %v4607_v56 }
 0x30c   : > { %v1675_v8 = vpop.xlane.xlu0 %1674 }
 0x30d   : > { %v1755_v59 = vadd.f32 %v1675_v8, %v1627_v51  ;;  %v1524_v8 = vmul.f32 1.442695, %v1428_v9 }
 0x30f   : > { %1788 = vst.msk [vmem:[#allocation3 + $0x38] sm:$0xff] %vm417_vm0, %v1755_v59  ;;  %3662 = vpow2.f32 %v1524_v8 }
 0x313   : > { %v1101_v10 = vpop.xlane.xlu2 %1100 }
 0x314   : > { %v4675_v30 = vmax.f32 %v4670_v18, %v1101_v10  ;;  %v5637_v10 = vld [vmem:[#allocation13_spill] sm:$0xff]  ;;  %v5638_v18 = vld [vmem:[#allocation14_spill] sm:$0xff] }
 0x315   : > { %v1107_v53 = vpop.xlane.xlu1 %1106 }
 0x316   : > { %5634 = vst [vmem:[#allocation30_spill] sm:$0xff] %v4675_v30  ;;  %v4682_v36 = vmax.f32 %v4672_v17, %v1107_v53  ;;  %1383 = vperm.xlu0 %3592, %v4675_v30   ;;  %v5643_v17 = vld [vmem:[#allocation18_spill] sm:$0xff] }
 0x317   : > { %2436 = vst.msk [vmem:[#allocation2 + $0xe8] sm:$0xff] %vm417_vm0, %v4675_v30  ;;  %v4693_v30 = vpop.eup %3662 }
 0x318   : > { %5635 = vst [vmem:[#allocation82_spill] sm:$0xff] %v4682_v36 }
 0x319   : > { %2438 = vst.msk [vmem:[#allocation2 + $0xf8] sm:$0xff] %vm417_vm0, %v4682_v36 }
 0x31b   : > { %v1324_v59 = vpop.permute.xlu2 %1323 }
 0x31c   : > { %v1430_v63 = vsub.f32 %v5637_v10, %v1324_v59  ;;  %v1431_v43 = vsub.f32 %v5638_v18, %v1324_v59  ;;  %v5640_v10 = vld [vmem:[#allocation21_spill] sm:$0xff] }
 0x31d   : > { %v1434_v18 = vsub.f32 %v5640_v10, %v4658_v11  ;;  %v5642_v59 = vld [vmem:[#allocation17_spill] sm:$0xff] }
 0x31e   : > { %v1528_v31 = vmul.f32 1.442695, %v1430_v63  ;;  %v1530_v53 = vmul.f32 1.442695, %v1431_v43 }
 0x31f   : > { %v1536_v63 = vmul.f32 1.442695, %v1434_v18 }
 0x320   : > { %3664 = vpow2.f32 %v1528_v31  ;;  %v5641_v31 = vld [vmem:[#allocation6_spill] sm:$0xff] }
 0x321   : > { %3666 = vpow2.f32 %v1530_v53  ;;  %v1423_v43 = vsub.f32 %v5641_v31, %v4547_v57 }
 0x322   : > { %3668 = vpow2.f32 %v1536_v63 }
 0x323   : > { %v1514_v52 = vmul.f32 1.442695, %v1423_v43 }
 0x326   : > { %v3665_v45 = vpop.eup %3664 }
 0x327   : > { %v4695_v3 = vpop.eup %3666  ;;  %v2053_v51 = vpack.c.bf16 %v3665_v45, %v4693_v30 }
 0x328   : > { %5639 = vst [vmem:[#allocation9_spill] sm:$0xff] %v4695_v3  ;;  %1668 = vadd.xlane.f32.xlu1 %v4481_v1  ;;  %v4700_v9 = vadd.f32 %v4695_v3, %v3665_v45  ;;  %v4709_v45 = vpop.eup %3668  ;;  %v5656_v3 = vld [vmem:[#allocation16_spill] sm:$0xff] }
 0x329   : > { %2213 = vmatmul.bf16.gmra.mxu2 %v2053_v51 }
 0x32a   : > { %1671 = vadd.xlane.f32.xlu2 %v4518_v42 }
 0x32d   : > { %v1329_v8 = vpop.permute.xlu1 %1328 }
 0x32e   : > { %v1432_v53 = vsub.f32 %v5642_v59, %v1329_v8  ;;  %v1433_v32 = vsub.f32 %v5643_v17, %v1329_v8  ;;  %v5646_v17 = vld [vmem:[#allocation38_spill] sm:$0xff]  ;;  %v5649_v8 = vld [vmem:[#allocation7_spill] sm:$0xff]  ;;  %v5650_v59 = vld [vmem:[#allocation8_spill] sm:$0xff] }
 0x330   : > { %v1532_v47 = vmul.f32 1.442695, %v1432_v53  ;;  %v1534_v1 = vmul.f32 1.442695, %v1433_v32  ;;  %v5647_v32 = vld [vmem:[#allocation39_spill] sm:$0xff]  ;;  %v5651_v53 = vsub.f32 %v5649_v8, %v5650_v59 }
 0x331   : > { %v5648_v31 = vsub.f32 %v5646_v17, %v5647_v32  ;;  %v5652_v17 = vld [vmem:[#allocation11_spill] sm:$0xff]  ;;  %v5653_v32 = vld [vmem:[#allocation12_spill] sm:$0xff] }
 0x332   : > { %3670 = vpow2.f32 %v1532_v47  ;;  %v1589_v59 = vld [vmem:[#allocation3 + $0x8] sm:$0xff] }
 0x333   : > { %3672 = vpow2.f32 %v1534_v1  ;;  %v1192_v43 = vmul.f32 1.442695, %v5648_v31  ;;  %v1174_v1 = vmul.f32 1.442695, %v5651_v53  ;;  %v5654_v31 = vsub.f32 %v5652_v17, %v5653_v32  ;;  %v1590_v17 = vld [vmem:[#allocation3 + $0x10] sm:$0xff] }
 0x334   : > { %3674 = vpow2.f32 %v1514_v52  ;;  %v4725_v52 = vpop.permute.xlu0 %1358 }
 0x335   : > { %3676 = vpow2.f32 %v1192_v43 }
 0x336   : > { %3678 = vpow2.f32 %v1174_v1 }
 0x338   : > { %v3671_v51 = vpop.eup %3670 }
 0x339   : > { %v4711_v42 = vpop.eup %3672  ;;  %v2055_v57 = vpack.c.bf16 %v4709_v45, %v3671_v51 }
 0x33a   : > { %5644 = vst [vmem:[#allocation13_spill] sm:$0xff] %v4711_v42  ;;  %v4715_v10 = vadd.f32 %v4711_v42, %v3671_v51  ;;  %v4717_v18 = vpop.eup %3674  ;;  %v1598_v51 = vld [vmem:[#allocation3 + $0x50] sm:$0xff]  ;;  %v5655_v42 = vld [vmem:[#allocation15_spill] sm:$0xff] }
 0x33b   : > { %5645 = vst [vmem:[#allocation14_spill] sm:$0xff] %v4717_v18  ;;  %2218 = vmatmul.bf16.gmra.mxu2 %v2055_v57  ;;  %v1691_v47 = vadd.f32 %v4717_v18, %v4594_v6  ;;  %v3677_v63 = vpop.eup %3676  ;;  %v1176_v6 = vmul.f32 1.442695, %v5654_v31  ;;  %v5657_v18 = vsub.f32 %v5655_v42, %v5656_v3  ;;  %v1591_v42 = vld [vmem:[#allocation3 + $0x18] sm:$0xff] }
 0x33c   : > { %v1630_v57 = vmul.f32 %v3677_v63, %v1598_v51  ;;  %v4739_v8 = vpop.eup %3678 }
 0x33d   : > { %3680 = vpow2.f32 %v1176_v6  ;;  %v1621_v53 = vmul.f32 %v4739_v8, %v1589_v59  ;;  %v5658_v59 = vld [vmem:[#allocation35_spill] sm:$0xff] }
 0x340   : > { %1692 = vadd.xlane.f32.xlu0 %v1691_v47 }
 0x341   : > { %1348 = vperm.xlu1 %3593, %v4506_v20   ;;  %v1178_v20 = vmul.f32 1.442695, %v5657_v18 }
 0x342   : > { %1353 = vperm.xlu2 %3591, %v4567_v39  }
 0x343   : > { %3682 = vpow2.f32 %v1178_v20  ;;  %v4742_v1 = vpop.eup %3680 }
 0x344   : > { %v1622_v32 = vmul.f32 %v4742_v1, %v1590_v17 }
 0x349   : > { %v3683_v31 = vpop.eup %3682 }
 0x34a   : > { %1363 = vperm.xlu2 %3591, %v4561_v50   ;;  %v1684_v43 = vpop.xlane.xlu0 %1683  ;;  %v1623_v20 = vmul.f32 %v3683_v31, %v1591_v42 }
 0x34b   : > { %v1758_v47 = vadd.f32 %v1684_v43, %v1630_v57 }
 0x34d   : > { %1791 = vst.msk [vmem:[#allocation3 + $0x50] sm:$0xff] %vm417_vm0, %v1758_v47 }
 0x354   : > { %v1657_v51 = vpop.xlane.xlu2 %1656  ;;  %1393 = vperm.xlu0 %3592, %v4682_v36  }
 0x355   : > { %v1749_v57 = vadd.f32 %v1657_v51, %v1621_v53  ;;  %v1149_v53 = vsub.f32 %v5658_v59, %v4277_v21  ;;  %v5659_v51 = vld [vmem:[#allocation25_spill] sm:$0xff] }
 0x357   : > { %1782 = vst.msk [vmem:[#allocation3 + $0x8] sm:$0xff] %vm417_vm0, %v1749_v57  ;;  %v5660_v57 = vld [vmem:[#allocation26_spill] sm:$0xff] }
 0x358   : > { %v1660_v3 = vpop.xlane.xlu1 %1659 }
 0x359   : > { %v1750_v18 = vadd.f32 %v1660_v3, %v1622_v32  ;;  %v1190_v3 = vmul.f32 1.442695, %v1149_v53 }
 0x35b   : > { %1783 = vst.msk [vmem:[#allocation3 + $0x10] sm:$0xff] %vm417_vm0, %v1750_v18  ;;  %v5661_v18 = vld [vmem:[#allocation28_spill] sm:$0xff] }
 0x35c   : > { %v1663_v6 = vpop.xlane.xlu2 %1662  ;;  %1847 = vperm.xlu0 %3592, %v4609_v5  }
 0x35d   : > { %v1751_v43 = vadd.f32 %v1663_v6, %v1623_v20  ;;  %v5662_v20 = vld [vmem:[#allocation29_spill] sm:$0xff] }
 0x35f   : > { %1784 = vst.msk [vmem:[#allocation3 + $0x18] sm:$0xff] %vm417_vm0, %v1751_v43 }
 0x364   : > { %v1339_v47 = vpop.permute.xlu2 %1338  ;;  %1862 = vperm.xlu0 %3592, %v3683_v31  }
 0x365   : > { %v1436_v17 = vsub.f32 %v5659_v51, %v1339_v47  ;;  %v1437_v36 = vsub.f32 %v5660_v57, %v1339_v47 }
 0x367   : > { %v1540_v50 = vmul.f32 1.442695, %v1436_v17  ;;  %v1542_v32 = vmul.f32 1.442695, %v1437_v36 }
 0x369   : > { %3684 = vpow2.f32 %v1540_v50 }
 0x36a   : > { %3686 = vpow2.f32 %v1542_v32 }
 0x36b   : > { %1677 = vadd.xlane.f32.xlu1 %v4535_v25  ;;  %3688 = vpow2.f32 %v1190_v3  ;;  %v5663_v25 = vld [vmem:[#allocation42_spill] sm:$0xff]  ;;  %v5666_v3 = vld [vmem:[#allocation24_spill] sm:$0xff] }
 0x36c   : > { %1867 = vperm.xlu0 %3592, %v4661_v28   ;;  %v5664_v28 = vsub.f32 %v5663_v25, %v4329_v61  ;;  %v5665_v61 = vld [vmem:[#allocation23_spill] sm:$0xff] }
 0x36e   : > { %v1198_v59 = vmul.f32 1.442695, %v5664_v28  ;;  %v1594_v28 = vld [vmem:[#allocation3 + $0x30] sm:$0xff] }
 0x36f   : > { %v3685_v5 = vpop.eup %3684 }
 0x370   : > { %v4756_v42 = vpop.eup %3686  ;;  %v1344_v31 = vpop.permute.xlu1 %1343 }
 0x371   : > { %v1438_v21 = vsub.f32 %v5661_v18, %v1344_v31  ;;  %v1439_v6 = vsub.f32 %v5662_v20, %v1344_v31  ;;  %v4761_v43 = vadd.f32 %v4756_v42, %v3685_v5  ;;  %v4763_v36 = vpop.eup %3688  ;;  %v5667_v31 = vsub.f32 %v5665_v61, %v5666_v3  ;;  %v5668_v18 = vld [vmem:[#allocation27_spill] sm:$0xff]  ;;  %v5669_v20 = vld [vmem:[#allocation40_spill] sm:$0xff] }
 0x373   : > { %v1544_v50 = vmul.f32 1.442695, %v1438_v21  ;;  %v1546_v47 = vmul.f32 1.442695, %v1439_v6  ;;  %1680 = vadd.xlane.f32.xlu2 %v4541_v55  ;;  %v1151_v6 = vsub.f32 %v5669_v20, %v4308_v15  ;;  %v3514_v55 = vld [vmem:[%s4305_s11 + $0xf8] sm:$0xff] }
 0x374   : > { %1892 = vperm.xlu0 %3592, %v4763_v36   ;;  %2254 = vmatpush.bf16.msrb.mxu3 %v3514_v55 }
 0x375   : > { %3690 = vpow2.f32 %v1544_v50  ;;  %v1593_v50 = vld [vmem:[#allocation3 + $0x28] sm:$0xff] }
 0x376   : > { %3692 = vpow2.f32 %v1546_v47  ;;  %v1194_v47 = vmul.f32 1.442695, %v1151_v6 }
 0x377   : > { %3694 = vpow2.f32 %v1198_v59 }
 0x37b   : > { %v3691_v53 = vpop.eup %3690  ;;  %1689 = vadd.xlane.f32.xlu2 %v4600_v49  ;;  %v1182_v49 = vmul.f32 1.442695, %v5667_v31 }
 0x37c   : > { %v4771_v51 = vpop.eup %3692  ;;  %1897 = vperm.xlu0 %3592, %v3677_v63   ;;  %v2057_v17 = vpack.c.bf16 %v3691_v53, %v3685_v5  ;;  %v1146_v63 = vsub.f32 %v5668_v18, %v4238_v58  ;;  %v5671_v58 = vld [vmem:[#allocation43_spill] sm:$0xff] }
 0x37d   : > { %v4774_v57 = vadd.f32 %v4771_v51, %v3691_v53  ;;  %v3695_v32 = vpop.eup %3694  ;;  %3696 = vpow2.f32 %v1182_v49  ;;  %v5670_v53 = vld [vmem:[#allocation10_spill] sm:$0xff]  ;;  %v1154_v3 = vsub.f32 %v5671_v58, %v4340_v2  ;;  %v1601_v58 = vld [vmem:[#allocation3 + $0x68] sm:$0xff] }
 0x37e   : > { %2223 = vmatmul.bf16.gmra.mxu2 %v2057_v17  ;;  %v1184_v5 = vmul.f32 1.442695, %v1146_v63  ;;  %v1429_v17 = vsub.f32 %v5670_v53, %v4607_v56  ;;  %v4794_v56 = vpop.permute.xlu0 %1373 }
 0x380   : > { %3698 = vpow2.f32 %v1184_v5  ;;  %v1526_v63 = vmul.f32 1.442695, %v1429_v17  ;;  %v1200_v5 = vmul.f32 1.442695, %v1154_v3 }
 0x381   : > { %3700 = vpow2.f32 %v1194_v47 }
 0x382   : > { %3702 = vpow2.f32 %v1526_v63 }
 0x383   : > { %v3697_v21 = vpop.eup %3696  ;;  %3704 = vpow2.f32 %v1200_v5 }
 0x384   : > { %1368 = vperm.xlu1 %3593, %v4622_v22   ;;  %1912 = vperm.xlu0 %3592, %v3695_v32   ;;  %v1625_v59 = vmul.f32 %v3697_v21, %v1593_v50 }
 0x386   : > { %v3699_v25 = vpop.eup %3698 }
 0x387   : > { %v1626_v49 = vmul.f32 %v3699_v25, %v1594_v28 }
 0x393   : > { %1872 = vperm.xlu2 %3591, %v3697_v21   ;;  %v4792_v21 = vpop.eup %3700 }
 0x39b   : > { %1877 = vperm.xlu2 %3591, %v3699_v25   ;;  %v1669_v61 = vpop.xlane.xlu1 %1668  ;;  %v4799_v25 = vpop.eup %3702 }
 0x39c   : > { %v1753_v31 = vadd.f32 %v1669_v61, %v1625_v59  ;;  %v4801_v28 = vpop.eup %3704  ;;  %v4803_v59 = vpop.permute.xlu0 %1383  ;;  %v1700_v53 = vadd.f32 %v4799_v25, %v4693_v30  ;;  %v5672_v61 = vld [vmem:[#allocation45_spill] sm:$0xff] }
 0x39d   : > { %v1672_v18 = vpop.xlane.xlu2 %1671 }
 0x39e   : > { %1786 = vst.msk [vmem:[#allocation3 + $0x28] sm:$0xff] %vm417_vm0, %v1753_v31  ;;  %v1754_v15 = vadd.f32 %v1672_v18, %v1626_v49 }
 0x3a0   : > { %1787 = vst.msk [vmem:[#allocation3 + $0x30] sm:$0xff] %vm417_vm0, %v1754_v15  ;;  %v1633_v15 = vmul.f32 %v3695_v32, %v1601_v58 }
 0x3a3   : > { %1902 = vperm.xlu2 %3591, %v4792_v21  }
 0x3a5   : > { %v1354_v20 = vpop.permute.xlu2 %1353 }
 0x3a6   : > { %v1442_v2 = vsub.f32 %v4266_v48, %v1354_v20  ;;  %v1443_v6 = vsub.f32 %v4270_v38, %v1354_v20  ;;  %v5673_v20 = vld [vmem:[#allocation31_spill] sm:$0xff] }
 0x3a8   : > { %v1552_v50 = vmul.f32 1.442695, %v1442_v2  ;;  %v1554_v47 = vmul.f32 1.442695, %v1443_v6  ;;  %v5674_v6 = vld [vmem:[#allocation32_spill] sm:$0xff] }
 0x3aa   : > { %3706 = vpow2.f32 %v1552_v50 }
 0x3ab   : > { %3708 = vpow2.f32 %v1554_v47  ;;  %1917 = vperm.xlu2 %3591, %v4801_v28  }
 0x3ad   : > { %v1364_v17 = vpop.permute.xlu2 %1363 }
 0x3ae   : > { %v1446_v48 = vsub.f32 %v4346_v34, %v1364_v17  ;;  %v1447_v38 = vsub.f32 %v5672_v61, %v1364_v17  ;;  %1686 = vadd.xlane.f32.xlu1 %v4589_v54  ;;  %1701 = vadd.xlane.f32.xlu0 %v1700_v53  ;;  %v2475_v17 = vld [vmem:[#allocation3 + $0x8] sm:$0xff] }
 0x3b0   : > { %v3707_v3 = vpop.eup %3706  ;;  %v1560_v31 = vmul.f32 1.442695, %v1446_v48  ;;  %v1562_v49 = vmul.f32 1.442695, %v1447_v38 }
 0x3b1   : > { %v4811_v18 = vpop.eup %3708 }
 0x3b2   : > { %3710 = vpow2.f32 %v1560_v31  ;;  %v4814_v63 = vadd.f32 %v4811_v18, %v3707_v3  ;;  %v5675_v31 = vld [vmem:[#allocation37_spill] sm:$0xff] }
 0x3b3   : > { %3712 = vpow2.f32 %v1562_v49  ;;  %v1693_v30 = vpop.xlane.xlu0 %1692  ;;  %v1349_v5 = vpop.permute.xlu1 %1348  ;;  %v1444_v49 = vsub.f32 %v5675_v31, %v4725_v52 }
 0x3b4   : > { %v1761_v34 = vadd.f32 %v1693_v30, %v1633_v15  ;;  %v1440_v2 = vsub.f32 %v5673_v20, %v1349_v5  ;;  %v1441_v54 = vsub.f32 %v5674_v6, %v1349_v5  ;;  %v5676_v20 = vld [vmem:[#allocation34_spill] sm:$0xff]  ;;  %v2476_v30 = vld [vmem:[#allocation3 + $0x10] sm:$0xff] }
 0x3b6   : > { %1794 = vst.msk [vmem:[#allocation3 + $0x68] sm:$0xff] %vm417_vm0, %v1761_v34  ;;  %v1548_v50 = vmul.f32 1.442695, %v1440_v2  ;;  %v1550_v47 = vmul.f32 1.442695, %v1441_v54  ;;  %v5677_v2 = vld [vmem:[#allocation33_spill] sm:$0xff] }
 0x3b7   : > { %v1556_v34 = vmul.f32 1.442695, %v1444_v49  ;;  %v1148_v6 = vsub.f32 %v5677_v2, %v5676_v20  ;;  %v2474_v2 = vld [vmem:[#allocation3] sm:$0xff] }
 0x3b8   : > { %v3711_v53 = vpop.eup %3710  ;;  %3714 = vpow2.f32 %v1548_v50 }
 0x3b9   : > { %v4819_v48 = vpop.eup %3712  ;;  %3716 = vpow2.f32 %v1550_v47  ;;  %v1188_v50 = vmul.f32 1.442695, %v1148_v6 }
 0x3ba   : > { %v4822_v32 = vadd.f32 %v4819_v48, %v3711_v53  ;;  %3718 = vrcp.f32 %v2475_v17  ;;  %v1596_v17 = vld [vmem:[#allocation3 + $0x40] sm:$0xff] }
 0x3bb   : > { %3720 = vpow2.f32 %v1556_v34 }
 0x3bc   : > { %3722 = vpow2.f32 %v1188_v50 }
 0x3be   : > { %v3715_v61 = vpop.eup %3714 }
 0x3bf   : > { %v4824_v38 = vpop.eup %3716  ;;  %v2059_v58 = vpack.c.bf16 %v3707_v3, %v3715_v61 }
 0x3c0   : > { %v4829_v15 = vadd.f32 %v4824_v38, %v3715_v61  ;;  %v3719_v5 = vpop.eup %3718  ;;  %v5678_v61 = vld [vmem:[#allocation41_spill] sm:$0xff] }
 0x3c1   : > { %2228 = vmatmul.bf16.vlgmr.msra.gmra.mxu3 %v2059_v58  ;;  %v4836_v3 = vpop.eup %3720  ;;  %v1152_v58 = vsub.f32 %v5678_v61, %v4318_v13 }
 0x3c2   : > { %2545 = vperm.xlu0 %3592, %v3719_v5   ;;  %v2061_v54 = vpack.c.bf16 %v3711_v53, %v4836_v3  ;;  %v4841_v47 = vpop.eup %3722  ;;  %v1597_v53 = vld [vmem:[#allocation3 + $0x48] sm:$0xff] }
 0x3c3   : > { %v1628_v49 = vmul.f32 %v4841_v47, %v1596_v17  ;;  %v1196_v20 = vmul.f32 1.442695, %v1152_v58  ;;  %v1600_v17 = vld [vmem:[#allocation3 + $0x60] sm:$0xff] }
 0x3c5   : > { %3724 = vpow2.f32 %v1196_v20 }
 0x3c6   : > { %v4845_v31 = vpop.permute.xlu0 %1393  ;;  %3726 = vrcp.f32 %v2474_v2 }
 0x3c7   : > { %1378 = vperm.xlu1 %3593, %v4625_v60  }
 0x3cb   : > { %v4853_v13 = vpop.eup %3724 }
 0x3cc   : > { %v3727_v61 = vpop.eup %3726  ;;  %v1632_v58 = vmul.f32 %v4853_v13, %v1600_v17  ;;  %v2480_v17 = vld [vmem:[#allocation3 + $0x30] sm:$0xff] }
 0x3cf   : > { %1388 = vperm.xlu1 %3593, %v4552_v23  }
 0x3d1   : > { %2233 = vmatmul.bf16.gmra.mxu3 %v2061_v54  ;;  %v4850_v54 = vpop.permute.xlu0 %1847 }
 0x3d4   : > { %1698 = vadd.xlane.f32.xlu2 %v4652_v40  ;;  %v1629_v40 = vmul.f32 %v4763_v36, %v1597_v53  ;;  %v5679_v36 = vld [vmem:[#allocation49_spill] sm:$0xff]  ;;  %v2479_v53 = vld [vmem:[#allocation3 + $0x28] sm:$0xff] }
 0x3d5   : > { %v1450_v20 = vsub.f32 %v5679_v36, %v4794_v56  ;;  %3728 = vrcp.f32 %v2479_v53 }
 0x3d7   : > { %v1568_v2 = vmul.f32 1.442695, %v1450_v20  ;;  %v5681_v20 = vld [vmem:[#allocation46_spill] sm:$0xff] }
 0x3d9   : > { %3730 = vpow2.f32 %v1568_v2 }
 0x3de   : > { %v1678_v5 = vpop.xlane.xlu1 %1677 }
 0x3df   : > { %v1756_v34 = vadd.f32 %v1678_v5, %v1628_v49 }
 0x3e1   : > { %1789 = vst.msk [vmem:[#allocation3 + $0x40] sm:$0xff] %vm417_vm0, %v1756_v34  ;;  %v4857_v34 = vpop.permute.xlu0 %1862 }
 0x3e6   : > { %v1681_v6 = vpop.xlane.xlu2 %1680 }
 0x3e7   : > { %v1757_v50 = vadd.f32 %v1681_v6, %v1629_v40 }
 0x3e9   : > { %1790 = vst.msk [vmem:[#allocation3 + $0x48] sm:$0xff] %vm417_vm0, %v1757_v50  ;;  %v4864_v50 = vpop.permute.xlu0 %1867 }
 0x3ec   : > { %2540 = vperm.xlu2 %3591, %v3727_v61   ;;  %1716 = vadd.xlane.f32.xlu0 %v4774_v57  ;;  %v3729_v61 = vpop.eup %3728 }
 0x3ee   : > { %v1690_v49 = vpop.xlane.xlu2 %1689 }
 0x3ef   : > { %v1760_v5 = vadd.f32 %v1690_v49, %v1632_v58  ;;  %v4866_v58 = vpop.eup %3730 }
 0x3f1   : > { %1793 = vst.msk [vmem:[#allocation3 + $0x60] sm:$0xff] %vm417_vm0, %v1760_v5  ;;  %v4869_v36 = vpop.permute.xlu0 %1892 }
 0x3f6   : > { %v1369_v40 = vpop.permute.xlu1 %1368 }
 0x3f7   : > { %v1448_v6 = vsub.f32 %v4361_v41, %v1369_v40 }
 0x3f9   : > { %1695 = vadd.xlane.f32.xlu1 %v4640_v4  ;;  %v1564_v57 = vmul.f32 1.442695, %v1448_v6  ;;  %v5680_v4 = vld [vmem:[#allocation47_spill] sm:$0xff]  ;;  %v4873_v2 = vpop.permute.xlu0 %1897 }
 0x3fa   : > { %v1156_v53 = vsub.f32 %v5681_v20, %v5680_v4 }
 0x3fb   : > { %3732 = vpow2.f32 %v1564_v57 }
 0x3fc   : > { %3734 = vrcp.f32 %v2480_v17  ;;  %v1204_v6 = vmul.f32 1.442695, %v1156_v53 }
 0x3fe   : > { %3736 = vpow2.f32 %v1204_v6 }
 0x3ff   : > { %3738 = vrcp.f32 %v2476_v30  ;;  %v3512_v30 = vld [vmem:[%s4305_s11 + $0xe8] sm:$0xff] }
 0x400   : > { %2565 = vperm.xlu0 %3592, %v3729_v61   ;;  %v1604_v61 = vld [vmem:[#allocation3 + $0x80] sm:$0xff] }
 0x401   : > { %v3733_v49 = vpop.eup %3732  ;;  %v4877_v57 = vpop.permute.xlu0 %1912 }
 0x402   : > { %v2063_v5 = vpack.c.bf16 %v4866_v58, %v3733_v49  ;;  %v3735_v41 = vpop.eup %3734 }
 0x404   : > { %2238 = vmatmul.bf16.gmra.mxu3 %v2063_v5  ;;  %v4880_v17 = vpop.eup %3736  ;;  %v1599_v5 = vld [vmem:[#allocation3 + $0x58] sm:$0xff] }
 0x405   : > { %v1636_v4 = vmul.f32 %v4880_v17, %v1604_v61  ;;  %v1631_v20 = vmul.f32 %v4792_v21, %v1599_v5  ;;  %v5682_v21 = vld [vmem:[#allocation44_spill] sm:$0xff] }
 0x406   : > { %v1155_v61 = vsub.f32 %v5682_v21, %v4355_v7  ;;  %v1454_v7 = vsub.f32 %v4423_v33, %v4803_v59 }
 0x408   : > { %2570 = vperm.xlu0 %3592, %v3735_v41   ;;  %v4882_v41 = vpop.permute.xlu2 %1872 }
 0x412   : > { %1852 = vperm.xlu1 %3593, %v4739_v8  }
 0x415   : > { %1707 = vadd.xlane.f32.xlu2 %v4715_v10 }
 0x41a   : > { %1857 = vperm.xlu1 %3593, %v4742_v1   ;;  %v1449_v1 = vsub.f32 %v4363_v44, %v1369_v40  ;;  %v3511_v44 = vld [vmem:[%s4305_s11 + $0xe0] sm:$0xff] }
 0x41c   : > { %v1566_v5 = vmul.f32 1.442695, %v1449_v1 }
 0x41e   : > { %3740 = vpow2.f32 %v1566_v5 }
 0x421   : > { %v1702_v8 = vpop.xlane.xlu0 %1701  ;;  %v1687_v53 = vpop.xlane.xlu1 %1686 }
 0x422   : > { %v1764_v10 = vadd.f32 %v1702_v8, %v1636_v4  ;;  %v1759_v6 = vadd.f32 %v1687_v53, %v1631_v20  ;;  %1882 = vperm.xlu1 %3593, %v4666_v16   ;;  %v4894_v4 = vpop.permute.xlu2 %1877  ;;  %v3739_v16 = vpop.eup %3738  ;;  %v3513_v20 = vld [vmem:[%s4305_s11 + $0xf0] sm:$0xff]  ;;  %v1202_v8 = vmul.f32 1.442695, %v1155_v61  ;;  %v3510_v53 = vld [vmem:[%s4305_s11 + $0xd8] sm:$0xff]  ;;  %v1459_v61 = vsub.f32 %v4576_v46, %v4845_v31 }
 0x423   : > { %2255 = vmatpush.bf16.msrb.mxu3 %v3513_v20 }
 0x424   : > { %1797 = vst.msk [vmem:[#allocation3 + $0x80] sm:$0xff] %vm417_vm0, %v1764_v10  ;;  %3742 = vpow2.f32 %v1202_v8  ;;  %v4903_v55 = vpop.eup %3740  ;;  %v1576_v10 = vmul.f32 1.442695, %v1454_v7  ;;  %v3508_v8 = vld [vmem:[%s4305_s11 + $0xc8] sm:$0xff] }
 0x425   : > { %1792 = vst.msk [vmem:[#allocation3 + $0x58] sm:$0xff] %vm417_vm0, %v1759_v6  ;;  %v5684_v7 = vld [vmem:[#allocation59_spill] sm:$0xff] }
 0x426   : > { %3744 = vpow2.f32 %v1576_v10 }
 0x427   : > { %2256 = vmatpush.bf16.msrb.mxu3 %v3512_v30 }
 0x42a   : > { %1887 = vperm.xlu1 %3593, %v4841_v47   ;;  %v1455_v47 = vsub.f32 %v4425_v37, %v4803_v59  ;;  %v4907_v40 = vpop.permute.xlu2 %1902  ;;  %v5683_v37 = vld [vmem:[#allocation52_spill] sm:$0xff] }
 0x42b   : > { %2257 = vmatpush.bf16.msrb.mxu3 %v3511_v44  ;;  %v1157_v59 = vsub.f32 %v5683_v37, %v4402_v19 }
 0x42c   : > { %v1578_v6 = vmul.f32 1.442695, %v1455_v47  ;;  %v5685_v47 = vld [vmem:[#allocation60_spill] sm:$0xff]  ;;  %v2485_v10 = vld [vmem:[#allocation3 + $0x58] sm:$0xff] }
 0x42d   : > { %2550 = vperm.xlu2 %3591, %v3739_v16   ;;  %v3509_v16 = vld [vmem:[%s4305_s11 + $0xd0] sm:$0xff]  ;;  %v1206_v20 = vmul.f32 1.442695, %v1157_v59  ;;  %v3507_v59 = vld [vmem:[%s4305_s11 + $0xc0] sm:$0xff]  ;;  %s5271_s11 = scalar_lea.vmem %s5461_s0, %s3481_s8 }
 0x42e   : > { %3746 = vpow2.f32 %v1578_v6  ;;  %v5686_v6 = vld [vmem:[#allocation22_spill] sm:$0xff] }
 0x42f   : > { %2258 = vmatpush.bf16.msrb.mxu3 %v3510_v53  ;;  %v1603_v53 = vld [vmem:[#allocation3 + $0x78] sm:$0xff] }
 0x432   : > { %1907 = vperm.xlu1 %3593, %v4853_v13   ;;  %1722 = vadd.xlane.f32.xlu0 %v4814_v63  ;;  %v1730_v13 = vadd.f32 %v4903_v55, %v3733_v49  ;;  %v3743_v63 = vpop.eup %3742 }
 0x433   : > { %2259 = vmatpush.bf16.msrb.mxu3 %v3509_v16  ;;  %v4921_v19 = vpop.eup %3744 }
 0x437   : > { %2260 = vmatpush.bf16.msrb.mxu3 %v3508_v8 }
 0x439   : > { %v1379_v1 = vpop.permute.xlu1 %1378 }
 0x43a   : > { %v1452_v21 = vsub.f32 %v4404_v26, %v1379_v1  ;;  %v1453_v33 = vsub.f32 %v4411_v24, %v1379_v1  ;;  %1922 = vperm.xlu1 %3593, %v3743_v63   ;;  %1731 = vadd.xlane.f32.xlu0 %v1730_v13  ;;  %v4918_v26 = vpop.permute.xlu2 %1917  ;;  %v1586_v24 = vmul.f32 1.442695, %v1459_v61  ;;  %v4926_v13 = vpop.eup %3746  ;;  %v1435_v1 = vsub.f32 %v5686_v6, %v4658_v11  ;;  %v2478_v11 = vld [vmem:[#allocation3 + $0x20] sm:$0xff] }
 0x43b   : > { %2261 = vmatpush.bf16.msrb.mxu3 %v3507_v59 }
 0x43c   : > { %v1572_v5 = vmul.f32 1.442695, %v1452_v21  ;;  %v1574_v49 = vmul.f32 1.442695, %v1453_v33  ;;  %v1538_v8 = vmul.f32 1.442695, %v1435_v1 }
 0x43e   : > { %3748 = vpow2.f32 %v1572_v5  ;;  %v1635_v5 = vmul.f32 %v3743_v63, %v1603_v53  ;;  %v5688_v53 = vld [vmem:[#allocation54_spill] sm:$0xff] }
 0x43f   : > { %3750 = vpow2.f32 %v1574_v49 }
 0x440   : > { %3752 = vpow2.f32 %v1206_v20  ;;  %v5687_v20 = vld [vmem:[#allocation55_spill] sm:$0xff] }
 0x441   : > { %v1389_v30 = vpop.permute.xlu1 %1388  ;;  %3754 = vpow2.f32 %v1586_v24  ;;  %v1159_v24 = vsub.f32 %v5687_v20, %v4441_v62 }
 0x442   : > { %v1456_v44 = vsub.f32 %v5684_v7, %v1389_v30  ;;  %v1457_v46 = vsub.f32 %v5685_v47, %v1389_v30  ;;  %1927 = vperm.xlu1 %3593, %v4880_v17   ;;  %3756 = vrcp.f32 %v2485_v10  ;;  %v1458_v17 = vsub.f32 %v4580_v35, %v4845_v31 }
 0x443   : > { %v1210_v47 = vmul.f32 1.442695, %v1159_v24  ;;  %v1161_v10 = vsub.f32 %v5688_v53, %v4428_v12  ;;  %v1609_v24 = vld [vmem:[#allocation3 + $0xa8] sm:$0xff] }
 0x444   : > { %v3749_v21 = vpop.eup %3748  ;;  %v1580_v33 = vmul.f32 1.442695, %v1456_v44  ;;  %v1582_v37 = vmul.f32 1.442695, %v1457_v46  ;;  %v1584_v35 = vmul.f32 1.442695, %v1458_v17  ;;  %v4968_v17 = vpop.permute.xlu0 %2545 }
 0x445   : > { %v4931_v61 = vpop.eup %3750  ;;  %v2065_v49 = vpack.c.bf16 %v4921_v19, %v3749_v21 }
 0x446   : > { %3758 = vpow2.f32 %v1580_v33  ;;  %v4937_v16 = vadd.f32 %v4931_v61, %v3749_v21  ;;  %v4943_v7 = vpop.eup %3752  ;;  %v1214_v33 = vmul.f32 1.442695, %v1161_v10 }
 0x447   : > { %3760 = vpow2.f32 %v1582_v37  ;;  %v1699_v30 = vpop.xlane.xlu2 %1698  ;;  %2243 = vmatmul.bf16.gmra.mxu3 %v2065_v49  ;;  %v4945_v44 = vpop.eup %3754 }
 0x448   : > { %v1763_v63 = vadd.f32 %v1699_v30, %v1635_v5  ;;  %v3757_v31 = vpop.eup %3756  ;;  %3762 = vpow2.f32 %v1538_v8  ;;  %v2487_v5 = vld [vmem:[#allocation3 + $0x68] sm:$0xff] }
 0x449   : > { %3764 = vpow2.f32 %v1584_v35  ;;  %v5689_v35 = vld [vmem:[#allocation51_spill] sm:$0xff] }
 0x44a   : > { %1796 = vst.msk [vmem:[#allocation3 + $0x78] sm:$0xff] %vm417_vm0, %v1763_v63  ;;  %1932 = vperm.xlu1 %3593, %v4943_v7   ;;  %3766 = vpow2.f32 %v1210_v47 }
 0x44b   : > { %3768 = vpow2.f32 %v1214_v33  ;;  %v2481_v33 = vld [vmem:[#allocation3 + $0x38] sm:$0xff] }
 0x44c   : > { %v3759_v46 = vpop.eup %3758  ;;  %3770 = vrcp.f32 %v2487_v5  ;;  %v5692_v5 = vld [vmem:[#allocation53_spill] sm:$0xff] }
 0x44d   : > { %v4949_v62 = vpop.eup %3760  ;;  %3772 = vrcp.f32 %v2481_v33 }
 0x44e   : > { %2595 = vperm.xlu0 %3592, %v3757_v31   ;;  %v4954_v6 = vadd.f32 %v4949_v62, %v3759_v46  ;;  %v4958_v21 = vpop.eup %3762  ;;  %v5690_v31 = vld [vmem:[#allocation48_spill] sm:$0xff] }
 0x44f   : > { %v4960_v37 = vpop.eup %3764  ;;  %v1709_v59 = vadd.f32 %v4958_v21, %v4709_v45  ;;  %v5691_v47 = vpack.c.bf16 %v5689_v35, %v5690_v31  ;;  %v2477_v35 = vld [vmem:[#allocation3 + $0x18] sm:$0xff] }
 0x450   : > { %v4964_v49 = vpop.eup %3766  ;;  %v2067_v12 = vpack.c.bf16 %v4960_v37, %v3759_v46  ;;  %v1602_v46 = vld [vmem:[#allocation3 + $0x70] sm:$0xff] }
 0x451   : > { %v4970_v20 = vpop.eup %3768  ;;  %v1634_v53 = vmul.f32 %v4801_v28, %v1602_v46 }
 0x452   : > { %v3771_v8 = vpop.eup %3770  ;;  %v1641_v45 = vmul.f32 %v4970_v20, %v1609_v24 }
 0x456   : > { %1710 = vadd.xlane.f32.xlu2 %v1709_v59  ;;  %1942 = vperm.xlu0 %3592, %v4964_v49  }
 0x457   : > { %2248 = vmatmul.bf16.gmra.mxu3 %v2067_v12  ;;  %v1158_v12 = vsub.f32 %v5692_v5, %v4415_v29  ;;  %v5696_v29 = vld [vmem:[#allocation61_spill] sm:$0xff] }
 0x459   : > { %v1208_v28 = vmul.f32 1.442695, %v1158_v12  ;;  %v4997_v12 = vpop.f32.mrf.mxu3 }
 0x45e   : > { %1719 = vadd.xlane.f32.xlu2 %v4829_v15  ;;  %2605 = vperm.xlu0 %3592, %v3771_v8   ;;  %v3773_v15 = vpop.eup %3772  ;;  %v5693_v8 = vld [vmem:[#allocation57_spill] sm:$0xff] }
 0x45f   : > { %v1717_v30 = vpop.xlane.xlu0 %1716 }
 0x460   : > { %v1769_v63 = vadd.f32 %v1717_v30, %v1641_v45  ;;  %v5694_v45 = vpack.c.bf16 %v5693_v8, %v4438_v27  ;;  %v5699_v8 = vld [vmem:[#allocation75_spill] sm:$0xff] }
 0x462   : > { %1802 = vst.msk [vmem:[#allocation3 + $0xa8] sm:$0xff] %vm417_vm0, %v1769_v63  ;;  %v4986_v63 = vpop.permute.xlu2 %2540 }
 0x467   : > { %2262 = vmatmul.bf16.vlgmr.msrb.gmra.mxu3 %v5691_v47  ;;  %v5695_v47 = vld [vmem:[#allocation62_spill] sm:$0xff] }
 0x468   : > { %v5697_v46 = vpack.c.bf16 %v5695_v47, %v5696_v29 }
 0x46c   : > { %v1696_v10 = vpop.xlane.xlu1 %1695 }
 0x46d   : > { %v1762_v59 = vadd.f32 %v1696_v10, %v1634_v53 }
 0x46f   : > { %1795 = vst.msk [vmem:[#allocation3 + $0x70] sm:$0xff] %vm417_vm0, %v1762_v59  ;;  %v5698_v59 = vld [vmem:[#allocation36_spill] sm:$0xff] }
 0x474   : > { %1704 = vadd.xlane.f32.xlu1 %v4700_v9  ;;  %v1606_v9 = vld [vmem:[#allocation3 + $0x90] sm:$0xff] }
 0x476   : > { %2575 = vperm.xlu2 %3591, %v3773_v15   ;;  %v2488_v24 = vld [vmem:[#allocation3 + $0x70] sm:$0xff]  ;;  %v1445_v15 = vsub.f32 %v5698_v59, %v4725_v52  ;;  %v2495_v59 = vld [vmem:[#allocation3 + $0xa8] sm:$0xff] }
 0x477   : > { %2267 = vmatmul.bf16.gmra.mxu3 %v5694_v45  ;;  %3774 = vrcp.f32 %v2488_v24  ;;  %v1163_v45 = vsub.f32 %v5699_v8, %v4567_v39  ;;  %v5012_v39 = vpop.f32.mrf.mxu3 }
 0x478   : > { %3776 = vpow2.f32 %v1208_v28  ;;  %v1558_v5 = vmul.f32 1.442695, %v1445_v15  ;;  %v5001_v28 = vpop.permute.xlu0 %2565 }
 0x479   : > { %3778 = vrcp.f32 %v2477_v35  ;;  %v5700_v35 = vld [vmem:[#allocation70_spill] sm:$0xff] }
 0x47d   : > { %v3775_v30 = vpop.eup %3774 }
 0x47e   : > { %2610 = vperm.xlu0 %3592, %v3775_v30   ;;  %v4988_v31 = vpop.eup %3776  ;;  %v1218_v30 = vmul.f32 1.442695, %v1163_v45 }
 0x47f   : > { %v1638_v53 = vmul.f32 %v4988_v31, %v1606_v9  ;;  %v3779_v33 = vpop.eup %3778  ;;  %v5701_v9 = vld [vmem:[#allocation69_spill] sm:$0xff]  ;;  %v5020_v8 = vpop.f32.mrf.mxu3 }
 0x480   : > { %v5702_v47 = vpack.c.bf16 %v5700_v35, %v5701_v9  ;;  %5703 = vst [vmem:[#allocation21_spill] sm:$0xff] %v5020_v8  ;;  %v5705_v35 = vld [vmem:[#allocation71_spill] sm:$0xff] }
 0x487   : > { %2272 = vmatmul.bf16.gmra.mxu3 %v5697_v46  ;;  %v5006_v46 = vpop.permute.xlu1 %1852 }
 0x488   : > { %v1708_v27 = vpop.xlane.xlu2 %1707  ;;  %v2006_v8 = vmul.f32 0.0, %v5006_v46 }
 0x489   : > { %v1766_v10 = vadd.f32 %v1708_v27, %v1638_v53  ;;  %v1166_v53 = vsub.f32 %v4615_v14, %v4622_v22  ;;  %v5014_v27 = vpop.permute.xlu0 %2570 }
 0x48b   : > { %1799 = vst.msk [vmem:[#allocation3 + $0x90] sm:$0xff] %vm417_vm0, %v1766_v10 }
 0x48d   : > { %2555 = vperm.xlu1 %3593, %v3779_v33   ;;  %v1224_v33 = vmul.f32 1.442695, %v1166_v53 }
 0x492   : > { %v2492_v24 = vld [vmem:[#allocation3 + $0x90] sm:$0xff] }
 0x493   : > { %3780 = vrcp.f32 %v2492_v24  ;;  %v5018_v24 = vpop.permute.xlu1 %1857 }
 0x494   : > { %3782 = vpow2.f32 %v1558_v5  ;;  %v1611_v5 = vld [vmem:[#allocation3 + $0xb8] sm:$0xff]  ;;  %v2007_v46 = vmul.f32 0.0, %v5018_v24 }
 0x495   : > { %3784 = vpow2.f32 %v1218_v30  ;;  %v5704_v30 = vld [vmem:[#allocation72_spill] sm:$0xff] }
 0x496   : > { %3786 = vpow2.f32 %v1224_v33  ;;  %v5706_v9 = vpack.c.bf16 %v5704_v30, %v5705_v35 }
 0x497   : > { %2277 = vmatmul.bf16.gmra.mxu3 %v5702_v47  ;;  %3788 = vrcp.f32 %v2495_v59  ;;  %v2482_v59 = vld [vmem:[#allocation3 + $0x40] sm:$0xff] }
 0x498   : > { %3790 = vrcp.f32 %v2482_v59 }
 0x499   : > { %v3781_v29 = vpop.eup %3780 }
 0x49a   : > { %v5008_v52 = vpop.eup %3782  ;;  %2630 = vperm.xlu0 %3592, %v3781_v29   ;;  %v1614_v29 = vld [vmem:[#allocation3 + $0xd0] sm:$0xff] }
 0x49b   : > { %v1724_v10 = vadd.f32 %v5008_v52, %v4836_v3  ;;  %v3785_v15 = vpop.eup %3784 }
 0x49c   : > { %v1643_v22 = vmul.f32 %v3785_v15, %v1611_v5  ;;  %v5025_v3 = vpop.eup %3786  ;;  %v5031_v5 = vpop.f32.mrf.mxu3 }
 0x49d   : > { %v3789_v47 = vpop.eup %3788  ;;  %v1646_v53 = vmul.f32 %v5025_v3, %v1614_v29  ;;  %5707 = vst [vmem:[#allocation6_spill] sm:$0xff] %v5031_v5  ;;  %v5710_v29 = vld [vmem:[#allocation68_spill] sm:$0xff] }
 0x49f   : > { %1725 = vadd.xlane.f32.xlu2 %v1724_v10  ;;  %v5029_v10 = vpop.permute.xlu1 %1882 }
 0x4a2   : > { %1962 = vperm.xlu0 %3592, %v3785_v15  }
 0x4a4   : > { %v5039_v35 = vpop.f32.mrf.mxu3 }
 0x4a5   : > { %v1723_v14 = vpop.xlane.xlu0 %1722  ;;  %5709 = vst [vmem:[#allocation17_spill] sm:$0xff] %v5039_v35 }
 0x4a6   : > { %v1771_v45 = vadd.f32 %v1723_v14, %v1643_v22  ;;  %v3791_v22 = vpop.eup %3790  ;;  %v5708_v14 = vld [vmem:[#allocation77_spill] sm:$0xff] }
 0x4a7   : > { %2282 = vmatmul.bf16.gmra.mxu3 %v5706_v9  ;;  %v2048_v30 = vpack.c.bf16 %v5708_v14, %v4619_v0  ;;  %v3538_v9 = vld [vmem:[%s5465_s4 + $0x38] sm:$0xff] }
 0x4a8   : > { %1804 = vst.msk [vmem:[#allocation3 + $0xb8] sm:$0xff] %vm417_vm0, %v1771_v45  ;;  %v5036_v45 = vpop.permute.xlu1 %1887  ;;  %2810 = vmatpush.bf16.msrb.mxu2 %v3538_v9  ;;  %v1607_v14 = vld [vmem:[#allocation3 + $0x98] sm:$0xff]  ;;  %v5714_v9 = vld [vmem:[#allocation14_spill] sm:$0xff] }
 0x4aa   : > { %2645 = vperm.xlu0 %3592, %v3789_v47   ;;  %v3537_v47 = vld [vmem:[%s5465_s4 + $0x30] sm:$0xff] }
 0x4ac   : > { %2811 = vmatpush.bf16.msrb.mxu2 %v3537_v47  ;;  %v5053_v59 = vpop.f32.mrf.mxu3  ;;  %v1639_v47 = vmul.f32 %v4964_v49, %v1607_v14  ;;  %v5716_v49 = vld [vmem:[#allocation50_spill] sm:$0xff]  ;;  %v1610_v14 = vld [vmem:[#allocation3 + $0xb0] sm:$0xff] }
 0x4ad   : > { %v1732_v33 = vpop.xlane.xlu0 %1731  ;;  %5712 = vst [vmem:[#allocation18_spill] sm:$0xff] %v5053_v59 }
 0x4ae   : > { %v1774_v15 = vadd.f32 %v1732_v33, %v1646_v53  ;;  %v5711_v53 = vld [vmem:[#allocation66_spill] sm:$0xff]  ;;  %v5049_v33 = vpop.permute.xlu2 %2550 }
 0x4af   : > { %v1162_v0 = vsub.f32 %v5711_v53, %v5710_v29  ;;  %v3535_v29 = vld [vmem:[%s5465_s4 + $0x20] sm:$0xff] }
 0x4b0   : > { %1807 = vst.msk [vmem:[#allocation3 + $0xd0] sm:$0xff] %vm417_vm0, %v1774_v15 }
 0x4b1   : > { %v1216_v15 = vmul.f32 1.442695, %v1162_v0 }
 0x4b3   : > { %3792 = vpow2.f32 %v1216_v15 }
 0x4b4   : > { %3794 = vrcp.f32 %v2478_v11 }
 0x4b7   : > { %1713 = vadd.xlane.f32.xlu1 %v4761_v43  ;;  %2580 = vperm.xlu2 %3591, %v3791_v22   ;;  %v5051_v43 = vpop.permute.xlu1 %1907  ;;  %v3536_v22 = vld [vmem:[%s5465_s4 + $0x28] sm:$0xff] }
 0x4b8   : > { %2287 = vmatmul.bf16.gmra.mxu3 %v2048_v30  ;;  %2812 = vmatpush.bf16.msrb.mxu2 %v3536_v22  ;;  %v5713_v30 = vld [vmem:[#allocation78_spill] sm:$0xff]  ;;  %v1451_v22 = vsub.f32 %v5716_v49, %v4794_v56  ;;  %v3532_v56 = vld [vmem:[%s5465_s4 + $0x8] sm:$0xff]  ;;  %v5719_v49 = vld [vmem:[#allocation81_spill] sm:$0xff] }
 0x4b9   : > { %v2050_v1 = vpack.c.bf16 %v5714_v9, %v5713_v30  ;;  %v5072_v15 = vpop.eup %3792  ;;  %v3533_v30 = vld [vmem:[%s5465_s4 + $0x10] sm:$0xff] }
 0x4ba   : > { %v3795_v11 = vpop.eup %3794  ;;  %v1642_v9 = vmul.f32 %v5072_v15, %v1610_v14 }
 0x4bc   : > { %2813 = vmatpush.bf16.msrb.mxu2 %v3535_v29 }
 0x4bf   : > { %v5066_v59 = vpop.permute.xlu1 %1922 }
 0x4c8   : > { %2292 = vmatmul.bf16.gmra.mxu3 %v2050_v1  ;;  %v3534_v1 = vld [vmem:[%s5465_s4 + $0x18] sm:$0xff] }
 0x4c9   : > { %v1711_v53 = vpop.xlane.xlu2 %1710  ;;  %2814 = vmatpush.bf16.msrb.mxu2 %v3534_v1  ;;  %v5086_v1 = vpop.permute.xlu1 %1927 }
 0x4ca   : > { %v1767_v0 = vadd.f32 %v1711_v53, %v1639_v47  ;;  %v5064_v35 = vpop.f32.mrf.mxu3  ;;  %v1570_v47 = vmul.f32 1.442695, %v1451_v22  ;;  %5718 = vst [vmem:[#allocation7_spill] sm:$0xff] %v5086_v1  ;;  %v3531_v22 = vld [vmem:[%s5465_s4] sm:$0xff] }
 0x4cb   : > { %5715 = vst [vmem:[#allocation38_spill] sm:$0xff] %v5064_v35 }
 0x4cc   : > { %1800 = vst.msk [vmem:[#allocation3 + $0x98] sm:$0xff] %vm417_vm0, %v1767_v0  ;;  %3796 = vpow2.f32 %v1570_v47 }
 0x4cd   : > { %2815 = vmatpush.bf16.msrb.mxu2 %v3533_v30 }
 0x4d0   : > { %2560 = vperm.xlu1 %3593, %v3795_v11   ;;  %v5720_v11 = vld [vmem:[#allocation80_spill] sm:$0xff] }
 0x4d1   : > { %v1720_v29 = vpop.xlane.xlu2 %1719  ;;  %2816 = vmatpush.bf16.msrb.mxu2 %v3532_v56  ;;  %v5721_v35 = vpack.c.bf16 %v5719_v49, %v5720_v11  ;;  %v2174_v49 = vpop.f32.mrf.mxu0  ;;  %v5725_v11 = vld [vmem:[#allocation9_spill] sm:$0xff] }
 0x4d2   : > { %v1770_v53 = vadd.f32 %v1720_v29, %v1642_v9  ;;  %v5080_v0 = vpop.f32.mrf.mxu3  ;;  %v5096_v30 = vpop.eup %3796 }
 0x4d3   : > { %5717 = vst [vmem:[#allocation39_spill] sm:$0xff] %v5080_v0  ;;  %v1733_v47 = vadd.f32 %v5096_v30, %v4866_v58  ;;  %v5100_v29 = vpop.permute.xlu1 %1932 }
 0x4d4   : > { %1803 = vst.msk [vmem:[#allocation3 + $0xb0] sm:$0xff] %vm417_vm0, %v1770_v53 }
 0x4d5   : > { %2817 = vmatpush.bf16.msrb.mxu2 %v3531_v22  ;;  %5723 = vst [vmem:[#allocation11_spill] sm:$0xff] %v5100_v29 }
 0x4d8   : > { %2297 = vmatmul.bf16.gmra.mxu3 %v5721_v35  ;;  %v1605_v35 = vld [vmem:[#allocation3 + $0x88] sm:$0xff] }
 0x4d9   : > { %v1637_v22 = vmul.f32 %v4943_v7, %v1605_v35  ;;  %v2176_v5 = vpop.f32.mrf.mxu0 }
 0x4da   : > { %v5094_v14 = vpop.f32.mrf.mxu3 }
 0x4db   : > { %5722 = vst [vmem:[#allocation8_spill] sm:$0xff] %v5094_v14  ;;  %v2496_v9 = vld [vmem:[#allocation3 + $0xb0] sm:$0xff]  ;;  %v2054_v14 = vpack.c.bf16 %v5725_v11, %v4799_v25  ;;  %v5726_v11 = vld [vmem:[#allocation13_spill] sm:$0xff] }
 0x4dc   : > { %3798 = vrcp.f32 %v2496_v9  ;;  %v2056_v7 = vpack.c.bf16 %v4958_v21, %v5726_v11  ;;  %v5729_v11 = vpack.c.bf16 %v4771_v51, %v4756_v42  ;;  %v2484_v51 = vld [vmem:[#allocation3 + $0x50] sm:$0xff] }
 0x4e0   : > { %1734 = vadd.xlane.f32.xlu2 %v1733_v47 }
 0x4e1   : > { %v2179_v35 = vpop.f32.mrf.mxu0 }
 0x4e2   : > { %v3799_v53 = vpop.eup %3798  ;;  %v5102_v56 = vpop.f32.mrf.mxu3 }
 0x4e3   : > { %5724 = vst [vmem:[#allocation12_spill] sm:$0xff] %v5102_v56  ;;  %2650 = vperm.xlu0 %3592, %v3799_v53   ;;  %v2005_v56 = vmul.f32 0.0, %v4850_v54 }
 0x4e7   : > { %v1705_v0 = vpop.xlane.xlu1 %1704 }
 0x4e8   : > { %2302 = vmatmul.bf16.gmra.mxu3 %v2054_v14  ;;  %v1765_v9 = vadd.f32 %v1705_v0, %v1637_v22  ;;  %1737 = vadd.xlane.f32.xlu2 %v4937_v16  ;;  %v2489_v14 = vld [vmem:[#allocation3 + $0x78] sm:$0xff]  ;;  %v5728_v22 = vld [vmem:[#allocation56_spill] sm:$0xff] }
 0x4e9   : > { %3800 = vrcp.f32 %v2489_v14  ;;  %v2576_v14 = vpop.permute.xlu2 %2575 }
 0x4ea   : > { %1798 = vst.msk [vmem:[#allocation3 + $0x88] sm:$0xff] %vm417_vm0, %v1765_v9  ;;  %v2263_v58 = vpop.f32.mrf.mxu3  ;;  %v2008_v9 = vmul.f32 0.0, %v4857_v34 }
 0x4eb   : > { %v2264_v47 = vadd.f32 %v2263_v58, %v2174_v49 }
 0x4ed   : > { %v2343_v29 = vadd.f32 %v2264_v47, %v2005_v56 }
 0x4ef   : > { %v2698_v0 = vmul.f32 %v4986_v63, %v2343_v29 }
 0x4f2   : > { %v2265_v53 = vpop.f32.mrf.mxu3 }
 0x4f3   : > { %v2266_v1 = vadd.f32 %v2265_v53, %v2176_v5  ;;  %v3801_v5 = vpop.eup %3800 }
 0x4f5   : > { %v2344_v25 = vadd.f32 %v2266_v1, %v2006_v8  ;;  %v5727_v1 = vld [vmem:[#allocation58_spill] sm:$0xff] }
 0x4f6   : > { %v1164_v63 = vsub.f32 %v5728_v22, %v5727_v1  ;;  %v2189_v1 = vpop.f32.mrf.mxu1  ;;  %v5732_v22 = vpack.c.bf16 %v4811_v18, %v4824_v38  ;;  %v2012_v18 = vmul.f32 0.0, %v5029_v10 }
 0x4f7   : > { %v2699_v16 = vmul.f32 %v4968_v17, %v2344_v25  ;;  %v2181_v17 = vpop.f32.mrf.mxu0  ;;  %v2493_v25 = vld [vmem:[#allocation3 + $0x98] sm:$0xff] }
 0x4f8   : > { %2307 = vmatmul.bf16.gmra.mxu3 %v2056_v7  ;;  %v1220_v47 = vmul.f32 1.442695, %v1164_v63  ;;  %v2483_v7 = vld [vmem:[#allocation3 + $0x48] sm:$0xff] }
 0x4f9   : > { %v2730_v49 = vpack.c.bf16 %v2699_v16, %v2698_v0  ;;  %v1612_v16 = vld [vmem:[#allocation3 + $0xc0] sm:$0xff] }
 0x4fa   : > { %1728 = vadd.xlane.f32.xlu1 %v4822_v32  ;;  %v2268_v54 = vpop.f32.mrf.mxu3  ;;  %3802 = vpow2.f32 %v1220_v47  ;;  %v2011_v47 = vmul.f32 0.0, %v4894_v4 }
 0x4fb   : > { %v2269_v56 = vadd.f32 %v2268_v54, %v2179_v35  ;;  %2818 = vmatmul.bf16.vlgmr.msrb.gmra.mxu2 %v2730_v49  ;;  %3804 = vrcp.f32 %v2493_v25 }
 0x4fc   : > { %3806 = vrcp.f32 %v2483_v7  ;;  %v2062_v7 = vpack.c.bf16 %v4819_v48, %v5008_v52 }
 0x4fd   : > { %v2345_v8 = vadd.f32 %v2269_v56, %v2007_v46  ;;  %v5730_v56 = vld [vmem:[#allocation64_spill] sm:$0xff]  ;;  %3808 = vrcp.f32 %v2484_v51  ;;  %v2486_v51 = vld [vmem:[#allocation3 + $0x60] sm:$0xff] }
 0x4ff   : > { %v2700_v21 = vmul.f32 %v5049_v33, %v2345_v8  ;;  %v2556_v53 = vpop.permute.xlu1 %2555  ;;  %v5731_v8 = vld [vmem:[#allocation63_spill] sm:$0xff]  ;;  %v2184_v52 = vpop.f32.mrf.mxu0 }
 0x500   : > { %2615 = vperm.xlu2 %3591, %v3801_v5   ;;  %v5128_v34 = vpop.eup %3802  ;;  %v1160_v5 = vsub.f32 %v5731_v8, %v5730_v56 }
 0x501   : > { %v3805_v35 = vpop.eup %3804  ;;  %v1644_v42 = vmul.f32 %v5128_v34, %v1612_v16  ;;  %v1608_v16 = vld [vmem:[#allocation3 + $0xa0] sm:$0xff] }
 0x502   : > { %v2270_v29 = vpop.f32.mrf.mxu3  ;;  %v3807_v49 = vpop.eup %3806 }
 0x503   : > { %v2271_v58 = vadd.f32 %v2270_v29, %v2181_v17  ;;  %v3809_v63 = vpop.eup %3808 }
 0x505   : > { %v2346_v32 = vadd.f32 %v2271_v58, %v2008_v9 }
 0x507   : > { %v2701_v24 = vmul.f32 %v2556_v53, %v2346_v32  ;;  %v2191_v53 = vpop.f32.mrf.mxu1 }
 0x508   : > { %2312 = vmatmul.bf16.gmra.mxu3 %v5729_v11  ;;  %1937 = vperm.xlu2 %3591, %v4988_v31   ;;  %v5140_v11 = vpop.f32.mrf.mxu2 }
 0x509   : > { %v2731_v33 = vpack.c.bf16 %v2701_v24, %v2700_v21  ;;  %v1212_v21 = vmul.f32 1.442695, %v1160_v5  ;;  %v2064_v5 = vpack.c.bf16 %v5096_v30, %v4903_v55  ;;  %v5733_v55 = vld [vmem:[#allocation67_spill] sm:$0xff]  ;;  %v5734_v30 = vld [vmem:[#allocation65_spill] sm:$0xff] }
 0x50a   : > { %v5125_v0 = vpop.f32.mrf.mxu3 }
 0x50b   : > { %2823 = vmatmul.bf16.gmra.mxu2 %v2731_v33 }
 0x50d   : > { %1743 = vadd.xlane.f32.xlu0 %v4954_v6  ;;  %v2497_v6 = vld [vmem:[#allocation3 + $0xb8] sm:$0xff] }
 0x50e   : > { %3810 = vrcp.f32 %v2497_v6  ;;  %v5163_v6 = vpop.permute.xlu0 %2595 }
 0x50f   : > { %3812 = vpow2.f32 %v1212_v21 }
 0x510   : > { %2635 = vperm.xlu2 %3591, %v3805_v35   ;;  %v5155_v48 = vpop.f32.mrf.mxu2 }
 0x512   : > { %v1726_v31 = vpop.xlane.xlu2 %1725  ;;  %v2275_v54 = vpop.f32.mrf.mxu3 }
 0x513   : > { %v1772_v46 = vadd.f32 %v1726_v31, %v1644_v42  ;;  %2585 = vperm.xlu1 %3593, %v3807_v49  }
 0x514   : > { %v3811_v9 = vpop.eup %3810 }
 0x515   : > { %1805 = vst.msk [vmem:[#allocation3 + $0xc0] sm:$0xff] %vm417_vm0, %v1772_v46  ;;  %v3813_v32 = vpop.eup %3812 }
 0x516   : > { %v1640_v42 = vmul.f32 %v3813_v32, %v1608_v16  ;;  %v5735_v16 = vpack.c.bf16 %v4926_v13, %v4931_v61 }
 0x518   : > { %2317 = vmatmul.bf16.gmra.mxu3 %v5732_v22  ;;  %1957 = vperm.xlu2 %3591, %v5072_v15   ;;  %v5159_v8 = vpop.f32.mrf.mxu2 }
 0x51a   : > { %v2278_v17 = vpop.f32.mrf.mxu3 }
 0x51b   : > { %2590 = vperm.xlu1 %3593, %v3809_v63   ;;  %v2279_v58 = vadd.f32 %v2278_v17, %v2189_v1  ;;  %v2186_v1 = vpop.f32.mrf.mxu0  ;;  %v2010_v17 = vmul.f32 0.0, %v4882_v41 }
 0x51c   : > { %v2498_v29 = vld [vmem:[#allocation3 + $0xc0] sm:$0xff]  ;;  %v2276_v22 = vadd.f32 %v2275_v54, %v2186_v1  ;;  %v5174_v54 = vpop.permute.xlu0 %1942 }
 0x51d   : > { %3814 = vrcp.f32 %v2498_v29  ;;  %v2349_v38 = vadd.f32 %v2279_v58, %v2011_v47  ;;  %v2274_v29 = vadd.f32 %v5125_v0, %v2184_v52 }
 0x51e   : > { %3816 = vrcp.f32 %v2486_v51  ;;  %v2348_v58 = vadd.f32 %v2276_v22, %v2010_v17  ;;  %v1616_v17 = vld [vmem:[#allocation3 + $0xe0] sm:$0xff] }
 0x51f   : > { %v5145_v35 = vmul.f32 %v5014_v27, %v2349_v38  ;;  %v2490_v27 = vld [vmem:[#allocation3 + $0x80] sm:$0xff] }
 0x520   : > { %2655 = vperm.xlu2 %3591, %v3811_v9   ;;  %3818 = vrcp.f32 %v2490_v27  ;;  %v2009_v9 = vmul.f32 0.0, %v4864_v50  ;;  %v5170_v47 = vpop.f32.mrf.mxu2  ;;  %v2703_v41 = vmul.f32 %v5001_v28, %v2348_v58  ;;  %v5188_v28 = vpop.permute.xlu2 %2580 }
 0x522   : > { %v2280_v25 = vpop.f32.mrf.mxu3 }
 0x523   : > { %v3815_v24 = vpop.eup %3814  ;;  %v2281_v15 = vadd.f32 %v2280_v25, %v2191_v53  ;;  %1947 = vperm.xlu1 %3593, %v3813_v32   ;;  %v1167_v32 = vsub.f32 %v5734_v30, %v5733_v55  ;;  %v2347_v53 = vadd.f32 %v2274_v29, %v2009_v9  ;;  %v5737_v29 = vpack.c.bf16 %v4945_v44, %v4949_v62  ;;  %v5738_v55 = vld [vmem:[#allocation76_spill] sm:$0xff]  ;;  %v5739_v30 = vld [vmem:[#allocation74_spill] sm:$0xff] }
 0x524   : > { %2660 = vperm.xlu0 %3592, %v3815_v24   ;;  %v5192_v52 = vpop.permute.xlu0 %2605 }
 0x525   : > { %v2350_v33 = vadd.f32 %v2281_v15, %v2012_v18  ;;  %v1226_v50 = vmul.f32 1.442695, %v1167_v32  ;;  %v1165_v32 = vsub.f32 %v5739_v30, %v5738_v55  ;;  %v5745_v55 = vld [vmem:[#allocation82_spill] sm:$0xff] }
 0x527   : > { %v5147_v4 = vmul.f32 %v2576_v14, %v2350_v33  ;;  %v3817_v14 = vpop.eup %3816  ;;  %v1745_v33 = vadd.f32 %v4960_v37, %v4945_v44  ;;  %v1222_v44 = vmul.f32 1.442695, %v1165_v32 }
 0x528   : > { %2322 = vmatmul.bf16.gmra.mxu3 %v2062_v7  ;;  %v3819_v21 = vpop.eup %3818  ;;  %v5181_v7 = vpop.f32.mrf.mxu2 }
 0x529   : > { %v2733_v10 = vpack.c.bf16 %v5147_v4, %v5145_v35  ;;  %v5740_v35 = vld [vmem:[#allocation19_spill] sm:$0xff]  ;;  %v5741_v4 = vld [vmem:[#allocation30_spill] sm:$0xff] }
 0x52a   : > { %v5151_v49 = vpop.f32.mrf.mxu3  ;;  %v1714_v31 = vpop.xlane.xlu1 %1713 }
 0x52b   : > { %v1768_v46 = vadd.f32 %v1714_v31, %v1640_v42  ;;  %1952 = vperm.xlu1 %3593, %v4970_v20   ;;  %v2491_v20 = vld [vmem:[#allocation3 + $0x88] sm:$0xff] }
 0x52c   : > { %3820 = vrcp.f32 %v2491_v20  ;;  %v5736_v42 = vld [vmem:[#allocation79_spill] sm:$0xff] }
 0x52d   : > { %1801 = vst.msk [vmem:[#allocation3 + $0xa0] sm:$0xff] %vm417_vm0, %v1768_v46  ;;  %v1168_v51 = vsub.f32 %v5736_v42, %v4625_v60 }
 0x52f   : > { %v1228_v37 = vmul.f32 1.442695, %v1168_v51 }
 0x530   : > { %v5196_v61 = vpop.f32.mrf.mxu2 }
 0x532   : > { %v5157_v56 = vpop.f32.mrf.mxu3  ;;  %v3821_v24 = vpop.eup %3820 }
 0x533   : > { %2600 = vperm.xlu1 %3593, %v3817_v14   ;;  %v1615_v14 = vld [vmem:[#allocation3 + $0xd8] sm:$0xff] }
 0x534   : > { %v2494_v25 = vld [vmem:[#allocation3 + $0xa0] sm:$0xff] }
 0x535   : > { %3822 = vrcp.f32 %v2494_v25 }
 0x536   : > { %3824 = vpow2.f32 %v1226_v50  ;;  %v5743_v50 = vld [vmem:[#allocation73_spill] sm:$0xff] }
 0x537   : > { %3826 = vpow2.f32 %v1228_v37 }
 0x538   : > { %2327 = vmatmul.bf16.gmra.mxu3 %v2064_v5  ;;  %v5210_v9 = vpop.f32.mrf.mxu2 }
 0x53b   : > { %v5165_v63 = vpop.f32.mrf.mxu3  ;;  %2620 = vperm.xlu1 %3593, %v3819_v21   ;;  %v3823_v31 = vpop.eup %3822 }
 0x53c   : > { %v5194_v27 = vpop.eup %3824  ;;  %v2611_v21 = vpop.permute.xlu0 %2610 }
 0x53d   : > { %v1647_v5 = vmul.f32 %v5194_v27, %v1615_v14  ;;  %v5202_v22 = vpop.eup %3826 }
 0x53e   : > { %v1648_v58 = vmul.f32 %v5202_v22, %v1616_v17 }
 0x540   : > { %v5226_v51 = vpop.f32.mrf.mxu2 }
 0x542   : > { %v2561_v18 = vpop.permute.xlu1 %2560 }
 0x543   : > { %v5176_v38 = vpop.f32.mrf.mxu3  ;;  %v2702_v15 = vmul.f32 %v2561_v18, %v2347_v53  ;;  %2625 = vperm.xlu1 %3593, %v3821_v24  }
 0x544   : > { %v5215_v24 = vpop.permute.xlu0 %2630 }
 0x545   : > { %v2732_v0 = vpack.c.bf16 %v2703_v41, %v2702_v15 }
 0x547   : > { %2828 = vmatmul.bf16.gmra.mxu2 %v2732_v0  ;;  %v1170_v0 = vsub.f32 %v5743_v50, %v4552_v23  ;;  %v1739_v50 = vadd.f32 %v4926_v13, %v4921_v19  ;;  %v5273_v19 = vstv %s2899_s7  ;;  %v1618_v13 = vld [vmem:[#allocation3 + $0xf0] sm:$0xff] }
 0x548   : > { %2332 = vmatmul.bf16.gmra.mxu3 %v5735_v16 }
 0x549   : > { %1746 = vadd.xlane.f32.xlu2 %v1745_v33  ;;  %v2019_v33 = vmul.f32 0.0, %v4918_v26  ;;  %v2194_v26 = vpop.f32.mrf.mxu1 }
 0x54b   : > { %v5190_v46 = vpop.f32.mrf.mxu3  ;;  %2640 = vperm.xlu1 %3593, %v3823_v31   ;;  %v2020_v31 = vmul.f32 0.0, %v5066_v59  ;;  %v1613_v59 = vld [vmem:[#allocation3 + $0xc8] sm:$0xff] }
 0x553   : > { %v5199_v20 = vpop.f32.mrf.mxu3  ;;  %v1735_v60 = vpop.xlane.xlu2 %1734 }
 0x554   : > { %v1775_v1 = vadd.f32 %v1735_v60, %v1647_v5  ;;  %v1232_v5 = vmul.f32 1.442695, %v1170_v0 }
 0x556   : > { %1808 = vst.msk [vmem:[#allocation3 + $0xd8] sm:$0xff] %vm417_vm0, %v1775_v1 }
 0x557   : > { %2833 = vmatmul.bf16.gmra.mxu2 %v2733_v10  ;;  %v5742_v10 = vsub.f32 %v5740_v35, %v5741_v4 }
 0x558   : > { %2337 = vmatmul.bf16.gmra.mxu3 %v5737_v29 }
 0x559   : > { %v1230_v41 = vmul.f32 1.442695, %v5742_v10 }
 0x55b   : > { %v2298_v53 = vpop.f32.mrf.mxu3  ;;  %v1738_v25 = vpop.xlane.xlu2 %1737 }
 0x55c   : > { %v1776_v18 = vadd.f32 %v1738_v25, %v1648_v58  ;;  %v2299_v62 = vadd.f32 %v2298_v53, %v5159_v8 }
 0x55d   : > { %v2501_v15 = vld [vmem:[#allocation3 + $0xd8] sm:$0xff] }
 0x55e   : > { %1809 = vst.msk [vmem:[#allocation3 + $0xe0] sm:$0xff] %vm417_vm0, %v1776_v18  ;;  %3828 = vrcp.f32 %v2501_v15  ;;  %v2357_v37 = vadd.f32 %v2299_v62, %v2019_v33 }
 0x55f   : > { %3830 = vpow2.f32 %v1230_v41 }
 0x560   : > { %3832 = vpow2.f32 %v1222_v44  ;;  %v5234_v17 = vmul.f32 %v2611_v21, %v2357_v37  ;;  %v5248_v21 = vpop.f32.mrf.mxu2  ;;  %v2196_v44 = vpop.f32.mrf.mxu1  ;;  %v2284_v37 = vadd.f32 %v5151_v49, %v2194_v26  ;;  %v2014_v49 = vmul.f32 0.0, %v4869_v36 }
 0x561   : > { %1977 = vperm.xlu2 %3591, %v5025_v3   ;;  %v5230_v3 = vpop.permute.xlu0 %1962 }
 0x563   : > { %v2300_v16 = vpop.f32.mrf.mxu3  ;;  %v2616_v23 = vpop.permute.xlu2 %2615 }
 0x564   : > { %v3829_v42 = vpop.eup %3828  ;;  %v2301_v14 = vadd.f32 %v2300_v16, %v5170_v47  ;;  %v5744_v47 = vld [vmem:[#allocation20_spill] sm:$0xff] }
 0x565   : > { %2675 = vperm.xlu0 %3592, %v3829_v42   ;;  %v2502_v8 = vld [vmem:[#allocation3 + $0xe0] sm:$0xff]  ;;  %v5232_v1 = vpop.eup %3830  ;;  %v5746_v30 = vsub.f32 %v5744_v47, %v5745_v55 }
 0x566   : > { %v2358_v60 = vadd.f32 %v2301_v14, %v2020_v31  ;;  %3834 = vrcp.f32 %v2502_v8  ;;  %v5238_v58 = vpop.eup %3832  ;;  %v2933_v8 = vld [vmem:[%s5271_s11] sm:$0xff] }
 0x567   : > { %3836 = vpow2.f32 %v1232_v5  ;;  %v1234_v32 = vmul.f32 1.442695, %v5746_v30  ;;  %v1645_v15 = vmul.f32 %v5238_v58, %v1613_v59  ;;  %v2286_v59 = vadd.f32 %v5157_v56, %v2196_v44  ;;  %v2934_v44 = vld [vmem:[%s5271_s11 + $0x8] sm:$0xff] }
 0x568   : > { %v5236_v29 = vmul.f32 %v2616_v23, %v2358_v60  ;;  %v5261_v33 = vpop.f32.mrf.mxu2  ;;  %v2199_v42 = vpop.f32.mrf.mxu1  ;;  %v2013_v23 = vmul.f32 0.0, %v5036_v45 }
 0x569   : > { %1992 = vperm.xlu2 %3591, %v5232_v1   ;;  %3838 = vpow2.f32 %v1234_v32  ;;  %v5251_v41 = vpop.permute.xlu0 %2645  ;;  %v2352_v45 = vadd.f32 %v2286_v59, %v2014_v49 }
 0x56a   : > { %v2737_v53 = vpack.c.bf16 %v5236_v29, %v5234_v17  ;;  %v2351_v26 = vadd.f32 %v2284_v37, %v2013_v23  ;;  %v2289_v37 = vadd.f32 %v5165_v63, %v2199_v42 }
 0x56b   : > { %v5246_v25 = vpop.f32.mrf.mxu3  ;;  %v5290_v56 = vpop.permute.xlu2 %1937 }
 0x56c   : > { %v3835_v18 = vpop.eup %3834  ;;  %v2706_v36 = vmul.f32 %v5188_v28, %v2351_v26 }
 0x56d   : > { %2680 = vperm.xlu0 %3592, %v3835_v18   ;;  %v1729_v35 = vpop.xlane.xlu1 %1728  ;;  %v3837_v10 = vpop.eup %3836 }
 0x56e   : > { %v1773_v4 = vadd.f32 %v1729_v35, %v1645_v15  ;;  %v1650_v60 = vmul.f32 %v3837_v10, %v1618_v13  ;;  %v2016_v13 = vmul.f32 0.0, %v4907_v40 }
 0x56f   : > { %v5258_v0 = vpop.eup %3838 }
 0x570   : > { %1806 = vst.msk [vmem:[#allocation3 + $0xc8] sm:$0xff] %vm417_vm0, %v1773_v4  ;;  %v2201_v18 = vpop.f32.mrf.mxu1 }
 0x571   : > { %1997 = vperm.xlu2 %3591, %v3837_v10   ;;  %v5263_v16 = vpop.permute.xlu0 %2650  ;;  %v2291_v35 = vadd.f32 %v5176_v38, %v2201_v18 }
 0x573   : > { %v5254_v62 = vpop.f32.mrf.mxu3  ;;  %v5305_v63 = vpop.permute.xlu2 %2635 }
 0x575   : > { %2002 = vperm.xlu0 %3592, %v5258_v0   ;;  %1740 = vadd.xlane.f32.xlu1 %v1739_v50 }
 0x577   : > { %v2499_v26 = vld [vmem:[#allocation3 + $0xc8] sm:$0xff] }
 0x578   : > { %3840 = vrcp.f32 %v2499_v26 }
 0x57b   : > { %v5266_v31 = vpop.f32.mrf.mxu3 }
 0x57e   : > { %v2819_v14 = vpop.f32.mrf.mxu2 }
 0x57f   : > { %v2901_v5 = vmul.f32 %v5273_v19, %v2819_v14 }
 0x580   : > { %v1744_v47 = vpop.xlane.xlu0 %1743 }
 0x581   : > { %v2965_v55 = vadd.f32 %v2933_v8, %v2901_v5  ;;  %v1778_v30 = vadd.f32 %v1744_v47, %v1650_v60  ;;  %v2015_v5 = vmul.f32 0.0, %v4873_v2  ;;  %v2354_v60 = vadd.f32 %v2291_v35, %v2016_v13 }
 0x582   : > { %v2296_v13 = vadd.f32 %v5199_v20, %v5155_v48  ;;  %v2500_v48 = vld [vmem:[#allocation3 + $0xd0] sm:$0xff] }
 0x583   : > { %2997 = vst [vmem:[%s5283_s13] sm:$0xff] %v2965_v55  ;;  %v5287_v32 = vpop.f32.mrf.mxu3  ;;  %v2353_v23 = vadd.f32 %v2289_v37, %v2015_v5  ;;  %v2935_v55 = vld [vmem:[%s5271_s11 + $0x10] sm:$0xff]  ;;  %v2709_v40 = vmul.f32 %v5163_v6, %v2354_v60  ;;  %v2017_v5 = vmul.f32 0.0, %v5051_v43  ;;  %3842 = vrcp.f32 %v2500_v48 }
 0x584   : > { %1811 = vst.msk [vmem:[#allocation3 + $0xf0] sm:$0xff] %vm417_vm0, %v1778_v30  ;;  %v2311_v29 = vadd.f32 %v5287_v32, %v5226_v51 }
 0x585   : > { %v2586_v15 = vpop.permute.xlu1 %2585 }
 0x586   : > { %v2707_v4 = vmul.f32 %v2586_v15, %v2352_v45  ;;  %v2821_v10 = vpop.f32.mrf.mxu2  ;;  %v2936_v15 = vld [vmem:[%s5271_s11 + $0x18] sm:$0xff] }
 0x587   : > { %v2902_v50 = vmul.f32 %v5273_v19, %v2821_v10 }
 0x588   : > { %v2734_v14 = vpack.c.bf16 %v2707_v4, %v2706_v36  ;;  %v3841_v36 = vpop.eup %3840 }
 0x589   : > { %v2966_v8 = vadd.f32 %v2934_v44, %v2902_v50 }
 0x58a   : > { %2838 = vmatmul.bf16.gmra.mxu2 %v2734_v14  ;;  %v2294_v14 = vadd.f32 %v5190_v46, %v5140_v11 }
 0x58b   : > { %2998 = vst [vmem:[%s5283_s13 + $0x8] sm:$0xff] %v2966_v8  ;;  %v5300_v38 = vpop.f32.mrf.mxu3 }
 0x58d   : > { %v2591_v59 = vpop.permute.xlu1 %2590 }
 0x58e   : > { %v2708_v28 = vmul.f32 %v2591_v59, %v2353_v23  ;;  %v2824_v47 = vpop.f32.mrf.mxu2  ;;  %1967 = vperm.xlu1 %3593, %v5128_v34   ;;  %v1958_v34 = vpop.permute.xlu2 %1957 }
 0x58f   : > { %v2903_v2 = vmul.f32 %v5273_v19, %v2824_v47  ;;  %v2027_v10 = vmul.f32 0.0, %v1958_v34 }
 0x590   : > { %v2735_v42 = vpack.c.bf16 %v2709_v40, %v2708_v28  ;;  %v2355_v28 = vadd.f32 %v2294_v14, %v2017_v5  ;;  %v2304_v40 = vadd.f32 %v5246_v25, %v5181_v7  ;;  %v1619_v7 = vld [vmem:[#allocation3 + $0xf8] sm:$0xff]  ;;  %v2023_v14 = vmul.f32 0.0, %v5290_v56 }
 0x591   : > { %v2967_v30 = vadd.f32 %v2935_v55, %v2903_v2  ;;  %v5747_v2 = vld [vmem:[#allocation7_spill] sm:$0xff] }
 0x593   : > { %2999 = vst [vmem:[%s5283_s13 + $0x10] sm:$0xff] %v2967_v30  ;;  %v2315_v49 = vpop.f32.mrf.mxu3 }
 0x595   : > { %v1948_v18 = vpop.permute.xlu1 %1947 }
 0x596   : > { %v2826_v45 = vpop.f32.mrf.mxu2  ;;  %1972 = vperm.xlu1 %3593, %v5238_v58   ;;  %v2018_v58 = vmul.f32 0.0, %v4877_v57  ;;  %v2656_v11 = vpop.permute.xlu2 %2655 }
 0x597   : > { %v2904_v35 = vmul.f32 %v5273_v19, %v2826_v45 }
 0x598   : > { %v2356_v60 = vadd.f32 %v2296_v13, %v2018_v58  ;;  %v2309_v58 = vadd.f32 %v5266_v31, %v5210_v9 }
 0x599   : > { %v2968_v6 = vadd.f32 %v2936_v15, %v2904_v35 }
 0x59a   : > { %2843 = vmatmul.bf16.gmra.mxu2 %v2735_v42  ;;  %v2711_v57 = vmul.f32 %v5192_v52, %v2356_v60  ;;  %v2021_v52 = vmul.f32 0.0, %v5747_v2  ;;  %v5748_v42 = vld [vmem:[#allocation11_spill] sm:$0xff]  ;;  %v2361_v60 = vadd.f32 %v2309_v58, %v2023_v14  ;;  %v2943_v14 = vld [vmem:[%s5271_s11 + $0x50] sm:$0xff] }
 0x59b   : > { %3000 = vst [vmem:[%s5283_s13 + $0x18] sm:$0xff] %v2968_v6  ;;  %v2318_v4 = vpop.f32.mrf.mxu3  ;;  %v2022_v30 = vmul.f32 0.0, %v5748_v42 }
 0x59c   : > { %v2319_v44 = vadd.f32 %v2318_v4, %v4997_v12  ;;  %v2028_v12 = vmul.f32 0.0, %v5230_v3  ;;  %v2359_v26 = vadd.f32 %v2304_v40, %v2021_v52  ;;  %v2316_v4 = vadd.f32 %v2315_v49, %v5261_v33 }
 0x59d   : > { %v1953_v50 = vpop.permute.xlu1 %1952 }
 0x59e   : > { %v2365_v37 = vadd.f32 %v2319_v44, %v2027_v10  ;;  %2665 = vperm.xlu1 %3593, %v3841_v36   ;;  %v2026_v35 = vmul.f32 0.0, %v1953_v50  ;;  %v2025_v10 = vmul.f32 0.0, %v1948_v18 }
 0x5a0   : > { %v5320_v8 = vmul.f32 %v5263_v16, %v2365_v37  ;;  %v3843_v16 = vpop.eup %3842  ;;  %v2364_v25 = vadd.f32 %v2316_v4, %v2026_v35  ;;  %v5750_v35 = vld [vmem:[#allocation6_spill] sm:$0xff] }
 0x5a2   : > { %v2719_v33 = vmul.f32 %v5251_v41, %v2364_v25  ;;  %v2024_v41 = vmul.f32 0.0, %v5174_v54 }
 0x5a3   : > { %v2320_v23 = vpop.f32.mrf.mxu3 }
 0x5a4   : > { %v2321_v59 = vadd.f32 %v2320_v23, %v5012_v39  ;;  %v2362_v5 = vadd.f32 %v2311_v29, %v2024_v41 }
 0x5a5   : > { %v2601_v20 = vpop.permute.xlu1 %2600 }
 0x5a6   : > { %v2366_v47 = vadd.f32 %v2321_v59, %v2028_v12  ;;  %v2710_v55 = vmul.f32 %v2601_v20, %v2355_v28  ;;  %1982 = vperm.xlu1 %3593, %v5194_v27   ;;  %v2306_v27 = vadd.f32 %v5254_v62, %v5196_v61  ;;  %v2314_v61 = vadd.f32 %v5300_v38, %v5248_v21  ;;  %v2937_v38 = vld [vmem:[%s5271_s11 + $0x20] sm:$0xff]  ;;  %v2938_v12 = vld [vmem:[%s5271_s11 + $0x28] sm:$0xff]  ;;  %v2939_v28 = vld [vmem:[%s5271_s11 + $0x30] sm:$0xff] }
 0x5a7   : > { %v1651_v62 = vmul.f32 %v5258_v0, %v1619_v7  ;;  %v2717_v32 = vmul.f32 %v5305_v63, %v2362_v5  ;;  %v2716_v59 = vmul.f32 %v5215_v24, %v2361_v60 }
 0x5a8   : > { %v5327_v46 = vmul.f32 %v2656_v11, %v2366_v47  ;;  %v2736_v43 = vpack.c.bf16 %v2711_v57, %v2710_v55  ;;  %v2360_v45 = vadd.f32 %v2306_v27, %v2022_v30  ;;  %v2363_v50 = vadd.f32 %v2314_v61, %v2025_v10  ;;  %v2940_v47 = vld [vmem:[%s5271_s11 + $0x38] sm:$0xff]  ;;  %v1617_v57 = vld [vmem:[#allocation3 + $0xe8] sm:$0xff] }
 0x5a9   : > { %v2739_v9 = vpack.c.bf16 %v2717_v32, %v2716_v59  ;;  %v1649_v63 = vmul.f32 %v5232_v1, %v1617_v57 }
 0x5aa   : > { %2848 = vmatmul.bf16.gmra.mxu2 %v2736_v43  ;;  %v2741_v3 = vpack.c.bf16 %v5327_v46, %v5320_v8  ;;  %v2941_v46 = vld [vmem:[%s5271_s11 + $0x40] sm:$0xff] }
 0x5ab   : > { %v2323_v27 = vpop.f32.mrf.mxu3 }
 0x5ad   : > { %v2621_v39 = vpop.permute.xlu1 %2620 }
 0x5ae   : > { %2670 = vperm.xlu1 %3593, %v3843_v16   ;;  %v2714_v34 = vmul.f32 %v2621_v39, %v2359_v26  ;;  %v2504_v39 = vld [vmem:[#allocation3 + $0xf0] sm:$0xff]  ;;  %v5749_v26 = vld [vmem:[#allocation21_spill] sm:$0xff] }
 0x5b3   : > { %v2325_v1 = vpop.f32.mrf.mxu3 }
 0x5b5   : > { %v2626_v15 = vpop.permute.xlu1 %2625 }
 0x5b6   : > { %v2715_v6 = vmul.f32 %v2626_v15, %v2360_v45  ;;  %1987 = vperm.xlu1 %3593, %v5202_v22   ;;  %v2324_v45 = vadd.f32 %v2323_v27, %v5749_v26 }
 0x5b8   : > { %v2738_v44 = vpack.c.bf16 %v2715_v6, %v2714_v34  ;;  %v2326_v34 = vadd.f32 %v2325_v1, %v5750_v35  ;;  %v2950_v35 = vld [vmem:[%s5271_s11 + $0x88] sm:$0xff] }
 0x5ba   : > { %2853 = vmatmul.bf16.gmra.mxu2 %v2737_v53 }
 0x5bb   : > { %v2328_v6 = vpop.f32.mrf.mxu3 }
 0x5bc   : > { %v1747_v36 = vpop.xlane.xlu2 %1746 }
 0x5bd   : > { %v1779_v13 = vadd.f32 %v1747_v36, %v1651_v62  ;;  %v2641_v22 = vpop.permute.xlu1 %2640 }
 0x5be   : > { %v2718_v49 = vmul.f32 %v2641_v22, %v2363_v50 }
 0x5bf   : > { %1812 = vst.msk [vmem:[#allocation3 + $0xf8] sm:$0xff] %vm417_vm0, %v1779_v13  ;;  %v2942_v13 = vld [vmem:[%s5271_s11 + $0x48] sm:$0xff] }
 0x5c0   : > { %v2740_v18 = vpack.c.bf16 %v2719_v33, %v2718_v49 }
 0x5c3   : > { %v2330_v33 = vpop.f32.mrf.mxu3 }
 0x5c4   : > { %v1978_v49 = vpop.permute.xlu2 %1977 }
 0x5c5   : > { %v2031_v29 = vmul.f32 0.0, %v1978_v49 }
 0x5c6   : > { %v2505_v37 = vld [vmem:[#allocation3 + $0xf8] sm:$0xff] }
 0x5c7   : > { %3844 = vrcp.f32 %v2505_v37 }
 0x5ca   : > { %v2829_v21 = vpop.f32.mrf.mxu2  ;;  %2858 = vmatmul.bf16.gmra.mxu2 %v2738_v44  ;;  %v2661_v44 = vpop.permute.xlu0 %2660 }
 0x5cb   : > { %v2905_v17 = vmul.f32 %v5273_v19, %v2829_v21 }
 0x5cd   : > { %v3845_v53 = vpop.eup %3844  ;;  %v2969_v0 = vadd.f32 %v2937_v38, %v2905_v17  ;;  %v5751_v38 = vld [vmem:[#allocation18_spill] sm:$0xff] }
 0x5ce   : > { %2695 = vperm.xlu2 %3591, %v3845_v53   ;;  %v2331_v17 = vadd.f32 %v2330_v33, %v5751_v38  ;;  %v5752_v53 = vld [vmem:[#allocation17_spill] sm:$0xff]  ;;  %v5754_v33 = vld [vmem:[#allocation39_spill] sm:$0xff] }
 0x5cf   : > { %3001 = vst [vmem:[%s5283_s13 + $0x20] sm:$0xff] %v2969_v0  ;;  %v2329_v0 = vadd.f32 %v2328_v6, %v5752_v53  ;;  %v2333_v6 = vpop.f32.mrf.mxu3 }
 0x5d1   : > { %v2369_v60 = vadd.f32 %v2329_v0, %v2031_v29 }
 0x5d2   : > { %v2831_v23 = vpop.f32.mrf.mxu2 }
 0x5d3   : > { %v2906_v51 = vmul.f32 %v5273_v19, %v2831_v23 }
 0x5d5   : > { %v2970_v54 = vadd.f32 %v2938_v12, %v2906_v51 }
 0x5d7   : > { %3002 = vst [vmem:[%s5283_s13 + $0x28] sm:$0xff] %v2970_v54  ;;  %v2676_v23 = vpop.permute.xlu0 %2675 }
 0x5da   : > { %v2834_v31 = vpop.f32.mrf.mxu2  ;;  %2863 = vmatmul.bf16.gmra.mxu2 %v2739_v9 }
 0x5db   : > { %v2907_v56 = vmul.f32 %v5273_v19, %v2834_v31  ;;  %v2944_v31 = vld [vmem:[%s5271_s11 + $0x58] sm:$0xff] }
 0x5dd   : > { %v2971_v48 = vadd.f32 %v2939_v28, %v2907_v56 }
 0x5df   : > { %3003 = vst [vmem:[%s5283_s13 + $0x30] sm:$0xff] %v2971_v48  ;;  %v2681_v38 = vpop.permute.xlu0 %2680 }
 0x5e2   : > { %v2836_v20 = vpop.f32.mrf.mxu2 }
 0x5e3   : > { %v2908_v55 = vmul.f32 %v5273_v19, %v2836_v20  ;;  %v2945_v20 = vld [vmem:[%s5271_s11 + $0x60] sm:$0xff] }
 0x5e5   : > { %v2972_v11 = vadd.f32 %v2940_v47, %v2908_v55 }
 0x5e7   : > { %3004 = vst [vmem:[%s5283_s13 + $0x38] sm:$0xff] %v2972_v11  ;;  %v2946_v11 = vld [vmem:[%s5271_s11 + $0x68] sm:$0xff] }
 0x5e8   : > { %v1741_v43 = vpop.xlane.xlu1 %1740 }
 0x5e9   : > { %v1777_v24 = vadd.f32 %v1741_v43, %v1649_v63 }
 0x5ea   : > { %2868 = vmatmul.bf16.gmra.mxu2 %v2740_v18 }
 0x5eb   : > { %1810 = vst.msk [vmem:[#allocation3 + $0xe8] sm:$0xff] %vm417_vm0, %v1777_v24 }
 0x5f2   : > { %v2503_v16 = vld [vmem:[#allocation3 + $0xe8] sm:$0xff] }
 0x5f3   : > { %3846 = vrcp.f32 %v2503_v16  ;;  %v2947_v16 = vld [vmem:[%s5271_s11 + $0x70] sm:$0xff] }
 0x5f4   : > { %3848 = vrcp.f32 %v2504_v39 }
 0x5f9   : > { %v3847_v40 = vpop.eup %3846 }
 0x5fa   : > { %2873 = vmatmul.bf16.gmra.mxu2 %v2741_v3  ;;  %2685 = vperm.xlu1 %3593, %v3847_v40   ;;  %v3849_v52 = vpop.eup %3848 }
 0x600   : > { %v1968_v2 = vpop.permute.xlu1 %1967 }
 0x601   : > { %v2029_v30 = vmul.f32 0.0, %v1968_v2  ;;  %v2948_v2 = vld [vmem:[%s5271_s11 + $0x78] sm:$0xff] }
 0x602   : > { %2690 = vperm.xlu1 %3593, %v3849_v52  }
 0x603   : > { %v2367_v4 = vadd.f32 %v2324_v45, %v2029_v30  ;;  %v2949_v30 = vld [vmem:[%s5271_s11 + $0x80] sm:$0xff] }
 0x605   : > { %v2722_v25 = vmul.f32 %v2661_v44, %v2367_v4  ;;  %v2335_v44 = vpop.f32.mrf.mxu3 }
 0x606   : > { %v2336_v49 = vadd.f32 %v2335_v44, %v5754_v33 }
 0x608   : > { %v1973_v42 = vpop.permute.xlu1 %1972 }
 0x609   : > { %v2030_v15 = vmul.f32 0.0, %v1973_v42 }
 0x60b   : > { %v2368_v10 = vadd.f32 %v2326_v34, %v2030_v15 }
 0x60d   : > { %v2839_v8 = vpop.f32.mrf.mxu2  ;;  %v2338_v29 = vpop.f32.mrf.mxu3 }
 0x60e   : > { %v2909_v3 = vmul.f32 %v5273_v19, %v2839_v8 }
 0x610   : > { %v2973_v7 = vadd.f32 %v2941_v46, %v2909_v3  ;;  %v2666_v61 = vpop.permute.xlu1 %2665  ;;  %v2951_v46 = vld [vmem:[%s5271_s11 + $0x90] sm:$0xff] }
 0x611   : > { %v2723_v62 = vmul.f32 %v2666_v61, %v2368_v10 }
 0x612   : > { %3005 = vst [vmem:[%s5283_s13 + $0x40] sm:$0xff] %v2973_v7 }
 0x613   : > { %v2742_v36 = vpack.c.bf16 %v2723_v62, %v2722_v25  ;;  %v2952_v62 = vld [vmem:[%s5271_s11 + $0x98] sm:$0xff] }
 0x615   : > { %v2841_v50 = vpop.f32.mrf.mxu2  ;;  %2878 = vmatmul.bf16.gmra.mxu2 %v2742_v36  ;;  %v1993_v36 = vpop.permute.xlu2 %1992 }
 0x616   : > { %v2910_v22 = vmul.f32 %v5273_v19, %v2841_v50 }
 0x618   : > { %v2974_v18 = vadd.f32 %v2942_v13, %v2910_v22  ;;  %v1983_v37 = vpop.permute.xlu1 %1982  ;;  %v5753_v13 = vld [vmem:[#allocation38_spill] sm:$0xff] }
 0x619   : > { %v2032_v21 = vmul.f32 0.0, %v1983_v37  ;;  %v2334_v22 = vadd.f32 %v2333_v6, %v5753_v13  ;;  %v2034_v37 = vmul.f32 0.0, %v1993_v36  ;;  %v2961_v13 = vld [vmem:[%s5271_s11 + $0xe0] sm:$0xff] }
 0x61a   : > { %3006 = vst [vmem:[%s5283_s13 + $0x48] sm:$0xff] %v2974_v18 }
 0x61b   : > { %v2370_v41 = vadd.f32 %v2331_v17, %v2032_v21  ;;  %v2372_v17 = vadd.f32 %v2336_v49, %v2034_v37 }
 0x61d   : > { %v2844_v58 = vpop.f32.mrf.mxu2  ;;  %v2725_v32 = vmul.f32 %v2676_v23, %v2370_v41 }
 0x61e   : > { %v2911_v5 = vmul.f32 %v5273_v19, %v2844_v58 }
 0x620   : > { %v2975_v12 = vadd.f32 %v2943_v14, %v2911_v5  ;;  %v2671_v51 = vpop.permute.xlu1 %2670  ;;  %v2953_v14 = vld [vmem:[%s5271_s11 + $0xa0] sm:$0xff] }
 0x621   : > { %v2724_v54 = vmul.f32 %v2671_v51, %v2369_v60  ;;  %v2003_v51 = vpop.permute.xlu0 %2002 }
 0x622   : > { %3007 = vst [vmem:[%s5283_s13 + $0x50] sm:$0xff] %v2975_v12  ;;  %v1998_v12 = vpop.permute.xlu2 %1997 }
 0x623   : > { %v2743_v59 = vpack.c.bf16 %v2725_v32, %v2724_v54  ;;  %v5755_v32 = vld [vmem:[#allocation8_spill] sm:$0xff] }
 0x624   : > { %v2339_v54 = vadd.f32 %v2338_v29, %v5755_v32 }
 0x625   : > { %v2846_v9 = vpop.f32.mrf.mxu2  ;;  %2883 = vmatmul.bf16.gmra.mxu2 %v2743_v59 }
 0x626   : > { %v2912_v28 = vmul.f32 %v5273_v19, %v2846_v9  ;;  %v2954_v9 = vld [vmem:[%s5271_s11 + $0xa8] sm:$0xff] }
 0x628   : > { %v2976_v56 = vadd.f32 %v2944_v31, %v2912_v28  ;;  %v1988_v7 = vpop.permute.xlu1 %1987  ;;  %v2340_v31 = vpop.f32.mrf.mxu3 }
 0x629   : > { %v2033_v61 = vmul.f32 0.0, %v1988_v7 }
 0x62a   : > { %3008 = vst [vmem:[%s5283_s13 + $0x58] sm:$0xff] %v2976_v56  ;;  %v2035_v56 = vmul.f32 0.0, %v1998_v12 }
 0x62b   : > { %v2371_v21 = vadd.f32 %v2334_v22, %v2033_v61 }
 0x62d   : > { %v2849_v48 = vpop.f32.mrf.mxu2  ;;  %v2726_v0 = vmul.f32 %v2681_v38, %v2371_v21 }
 0x62e   : > { %v2913_v47 = vmul.f32 %v5273_v19, %v2849_v48  ;;  %v2036_v48 = vmul.f32 0.0, %v2003_v51 }
 0x630   : > { %v2977_v55 = vadd.f32 %v2945_v20, %v2913_v47 }
 0x632   : > { %3009 = vst [vmem:[%s5283_s13 + $0x60] sm:$0xff] %v2977_v55  ;;  %v5756_v55 = vld [vmem:[#allocation12_spill] sm:$0xff] }
 0x635   : > { %v2851_v57 = vpop.f32.mrf.mxu2 }
 0x636   : > { %v2914_v63 = vmul.f32 %v5273_v19, %v2851_v57  ;;  %v2341_v57 = vadd.f32 %v2340_v31, %v5756_v55 }
 0x638   : > { %v2978_v43 = vadd.f32 %v2946_v11, %v2914_v63  ;;  %v2373_v11 = vadd.f32 %v2339_v54, %v2035_v56  ;;  %v2696_v63 = vpop.permute.xlu2 %2695 }
 0x63a   : > { %3010 = vst [vmem:[%s5283_s13 + $0x68] sm:$0xff] %v2978_v43  ;;  %v2374_v43 = vadd.f32 %v2341_v57, %v2036_v48 }
 0x63d   : > { %v2854_v24 = vpop.f32.mrf.mxu2 }
 0x63e   : > { %v2915_v39 = vmul.f32 %v5273_v19, %v2854_v24 }
 0x640   : > { %v2979_v40 = vadd.f32 %v2947_v16, %v2915_v39  ;;  %v2729_v16 = vmul.f32 %v2696_v63, %v2374_v43 }
 0x642   : > { %3011 = vst [vmem:[%s5283_s13 + $0x70] sm:$0xff] %v2979_v40  ;;  %v2955_v40 = vld [vmem:[%s5271_s11 + $0xb0] sm:$0xff] }
 0x645   : > { %v2856_v27 = vpop.f32.mrf.mxu2 }
 0x646   : > { %v2916_v52 = vmul.f32 %v5273_v19, %v2856_v27 }
 0x648   : > { %v2980_v1 = vadd.f32 %v2948_v2, %v2916_v52 }
 0x64a   : > { %3012 = vst [vmem:[%s5283_s13 + $0x78] sm:$0xff] %v2980_v1 }
 0x64d   : > { %v2859_v42 = vpop.f32.mrf.mxu2 }
 0x64e   : > { %v2917_v26 = vmul.f32 %v5273_v19, %v2859_v42  ;;  %v2956_v42 = vld [vmem:[%s5271_s11 + $0xb8] sm:$0xff] }
 0x650   : > { %v2981_v45 = vadd.f32 %v2949_v30, %v2917_v26 }
 0x652   : > { %3013 = vst [vmem:[%s5283_s13 + $0x80] sm:$0xff] %v2981_v45 }
 0x655   : > { %v2861_v15 = vpop.f32.mrf.mxu2 }
 0x656   : > { %v2918_v34 = vmul.f32 %v5273_v19, %v2861_v15  ;;  %v2957_v15 = vld [vmem:[%s5271_s11 + $0xc0] sm:$0xff] }
 0x658   : > { %v2982_v4 = vadd.f32 %v2950_v35, %v2918_v34 }
 0x65a   : > { %3014 = vst [vmem:[%s5283_s13 + $0x88] sm:$0xff] %v2982_v4  ;;  %v2958_v4 = vld [vmem:[%s5271_s11 + $0xc8] sm:$0xff] }
 0x65d   : > { %v2864_v8 = vpop.f32.mrf.mxu2 }
 0x65e   : > { %v2919_v3 = vmul.f32 %v5273_v19, %v2864_v8 }
 0x660   : > { %v2983_v10 = vadd.f32 %v2951_v46, %v2919_v3 }
 0x662   : > { %3015 = vst [vmem:[%s5283_s13 + $0x90] sm:$0xff] %v2983_v10  ;;  %v2959_v10 = vld [vmem:[%s5271_s11 + $0xd0] sm:$0xff] }
 0x665   : > { %v2866_v25 = vpop.f32.mrf.mxu2 }
 0x666   : > { %v2920_v50 = vmul.f32 %v5273_v19, %v2866_v25  ;;  %v2960_v25 = vld [vmem:[%s5271_s11 + $0xd8] sm:$0xff] }
 0x668   : > { %v2984_v18 = vadd.f32 %v2952_v62, %v2920_v50 }
 0x66a   : > { %3016 = vst [vmem:[%s5283_s13 + $0x98] sm:$0xff] %v2984_v18  ;;  %v2962_v18 = vld [vmem:[%s5271_s11 + $0xe8] sm:$0xff] }
 0x66c   : > { %v2686_v53 = vpop.permute.xlu1 %2685 }
 0x66d   : > { %v2727_v41 = vmul.f32 %v2686_v53, %v2372_v17  ;;  %v2869_v58 = vpop.f32.mrf.mxu2  ;;  %v2963_v17 = vld [vmem:[%s5271_s11 + $0xf0] sm:$0xff] }
 0x66e   : > { %v2921_v5 = vmul.f32 %v5273_v19, %v2869_v58 }
 0x66f   : > { %v2744_v60 = vpack.c.bf16 %v2727_v41, %v2726_v0  ;;  %v2964_v41 = vld [vmem:[%s5271_s11 + $0xf8] sm:$0xff] }
 0x670   : > { %v2985_v23 = vadd.f32 %v2953_v14, %v2921_v5 }
 0x671   : > { %2888 = vmatmul.bf16.gmra.mxu2 %v2744_v60 }
 0x672   : > { %3017 = vst [vmem:[%s5283_s13 + $0xa0] sm:$0xff] %v2985_v23 }
 0x674   : > { %v2691_v20 = vpop.permute.xlu1 %2690 }
 0x675   : > { %v2871_v59 = vpop.f32.mrf.mxu2  ;;  %v2728_v24 = vmul.f32 %v2691_v20, %v2373_v11 }
 0x676   : > { %v2922_v28 = vmul.f32 %v5273_v19, %v2871_v59 }
 0x677   : > { %v2745_v2 = vpack.c.bf16 %v2729_v16, %v2728_v24 }
 0x678   : > { %v2986_v47 = vadd.f32 %v2954_v9, %v2922_v28 }
 0x67a   : > { %3018 = vst [vmem:[%s5283_s13 + $0xa8] sm:$0xff] %v2986_v47 }
 0x67d   : > { %v2874_v39 = vpop.f32.mrf.mxu2 }
 0x67e   : > { %v2923_v27 = vmul.f32 %v5273_v19, %v2874_v39 }
 0x680   : > { %v2987_v52 = vadd.f32 %v2955_v40, %v2923_v27 }
 0x681   : > { %2893 = vmatmul.bf16.gmra.mxu2 %v2745_v2 }
 0x682   : > { %3019 = vst [vmem:[%s5283_s13 + $0xb0] sm:$0xff] %v2987_v52 }
 0x685   : > { %v2876_v1 = vpop.f32.mrf.mxu2 }
 0x686   : > { %v2924_v30 = vmul.f32 %v5273_v19, %v2876_v1 }
 0x688   : > { %v2988_v26 = vadd.f32 %v2956_v42, %v2924_v30 }
 0x68a   : > { %3020 = vst [vmem:[%s5283_s13 + $0xb8] sm:$0xff] %v2988_v26 }
 0x698   : > { %v2879_v45 = vpop.f32.mrf.mxu2 }
 0x699   : > { %v2925_v35 = vmul.f32 %v5273_v19, %v2879_v45 }
 0x69b   : > { %v2989_v34 = vadd.f32 %v2957_v15, %v2925_v35 }
 0x69d   : > { %3021 = vst [vmem:[%s5283_s13 + $0xc0] sm:$0xff] %v2989_v34 }
 0x6a0   : > { %v2881_v6 = vpop.f32.mrf.mxu2 }
 0x6a1   : > { %v2926_v8 = vmul.f32 %v5273_v19, %v2881_v6 }
 0x6a3   : > { %v2990_v46 = vadd.f32 %v2958_v4, %v2926_v8 }
 0x6a5   : > { %3022 = vst [vmem:[%s5283_s13 + $0xc8] sm:$0xff] %v2990_v46 }
 0x6a8   : > { %v2884_v3 = vpop.f32.mrf.mxu2 }
 0x6a9   : > { %v2927_v44 = vmul.f32 %v5273_v19, %v2884_v3 }
 0x6ab   : > { %v2991_v7 = vadd.f32 %v2959_v10, %v2927_v44 }
 0x6ad   : > { %3023 = vst [vmem:[%s5283_s13 + $0xd0] sm:$0xff] %v2991_v7 }
 0x6b0   : > { %v2886_v61 = vpop.f32.mrf.mxu2 }
 0x6b1   : > { %v2928_v62 = vmul.f32 %v5273_v19, %v2886_v61 }
 0x6b3   : > { %v2992_v36 = vadd.f32 %v2960_v25, %v2928_v62 }
 0x6b5   : > { %3024 = vst [vmem:[%s5283_s13 + $0xd8] sm:$0xff] %v2992_v36 }
 0x6f4   : > { %v2889_v50 = vpop.f32.mrf.mxu2 }
 0x6f5   : > { %v2929_v22 = vmul.f32 %v5273_v19, %v2889_v50 }
 0x6f7   : > { %v2993_v33 = vadd.f32 %v2961_v13, %v2929_v22 }
 0x6f9   : > { %3025 = vst [vmem:[%s5283_s13 + $0xe0] sm:$0xff] %v2993_v33 }
 0x6fc   : > { %v2891_v49 = vpop.f32.mrf.mxu2 }
 0x6fd   : > { %v2930_v37 = vmul.f32 %v5273_v19, %v2891_v49 }
 0x6ff   : > { %v2994_v21 = vadd.f32 %v2962_v18, %v2930_v37 }
 0x701   : > { %3026 = vst [vmem:[%s5283_s13 + $0xe8] sm:$0xff] %v2994_v21 }
 0x704   : > { %v2894_v38 = vpop.f32.mrf.mxu2 }
 0x705   : > { %v2931_v29 = vmul.f32 %v5273_v19, %v2894_v38 }
 0x707   : > { %v2995_v53 = vadd.f32 %v2963_v17, %v2931_v29 }
 0x709   : > { %3027 = vst [vmem:[%s5283_s13 + $0xf0] sm:$0xff] %v2995_v53 }
 0x70c   : > { %v2896_v0 = vpop.f32.mrf.mxu2 }
 0x70d   : > { %v2932_v58 = vmul.f32 %v5273_v19, %v2896_v0 }
 0x70f   : > { %v2996_v14 = vadd.f32 %v2964_v41, %v2932_v58 }
 0x711   : > { %3028 = vst [vmem:[%s5283_s13 + $0xf8] sm:$0xff] %v2996_v14 }
 0x712 PF: > { %s17_s25 = sadd.s32 1, %s3872_s25   ;;  %s5757_s23 = smov %s3868_s24 }
 0x713   : > { %p14_p5 = scmp.ge.s32.totalorder %s17_s25, 4   ;;  %s5758_s24 = smov %s5760_s5 }
 0x715   :  { %16 = sbr.rel (!%p14_p5) target bundleno = 2 (0x2), region = 91 }

</bundles_post_ra>
